<compile_context>
chip_gen: v7x
topology: tpu7x:2x2x1
jax: 0.10.0
libtpu: 0.0.40
codegen_flags: <defaults>
</compile_context>

<pallas_src>
import functools

import numpy as np
import jax
import jax.numpy as jnp
from jax import lax
from jax.experimental import pallas as pl
from jax.experimental.pallas import tpu as pltpu


# ----------------------------- backend gating --------------------------------

def _backend_info():
    try:
        dev = jax.devices()[0]
        return dev.platform, dev.device_kind.lower()
    except Exception:
        return "cpu", ""


_PLATFORM, _DEVICE_KIND = _backend_info()
# bf16 x bf16 -> f32 hits MXU rate on TPU; off-TPU (interpret mode) the CPU
# dot thunk cannot execute it, so widen operands to f32 inside the kernel.
_MXU_DTYPE = jnp.bfloat16 if _PLATFORM == "tpu" else jnp.float32


def _vmem_limit(total_bytes):
    # Double-buffered operands + f32 accumulator + slack, clamped so the limit
    # is valid on every generation (v5e default 16 MiB, v7x physical 64 MiB).
    need = 4 * int(total_bytes) + (1 << 20)
    return int(min(max(need, 16 << 20), 32 << 20))


# ----------------------------- Pallas kernels --------------------------------

def _convt_bn_relu_kernel(a_ref, w_ref, gamma_ref, beta_ref, o_ref, *,
                          n_phases, cout, eps):
    """y = W_all @ A  (R=n_phases*Cout rows), BatchNorm(train) + ReLU, bf16 out.

    Batch statistics are computed per channel over ALL phases jointly
    (= over N*OH*OW), exactly as PyTorch training-mode BatchNorm2d.
    """
    a = a_ref[...].astype(_MXU_DTYPE)
    wm = w_ref[...].astype(_MXU_DTYPE)
    acc = jnp.dot(wm, a, preferred_element_type=jnp.float32)     # (R, M) f32

    m = acc.shape[1]
    # Single-pass stats: sum and sum-of-squares in one sweep over acc.
    rs = jnp.sum(acc, axis=1, keepdims=True)                     # (R, 1)
    rs2 = jnp.sum(acc * acc, axis=1, keepdims=True)              # (R, 1)
    s1 = rs[0:cout]
    s2 = rs2[0:cout]
    for ph in range(1, n_phases):                 # fold phase row-blocks
        s1 = s1 + rs[ph * cout:(ph + 1) * cout]
        s2 = s2 + rs2[ph * cout:(ph + 1) * cout]
    inv_count = 1.0 / float(n_phases * m)
    mean = s1 * inv_count                                        # (Cout, 1)
    var = s2 * inv_count - mean * mean            # biased, as in PyTorch BN

    scale = gamma_ref[...] * lax.rsqrt(var + eps)                # (Cout, 1)
    shift = beta_ref[...] - mean * scale
    if n_phases > 1:
        scale = jnp.concatenate([scale] * n_phases, axis=0)      # (R, 1)
        shift = jnp.concatenate([shift] * n_phases, axis=0)
    o_ref[...] = jnp.maximum(acc * scale + shift, 0.0).astype(o_ref.dtype)


def _convt_tanh_kernel(a_ref, w_ref, o_ref):
    a = a_ref[...].astype(_MXU_DTYPE)
    wm = w_ref[...].astype(_MXU_DTYPE)
    acc = jnp.dot(wm, a, preferred_element_type=jnp.float32)
    o_ref[...] = jnp.tanh(acc)


# ----------------------------- pallas_call wrappers ---------------------------

def fused_convt_bn_relu(a, w_all, gamma, beta, *, cout, n_phases, eps=1e-5):
    r, m = w_all.shape[0], a.shape[1]
    total = (a.size * a.dtype.itemsize + w_all.size * w_all.dtype.itemsize
             + r * m * 6)  # bf16 output + f32 accumulator
    # TODO(synk): at production DCGAN sizes (ngf=64, batch>=128) this single
    # VMEM block stops fitting (first on v7x, 64 MiB physical); that regime
    # needs a grid over M with cross-tile sum/sumsq accumulators and a finalize
    # only after the full reduction (two-pass BN), not this fused single block.
    return pl.pallas_call(
        functools.partial(_convt_bn_relu_kernel,
                          n_phases=n_phases, cout=cout, eps=eps),
        out_shape=jax.ShapeDtypeStruct((r, m), jnp.bfloat16),
        compiler_params=pltpu.CompilerParams(
            vmem_limit_bytes=_vmem_limit(total)),
    )(a, w_all, gamma, beta)


def _pick_lane_tile(r, k, m):
    """Lane-tile for the gridded tanh layer; None -> single block."""
    if _PLATFORM != "tpu" or m % 256 != 0:
        return None
    multi_core = any(tag in _DEVICE_KIND for tag in ("v7", "v4", "v5p"))
    single_block_bytes = 2 * (k * m + r * k) + 4 * r * m
    if not multi_core and single_block_bytes <= (8 << 20):
        # Single-TC v5e/v6e: extra grid steps are pure per-step overhead here.
        return None
    min_steps = 4 if multi_core else 2        # >=2 steps per TensorCore on v7x
    for tm in (512, 256, 128):
        if m % tm == 0 and m // tm >= min_steps:
            return tm
    return None


def fused_convt_tanh(a, w_all):
    k, m = a.shape
    r = w_all.shape[0]
    total = (a.size * a.dtype.itemsize + w_all.size * w_all.dtype.itemsize
             + r * m * 4)
    vmem = _vmem_limit(total)
    out_shape = jax.ShapeDtypeStruct((r, m), jnp.float32)
    tm = _pick_lane_tile(r, k, m)
    if tm is None:
        return pl.pallas_call(
            _convt_tanh_kernel, out_shape=out_shape,
            compiler_params=pltpu.CompilerParams(vmem_limit_bytes=vmem),
        )(a, w_all)
    return pl.pallas_call(
        _convt_tanh_kernel,
        out_shape=out_shape,
        grid_spec=pltpu.PrefetchScalarGridSpec(
            num_scalar_prefetch=0,
            grid=(m // tm,),
            in_specs=[pl.BlockSpec((k, tm), lambda j: (0, j)),
                      pl.BlockSpec((r, k), lambda j: (0, 0))],
            out_specs=pl.BlockSpec((r, tm), lambda j: (0, j))),
        compiler_params=pltpu.CompilerParams(
            dimension_semantics=("parallel",), vmem_limit_bytes=vmem),
    )(a, w_all)


# ------------------- phase-decomposed ConvTranspose2d -------------------------
#
# ConvTranspose2d (stride s, padding p, kernel k, no bias):
#   out[n, co, s*i+r, s*j+c] = sum_{ci, dy in D_r, dx in D_c}
#       x[n, ci, i+dy, j+dx] * W[ci, co, kh(r,dy), kw(c,dx)]
# where for output phase r the contributing input offsets are
# D_r = {q_r-(t_r-1), ..., q_r} and kh(r,d) = k0_r + s*(q_r - d).
# One shared patch matrix is built over the UNION of offsets of all phases;
# taps a phase does not use get zero weight rows in W_all.

def _dim_plan(k, s, p, in_size):
    out_size = (in_size - 1) * s - 2 * p + k
    phases = []
    for r in range(s):
        k0 = (r + p) % s
        q = (r + p) // s
        t = (k - k0 + s - 1) // s
        size = (out_size - r + s - 1) // s
        phases.append(dict(k0=k0, q=q, t=t, size=size))
    sizes = {ph["size"] for ph in phases}
    if len(sizes) != 1 or s * phases[0]["size"] != out_size:
        # TODO(synk): non-uniform output-phase extents (other k/s/p combos)
        # would need the strided-scatter re-interleave; not needed here.
        raise NotImplementedError("non-uniform output phases")
    dmin = min(ph["q"] - (ph["t"] - 1) for ph in phases)
    dmax = max(ph["q"] for ph in phases)
    return phases, list(range(dmin, dmax + 1)), phases[0]["size"], out_size


def _tap(phase, d, s):
    """Kernel tap index used by `phase` at input offset d, or None."""
    if phase["q"] - (phase["t"] - 1) <= d <= phase["q"]:
        return phase["k0"] + s * (phase["q"] - d)
    return None


def _build_patch_matrix(x_nhwc, offs_h, offs_w, hp, wp):
    """Shared (Ku_h*Ku_w*Cin, N*hp*wp) bf16 patch matrix over the tap union."""
    n, h, w, cin = x_nhwc.shape
    pad_t = max(0, -offs_h[0])
    pad_b = max(0, hp - 1 + offs_h[-1] - (h - 1))
    pad_l = max(0, -offs_w[0])
    pad_r = max(0, wp - 1 + offs_w[-1] - (w - 1))
    xp = jnp.pad(x_nhwc.astype(jnp.bfloat16),
                 ((0, 0), (pad_t, pad_b), (pad_l, pad_r), (0, 0)))
    m = n * hp * wp
    cols = []
    for dy in offs_h:
        ry = dy + pad_t
        for dx in offs_w:
            rx = dx + pad_l
            win = xp[:, ry:ry + hp, rx:rx + wp, :]             # (N,hp,wp,Cin)
            cols.append(jnp.transpose(win, (3, 0, 1, 2)).reshape(cin, m))
    return jnp.concatenate(cols, axis=0)                        # (Ku^2*Cin, M)


def _build_weight_matrix(w, s, phases_h, phases_w, offs_h, offs_w):
    """(s^2*Cout, Ku^2*Cin) bf16; row block (ry,rx) holds that phase's taps."""
    cin, cout = w.shape[0], w.shape[1]
    zeros = jnp.zeros((cout, cin), w.dtype)
    rows = []
    for ph in phases_h:
        for pw in phases_w:
            blocks = []
            for dy in offs_h:
                kh = _tap(ph, dy, s)
                for dx in offs_w:
                    kw = _tap(pw, dx, s)
                    if kh is None or kw is None:
                        blocks.append(zeros)
                    else:
                        blocks.append(jnp.transpose(w[:, :, kh, kw]))  # (Cout,Cin)
            rows.append(jnp.concatenate(blocks, axis=1))        # (Cout, K)
    return jnp.concatenate(rows, axis=0).astype(jnp.bfloat16)   # (s^2*Cout, K)


def _run_layer(x_nhwc, w, gamma, beta, k, s, p, has_bn):
    n = x_nhwc.shape[0]
    cout = w.shape[1]
    phases_h, offs_h, hp, oh = _dim_plan(k, s, p, x_nhwc.shape[1])
    phases_w, offs_w, wp, ow = _dim_plan(k, s, p, x_nhwc.shape[2])
    a = _build_patch_matrix(x_nhwc, offs_h, offs_w, hp, wp)
    w_all = _build_weight_matrix(w, s, phases_h, phases_w, offs_h, offs_w)
    if has_bn:
        y = fused_convt_bn_relu(a, w_all, gamma, beta, cout=cout,
                                n_phases=s * s)                 # bf16 (R, M)
    else:
        y = fused_convt_tanh(a, w_all)                          # f32  (R, M)
    # Re-interleave phases: (s*s*Cout, N*hp*wp) -> (N, OH, OW, Cout) with one
    # reshape/transpose/reshape (no zeros buffer, no strided scatters).
    y6 = y.reshape(s, s, cout, n, hp, wp)
    return jnp.transpose(y6, (3, 4, 0, 5, 1, 2)).reshape(n, oh, ow, cout)


# ----------------------------- Generator model -------------------------------

# (kernel, stride, padding, has_bn_relu)
LAYER_CFG = [
    (4, 1, 0, True),
    (4, 2, 1, True),
    (4, 2, 1, True),
    (4, 2, 1, True),
    (5, 3, 1, False),   # final ConvTranspose2d -> Tanh
]


def init_generator_params(key, input_size, ngf, output_channels=3):
    chans = [input_size, ngf * 8, ngf * 4, ngf * 2, ngf, output_channels]
    params = {}
    for i, (k, s, p, has_bn) in enumerate(LAYER_CFG):
        key, wk = jax.random.split(key)
        cin, cout = chans[i], chans[i + 1]
        params[f"w{i}"] = 0.02 * jax.random.normal(wk, (cin, cout, k, k),
                                                   jnp.float32)
        if has_bn:
            # PyTorch BatchNorm2d default affine init: weight=1, bias=0.
            params[f"gamma{i}"] = jnp.ones((cout, 1), jnp.float32)
            params[f"beta{i}"] = jnp.zeros((cout, 1), jnp.float32)
    return params
    # TODO(synk): BatchNorm running_mean/running_var updates are a training
    # side-effect and are not tracked; forward math uses batch statistics as
    # PyTorch does in default (training) mode.


def generator_forward(params, x_nchw):
    x = jnp.transpose(x_nchw, (0, 2, 3, 1)).astype(jnp.float32)   # -> NHWC
    for i, (k, s, p, has_bn) in enumerate(LAYER_CFG):
        x = _run_layer(x, params[f"w{i}"],
                       params.get(f"gamma{i}"), params.get(f"beta{i}"),
                       k, s, p, has_bn)
    return jnp.transpose(x, (0, 3, 1, 2)).astype(jnp.float32)     # -> NCHW


# Pure-JAX reference (same math via XLA conv, same bf16-quantized operands and
# f32 accumulation, so the comparison is apples-to-apples).
def generator_reference(params, x_nchw):
    x = jnp.transpose(x_nchw, (0, 2, 3, 1)).astype(jnp.float32)
    for i, (k, s, p, has_bn) in enumerate(LAYER_CFG):
        w = params[f"w{i}"].astype(jnp.bfloat16).astype(jnp.float32)
        xq = x.astype(jnp.bfloat16).astype(jnp.float32)
        wf = jnp.transpose(w[:, :, ::-1, ::-1], (2, 3, 0, 1))       # HWIO
        pad = k - 1 - p
        y = lax.conv_general_dilated(
            xq, wf, window_strides=(1, 1),
            padding=[(pad, pad), (pad, pad)],
            lhs_dilation=(s, s),
            dimension_numbers=("NHWC", "HWIO", "NHWC"))
        if has_bn:
            mean = jnp.mean(y, axis=(0, 1, 2), keepdims=True)
            var = jnp.mean((y - mean) ** 2, axis=(0, 1, 2), keepdims=True)
            y = (y - mean) * lax.rsqrt(var + 1e-5)
            y = y * params[f"gamma{i}"].reshape(1, 1, 1, -1) \
                + params[f"beta{i}"].reshape(1, 1, 1, -1)
            y = jnp.maximum(y, 0.0)
        else:
            y = jnp.tanh(y)
        x = y
    return jnp.transpose(x, (0, 3, 1, 2))


if __name__ == "__main__":
    key = jax.random.PRNGKey(0)
    pkey, xkey = jax.random.split(key)

    batch, input_size, ngf = 2, 16, 8            # small DCGAN config
    params = init_generator_params(pkey, input_size, ngf, output_channels=3)
    x = jax.random.normal(xkey, (batch, input_size, 1, 1), jnp.float32)

    fwd = jax.jit(generator_forward)
    out = jax.block_until_ready(fwd(params, x))
    assert out.shape == (batch, 3, 96, 96), out.shape

    ref = jax.block_until_ready(jax.jit(generator_reference)(params, x))
    # Both paths feed bf16-quantized post-BN activations into every conv;
    # residual differences come from f32 summation order occasionally flipping
    # a bf16 rounding boundary, amplified by per-layer BatchNorm (~1e-3 level
    # on the tanh output).  1e-2 keeps comfortable margin while still catching
    # real math errors on a [-1, 1] output.
    np.testing.assert_allclose(np.asarray(out), np.asarray(ref),
                               atol=1e-2, rtol=1e-2)
    print("KERNEL_OK")
</pallas_src>

<mosaic_0001>
module attributes {stable_mosaic.version = 11 : i64} {
  func.func @_convt_bn_relu_kernel(%arg0: memref<256x32xbf16, #tpu.memory_space<vmem>>, %arg1: memref<64x256xbf16, #tpu.memory_space<vmem>>, %arg2: memref<64x1xf32, #tpu.memory_space<vmem>>, %arg3: memref<64x1xf32, #tpu.memory_space<vmem>>, %arg4: memref<64x32xbf16, #tpu.memory_space<vmem>>) attributes {dimension_semantics = [], scalar_prefetch = 0 : i64, scratch_operands = 0 : i64, tpu.core_type = #tpu.core_type<tc>} {
    %c0 = arith.constant 0 : index
    %c0_0 = arith.constant 0 : index
    %0 = vector.load %arg0[%c0, %c0_0] : memref<256x32xbf16, #tpu.memory_space<vmem>>, vector<256x32xbf16>
    %1 = arith.extf %0 : vector<256x32xbf16> to vector<256x32xf32>
    %c0_1 = arith.constant 0 : index
    %c0_2 = arith.constant 0 : index
    %2 = vector.load %arg1[%c0_1, %c0_2] : memref<64x256xbf16, #tpu.memory_space<vmem>>, vector<64x256xbf16>
    %3 = arith.extf %2 : vector<64x256xbf16> to vector<64x256xf32>
    %cst = arith.constant dense<0.000000e+00> : vector<64x32xf32>
    %4 = tpu.matmul %3, %1, %cst {dimension_numbers = #tpu.dot_dimension_numbers<[1], [0], [0], [1], [0, 0, 1, 1], [], []>} : vector<64x256xf32>, vector<256x32xf32>, vector<64x32xf32> -> vector<64x32xf32>
    %cst_3 = arith.constant dense<0.000000e+00> : vector<64xf32>
    %5 = vector.multi_reduction <add>, %4, %cst_3 [1] : vector<64x32xf32> to vector<64xf32>
    %6 = vector.shape_cast %5 : vector<64xf32> to vector<64x1xf32>
    %7 = arith.mulf %4, %4 : vector<64x32xf32>
    %cst_4 = arith.constant dense<0.000000e+00> : vector<64xf32>
    %8 = vector.multi_reduction <add>, %7, %cst_4 [1] : vector<64x32xf32> to vector<64xf32>
    %9 = vector.shape_cast %8 : vector<64xf32> to vector<64x1xf32>
    %cst_5 = arith.constant 3.125000e-02 : f32
    %10 = vector.broadcast %cst_5 : f32 to vector<64x1xf32>
    %11 = arith.mulf %6, %10 : vector<64x1xf32>
    %cst_6 = arith.constant 3.125000e-02 : f32
    %12 = vector.broadcast %cst_6 : f32 to vector<64x1xf32>
    %13 = arith.mulf %9, %12 : vector<64x1xf32>
    %14 = arith.mulf %11, %11 : vector<64x1xf32>
    %15 = arith.subf %13, %14 : vector<64x1xf32>
    %c0_7 = arith.constant 0 : index
    %c0_8 = arith.constant 0 : index
    %16 = vector.load %arg2[%c0_7, %c0_8] : memref<64x1xf32, #tpu.memory_space<vmem>>, vector<64x1xf32>
    %cst_9 = arith.constant 9.99999974E-6 : f32
    %17 = vector.broadcast %cst_9 : f32 to vector<64x1xf32>
    %18 = arith.addf %15, %17 : vector<64x1xf32>
    %19 = math.rsqrt %18 : vector<64x1xf32>
    %20 = arith.mulf %16, %19 : vector<64x1xf32>
    %c0_10 = arith.constant 0 : index
    %c0_11 = arith.constant 0 : index
    %21 = vector.load %arg3[%c0_10, %c0_11] : memref<64x1xf32, #tpu.memory_space<vmem>>, vector<64x1xf32>
    %22 = arith.mulf %11, %20 : vector<64x1xf32>
    %23 = arith.subf %21, %22 : vector<64x1xf32>
    %24 = vector.broadcast %20 : vector<64x1xf32> to vector<64x32xf32>
    %25 = arith.mulf %4, %24 : vector<64x32xf32>
    %26 = vector.broadcast %23 : vector<64x1xf32> to vector<64x32xf32>
    %27 = arith.addf %25, %26 : vector<64x32xf32>
    %cst_12 = arith.constant 0.000000e+00 : f32
    %28 = vector.broadcast %cst_12 : f32 to vector<64x32xf32>
    %29 = arith.maximumf %27, %28 : vector<64x32xf32>
    %30 = arith.truncf %29 : vector<64x32xf32> to vector<64x32xbf16>
    %c0_13 = arith.constant 0 : index
    %c0_14 = arith.constant 0 : index
    %31 = vector.load %arg4[%c0_13, %c0_14] : memref<64x32xbf16, #tpu.memory_space<vmem>>, vector<64x32xbf16>
    tpu.vector_store %arg4[%c0_13, %c0_14], %30 {strides = array<i32>} : memref<64x32xbf16, #tpu.memory_space<vmem>>, vector<64x32xbf16>,
    return
  }
}

module attributes {stable_mosaic.version = 11 : i64} {
  func.func @_convt_bn_relu_kernel(%arg0: memref<576x32xbf16, #tpu.memory_space<vmem>>, %arg1: memref<128x576xbf16, #tpu.memory_space<vmem>>, %arg2: memref<32x1xf32, #tpu.memory_space<vmem>>, %arg3: memref<32x1xf32, #tpu.memory_space<vmem>>, %arg4: memref<128x32xbf16, #tpu.memory_space<vmem>>) attributes {dimension_semantics = [], scalar_prefetch = 0 : i64, scratch_operands = 0 : i64, tpu.core_type = #tpu.core_type<tc>} {
    %c0 = arith.constant 0 : index
    %c0_0 = arith.constant 0 : index
    %0 = vector.load %arg0[%c0, %c0_0] : memref<576x32xbf16, #tpu.memory_space<vmem>>, vector<576x32xbf16>
    %1 = arith.extf %0 : vector<576x32xbf16> to vector<576x32xf32>
    %c0_1 = arith.constant 0 : index
    %c0_2 = arith.constant 0 : index
    %2 = vector.load %arg1[%c0_1, %c0_2] : memref<128x576xbf16, #tpu.memory_space<vmem>>, vector<128x576xbf16>
    %3 = arith.extf %2 : vector<128x576xbf16> to vector<128x576xf32>
    %cst = arith.constant dense<0.000000e+00> : vector<128x32xf32>
    %4 = tpu.matmul %3, %1, %cst {dimension_numbers = #tpu.dot_dimension_numbers<[1], [0], [0], [1], [0, 0, 1, 1], [], []>} : vector<128x576xf32>, vector<576x32xf32>, vector<128x32xf32> -> vector<128x32xf32>
    %cst_3 = arith.constant dense<0.000000e+00> : vector<128xf32>
    %5 = vector.multi_reduction <add>, %4, %cst_3 [1] : vector<128x32xf32> to vector<128xf32>
    %6 = vector.shape_cast %5 : vector<128xf32> to vector<128x1xf32>
    %7 = arith.mulf %4, %4 : vector<128x32xf32>
    %cst_4 = arith.constant dense<0.000000e+00> : vector<128xf32>
    %8 = vector.multi_reduction <add>, %7, %cst_4 [1] : vector<128x32xf32> to vector<128xf32>
    %9 = vector.shape_cast %8 : vector<128xf32> to vector<128x1xf32>
    %10 = vector.extract_strided_slice %6 {offsets = [0, 0], sizes = [32, 1], strides = [1, 1]} : vector<128x1xf32> to vector<32x1xf32>
    %11 = vector.extract_strided_slice %9 {offsets = [0, 0], sizes = [32, 1], strides = [1, 1]} : vector<128x1xf32> to vector<32x1xf32>
    %12 = vector.extract_strided_slice %6 {offsets = [32, 0], sizes = [32, 1], strides = [1, 1]} : vector<128x1xf32> to vector<32x1xf32>
    %13 = arith.addf %10, %12 : vector<32x1xf32>
    %14 = vector.extract_strided_slice %9 {offsets = [32, 0], sizes = [32, 1], strides = [1, 1]} : vector<128x1xf32> to vector<32x1xf32>
    %15 = arith.addf %11, %14 : vector<32x1xf32>
    %16 = vector.extract_strided_slice %6 {offsets = [64, 0], sizes = [32, 1], strides = [1, 1]} : vector<128x1xf32> to vector<32x1xf32>
    %17 = arith.addf %13, %16 : vector<32x1xf32>
    %18 = vector.extract_strided_slice %9 {offsets = [64, 0], sizes = [32, 1], strides = [1, 1]} : vector<128x1xf32> to vector<32x1xf32>
    %19 = arith.addf %15, %18 : vector<32x1xf32>
    %20 = vector.extract_strided_slice %6 {offsets = [96, 0], sizes = [32, 1], strides = [1, 1]} : vector<128x1xf32> to vector<32x1xf32>
    %21 = arith.addf %17, %20 : vector<32x1xf32>
    %22 = vector.extract_strided_slice %9 {offsets = [96, 0], sizes = [32, 1], strides = [1, 1]} : vector<128x1xf32> to vector<32x1xf32>
    %23 = arith.addf %19, %22 : vector<32x1xf32>
    %cst_5 = arith.constant 7.812500e-03 : f32
    %24 = vector.broadcast %cst_5 : f32 to vector<32x1xf32>
    %25 = arith.mulf %21, %24 : vector<32x1xf32>
    %cst_6 = arith.constant 7.812500e-03 : f32
    %26 = vector.broadcast %cst_6 : f32 to vector<32x1xf32>
    %27 = arith.mulf %23, %26 : vector<32x1xf32>
    %28 = arith.mulf %25, %25 : vector<32x1xf32>
    %29 = arith.subf %27, %28 : vector<32x1xf32>
    %c0_7 = arith.constant 0 : index
    %c0_8 = arith.constant 0 : index
    %30 = vector.load %arg2[%c0_7, %c0_8] : memref<32x1xf32, #tpu.memory_space<vmem>>, vector<32x1xf32>
    %cst_9 = arith.constant 9.99999974E-6 : f32
    %31 = vector.broadcast %cst_9 : f32 to vector<32x1xf32>
    %32 = arith.addf %29, %31 : vector<32x1xf32>
    %33 = math.rsqrt %32 : vector<32x1xf32>
    %34 = arith.mulf %30, %33 : vector<32x1xf32>
    %c0_10 = arith.constant 0 : index
    %c0_11 = arith.constant 0 : index
    %35 = vector.load %arg3[%c0_10, %c0_11] : memref<32x1xf32, #tpu.memory_space<vmem>>, vector<32x1xf32>
    %36 = arith.mulf %25, %34 : vector<32x1xf32>
    %37 = arith.subf %35, %36 : vector<32x1xf32>
    %38 = tpu.concatenate %34, %34, %34, %34 in 0 : vector<32x1xf32>, vector<32x1xf32>, vector<32x1xf32>, vector<32x1xf32> -> vector<128x1xf32>
    %39 = tpu.concatenate %37, %37, %37, %37 in 0 : vector<32x1xf32>, vector<32x1xf32>, vector<32x1xf32>, vector<32x1xf32> -> vector<128x1xf32>
    %40 = vector.broadcast %38 : vector<128x1xf32> to vector<128x32xf32>
    %41 = arith.mulf %4, %40 : vector<128x32xf32>
    %42 = vector.broadcast %39 : vector<128x1xf32> to vector<128x32xf32>
    %43 = arith.addf %41, %42 : vector<128x32xf32>
    %cst_12 = arith.constant 0.000000e+00 : f32
    %44 = vector.broadcast %cst_12 : f32 to vector<128x32xf32>
    %45 = arith.maximumf %43, %44 : vector<128x32xf32>
    %46 = arith.truncf %45 : vector<128x32xf32> to vector<128x32xbf16>
    %c0_13 = arith.constant 0 : index
    %c0_14 = arith.constant 0 : index
    %47 = vector.load %arg4[%c0_13, %c0_14] : memref<128x32xbf16, #tpu.memory_space<vmem>>, vector<128x32xbf16>
    tpu.vector_store %arg4[%c0_13, %c0_14], %46 {strides = array<i32>} : memref<128x32xbf16, #tpu.memory_space<vmem>>, vector<128x32xbf16>,
    return
  }
}

module attributes {stable_mosaic.version = 11 : i64} {
  func.func @_convt_bn_relu_kernel(%arg0: memref<288x128xbf16, #tpu.memory_space<vmem>>, %arg1: memref<64x288xbf16, #tpu.memory_space<vmem>>, %arg2: memref<16x1xf32, #tpu.memory_space<vmem>>, %arg3: memref<16x1xf32, #tpu.memory_space<vmem>>, %arg4: memref<64x128xbf16, #tpu.memory_space<vmem>>) attributes {dimension_semantics = [], scalar_prefetch = 0 : i64, scratch_operands = 0 : i64, tpu.core_type = #tpu.core_type<tc>} {
    %c0 = arith.constant 0 : index
    %c0_0 = arith.constant 0 : index
    %0 = vector.load %arg0[%c0, %c0_0] : memref<288x128xbf16, #tpu.memory_space<vmem>>, vector<288x128xbf16>
    %1 = arith.extf %0 : vector<288x128xbf16> to vector<288x128xf32>
    %c0_1 = arith.constant 0 : index
    %c0_2 = arith.constant 0 : index
    %2 = vector.load %arg1[%c0_1, %c0_2] : memref<64x288xbf16, #tpu.memory_space<vmem>>, vector<64x288xbf16>
    %3 = arith.extf %2 : vector<64x288xbf16> to vector<64x288xf32>
    %cst = arith.constant dense<0.000000e+00> : vector<64x128xf32>
    %4 = tpu.matmul %3, %1, %cst {dimension_numbers = #tpu.dot_dimension_numbers<[1], [0], [0], [1], [0, 0, 1, 1], [], []>} : vector<64x288xf32>, vector<288x128xf32>, vector<64x128xf32> -> vector<64x128xf32>
    %cst_3 = arith.constant dense<0.000000e+00> : vector<64xf32>
    %5 = vector.multi_reduction <add>, %4, %cst_3 [1] : vector<64x128xf32> to vector<64xf32>
    %6 = vector.shape_cast %5 : vector<64xf32> to vector<64x1xf32>
    %7 = arith.mulf %4, %4 : vector<64x128xf32>
    %cst_4 = arith.constant dense<0.000000e+00> : vector<64xf32>
    %8 = vector.multi_reduction <add>, %7, %cst_4 [1] : vector<64x128xf32> to vector<64xf32>
    %9 = vector.shape_cast %8 : vector<64xf32> to vector<64x1xf32>
    %10 = vector.extract_strided_slice %6 {offsets = [0, 0], sizes = [16, 1], strides = [1, 1]} : vector<64x1xf32> to vector<16x1xf32>
    %11 = vector.extract_strided_slice %9 {offsets = [0, 0], sizes = [16, 1], strides = [1, 1]} : vector<64x1xf32> to vector<16x1xf32>
    %12 = vector.extract_strided_slice %6 {offsets = [16, 0], sizes = [16, 1], strides = [1, 1]} : vector<64x1xf32> to vector<16x1xf32>
    %13 = arith.addf %10, %12 : vector<16x1xf32>
    %14 = vector.extract_strided_slice %9 {offsets = [16, 0], sizes = [16, 1], strides = [1, 1]} : vector<64x1xf32> to vector<16x1xf32>
    %15 = arith.addf %11, %14 : vector<16x1xf32>
    %16 = vector.extract_strided_slice %6 {offsets = [32, 0], sizes = [16, 1], strides = [1, 1]} : vector<64x1xf32> to vector<16x1xf32>
    %17 = arith.addf %13, %16 : vector<16x1xf32>
    %18 = vector.extract_strided_slice %9 {offsets = [32, 0], sizes = [16, 1], strides = [1, 1]} : vector<64x1xf32> to vector<16x1xf32>
    %19 = arith.addf %15, %18 : vector<16x1xf32>
    %20 = vector.extract_strided_slice %6 {offsets = [48, 0], sizes = [16, 1], strides = [1, 1]} : vector<64x1xf32> to vector<16x1xf32>
    %21 = arith.addf %17, %20 : vector<16x1xf32>
    %22 = vector.extract_strided_slice %9 {offsets = [48, 0], sizes = [16, 1], strides = [1, 1]} : vector<64x1xf32> to vector<16x1xf32>
    %23 = arith.addf %19, %22 : vector<16x1xf32>
    %cst_5 = arith.constant 0.001953125 : f32
    %24 = vector.broadcast %cst_5 : f32 to vector<16x1xf32>
    %25 = arith.mulf %21, %24 : vector<16x1xf32>
    %cst_6 = arith.constant 0.001953125 : f32
    %26 = vector.broadcast %cst_6 : f32 to vector<16x1xf32>
    %27 = arith.mulf %23, %26 : vector<16x1xf32>
    %28 = arith.mulf %25, %25 : vector<16x1xf32>
    %29 = arith.subf %27, %28 : vector<16x1xf32>
    %c0_7 = arith.constant 0 : index
    %c0_8 = arith.constant 0 : index
    %30 = vector.load %arg2[%c0_7, %c0_8] : memref<16x1xf32, #tpu.memory_space<vmem>>, vector<16x1xf32>
    %cst_9 = arith.constant 9.99999974E-6 : f32
    %31 = vector.broadcast %cst_9 : f32 to vector<16x1xf32>
    %32 = arith.addf %29, %31 : vector<16x1xf32>
    %33 = math.rsqrt %32 : vector<16x1xf32>
    %34 = arith.mulf %30, %33 : vector<16x1xf32>
    %c0_10 = arith.constant 0 : index
    %c0_11 = arith.constant 0 : index
    %35 = vector.load %arg3[%c0_10, %c0_11] : memref<16x1xf32, #tpu.memory_space<vmem>>, vector<16x1xf32>
    %36 = arith.mulf %25, %34 : vector<16x1xf32>
    %37 = arith.subf %35, %36 : vector<16x1xf32>
    %38 = tpu.concatenate %34, %34, %34, %34 in 0 : vector<16x1xf32>, vector<16x1xf32>, vector<16x1xf32>, vector<16x1xf32> -> vector<64x1xf32>
    %39 = tpu.concatenate %37, %37, %37, %37 in 0 : vector<16x1xf32>, vector<16x1xf32>, vector<16x1xf32>, vector<16x1xf32> -> vector<64x1xf32>
    %40 = vector.broadcast %38 : vector<64x1xf32> to vector<64x128xf32>
    %41 = arith.mulf %4, %40 : vector<64x128xf32>
    %42 = vector.broadcast %39 : vector<64x1xf32> to vector<64x128xf32>
    %43 = arith.addf %41, %42 : vector<64x128xf32>
    %cst_12 = arith.constant 0.000000e+00 : f32
    %44 = vector.broadcast %cst_12 : f32 to vector<64x128xf32>
    %45 = arith.maximumf %43, %44 : vector<64x128xf32>
    %46 = arith.truncf %45 : vector<64x128xf32> to vector<64x128xbf16>
    %c0_13 = arith.constant 0 : index
    %c0_14 = arith.constant 0 : index
    %47 = vector.load %arg4[%c0_13, %c0_14] : memref<64x128xbf16, #tpu.memory_space<vmem>>, vector<64x128xbf16>
    tpu.vector_store %arg4[%c0_13, %c0_14], %46 {strides = array<i32>} : memref<64x128xbf16, #tpu.memory_space<vmem>>, vector<64x128xbf16>,
    return
  }
}

module attributes {stable_mosaic.version = 11 : i64} {
  func.func @_convt_bn_relu_kernel(%arg0: memref<144x512xbf16, #tpu.memory_space<vmem>>, %arg1: memref<32x144xbf16, #tpu.memory_space<vmem>>, %arg2: memref<8x1xf32, #tpu.memory_space<vmem>>, %arg3: memref<8x1xf32, #tpu.memory_space<vmem>>, %arg4: memref<32x512xbf16, #tpu.memory_space<vmem>>) attributes {dimension_semantics = [], scalar_prefetch = 0 : i64, scratch_operands = 0 : i64, tpu.core_type = #tpu.core_type<tc>} {
    %c0 = arith.constant 0 : index
    %c0_0 = arith.constant 0 : index
    %0 = vector.load %arg0[%c0, %c0_0] : memref<144x512xbf16, #tpu.memory_space<vmem>>, vector<144x512xbf16>
    %1 = arith.extf %0 : vector<144x512xbf16> to vector<144x512xf32>
    %c0_1 = arith.constant 0 : index
    %c0_2 = arith.constant 0 : index
    %2 = vector.load %arg1[%c0_1, %c0_2] : memref<32x144xbf16, #tpu.memory_space<vmem>>, vector<32x144xbf16>
    %3 = arith.extf %2 : vector<32x144xbf16> to vector<32x144xf32>
    %cst = arith.constant dense<0.000000e+00> : vector<32x512xf32>
    %4 = tpu.matmul %3, %1, %cst {dimension_numbers = #tpu.dot_dimension_numbers<[1], [0], [0], [1], [0, 0, 1, 1], [], []>} : vector<32x144xf32>, vector<144x512xf32>, vector<32x512xf32> -> vector<32x512xf32>
    %cst_3 = arith.constant dense<0.000000e+00> : vector<32xf32>
    %5 = vector.multi_reduction <add>, %4, %cst_3 [1] : vector<32x512xf32> to vector<32xf32>
    %6 = vector.shape_cast %5 : vector<32xf32> to vector<32x1xf32>
    %7 = arith.mulf %4, %4 : vector<32x512xf32>
    %cst_4 = arith.constant dense<0.000000e+00> : vector<32xf32>
    %8 = vector.multi_reduction <add>, %7, %cst_4 [1] : vector<32x512xf32> to vector<32xf32>
    %9 = vector.shape_cast %8 : vector<32xf32> to vector<32x1xf32>
    %10 = vector.extract_strided_slice %6 {offsets = [0, 0], sizes = [8, 1], strides = [1, 1]} : vector<32x1xf32> to vector<8x1xf32>
    %11 = vector.extract_strided_slice %9 {offsets = [0, 0], sizes = [8, 1], strides = [1, 1]} : vector<32x1xf32> to vector<8x1xf32>
    %12 = vector.extract_strided_slice %6 {offsets = [8, 0], sizes = [8, 1], strides = [1, 1]} : vector<32x1xf32> to vector<8x1xf32>
    %13 = arith.addf %10, %12 : vector<8x1xf32>
    %14 = vector.extract_strided_slice %9 {offsets = [8, 0], sizes = [8, 1], strides = [1, 1]} : vector<32x1xf32> to vector<8x1xf32>
    %15 = arith.addf %11, %14 : vector<8x1xf32>
    %16 = vector.extract_strided_slice %6 {offsets = [16, 0], sizes = [8, 1], strides = [1, 1]} : vector<32x1xf32> to vector<8x1xf32>
    %17 = arith.addf %13, %16 : vector<8x1xf32>
    %18 = vector.extract_strided_slice %9 {offsets = [16, 0], sizes = [8, 1], strides = [1, 1]} : vector<32x1xf32> to vector<8x1xf32>
    %19 = arith.addf %15, %18 : vector<8x1xf32>
    %20 = vector.extract_strided_slice %6 {offsets = [24, 0], sizes = [8, 1], strides = [1, 1]} : vector<32x1xf32> to vector<8x1xf32>
    %21 = arith.addf %17, %20 : vector<8x1xf32>
    %22 = vector.extract_strided_slice %9 {offsets = [24, 0], sizes = [8, 1], strides = [1, 1]} : vector<32x1xf32> to vector<8x1xf32>
    %23 = arith.addf %19, %22 : vector<8x1xf32>
    %cst_5 = arith.constant 4.8828125E-4 : f32
    %24 = vector.broadcast %cst_5 : f32 to vector<8x1xf32>
    %25 = arith.mulf %21, %24 : vector<8x1xf32>
    %cst_6 = arith.constant 4.8828125E-4 : f32
    %26 = vector.broadcast %cst_6 : f32 to vector<8x1xf32>
    %27 = arith.mulf %23, %26 : vector<8x1xf32>
    %28 = arith.mulf %25, %25 : vector<8x1xf32>
    %29 = arith.subf %27, %28 : vector<8x1xf32>
    %c0_7 = arith.constant 0 : index
    %c0_8 = arith.constant 0 : index
    %30 = vector.load %arg2[%c0_7, %c0_8] : memref<8x1xf32, #tpu.memory_space<vmem>>, vector<8x1xf32>
    %cst_9 = arith.constant 9.99999974E-6 : f32
    %31 = vector.broadcast %cst_9 : f32 to vector<8x1xf32>
    %32 = arith.addf %29, %31 : vector<8x1xf32>
    %33 = math.rsqrt %32 : vector<8x1xf32>
    %34 = arith.mulf %30, %33 : vector<8x1xf32>
    %c0_10 = arith.constant 0 : index
    %c0_11 = arith.constant 0 : index
    %35 = vector.load %arg3[%c0_10, %c0_11] : memref<8x1xf32, #tpu.memory_space<vmem>>, vector<8x1xf32>
    %36 = arith.mulf %25, %34 : vector<8x1xf32>
    %37 = arith.subf %35, %36 : vector<8x1xf32>
    %38 = tpu.concatenate %34, %34, %34, %34 in 0 : vector<8x1xf32>, vector<8x1xf32>, vector<8x1xf32>, vector<8x1xf32> -> vector<32x1xf32>
    %39 = tpu.concatenate %37, %37, %37, %37 in 0 : vector<8x1xf32>, vector<8x1xf32>, vector<8x1xf32>, vector<8x1xf32> -> vector<32x1xf32>
    %40 = vector.broadcast %38 : vector<32x1xf32> to vector<32x512xf32>
    %41 = arith.mulf %4, %40 : vector<32x512xf32>
    %42 = vector.broadcast %39 : vector<32x1xf32> to vector<32x512xf32>
    %43 = arith.addf %41, %42 : vector<32x512xf32>
    %cst_12 = arith.constant 0.000000e+00 : f32
    %44 = vector.broadcast %cst_12 : f32 to vector<32x512xf32>
    %45 = arith.maximumf %43, %44 : vector<32x512xf32>
    %46 = arith.truncf %45 : vector<32x512xf32> to vector<32x512xbf16>
    %c0_13 = arith.constant 0 : index
    %c0_14 = arith.constant 0 : index
    %47 = vector.load %arg4[%c0_13, %c0_14] : memref<32x512xbf16, #tpu.memory_space<vmem>>, vector<32x512xbf16>
    tpu.vector_store %arg4[%c0_13, %c0_14], %46 {strides = array<i32>} : memref<32x512xbf16, #tpu.memory_space<vmem>>, vector<32x512xbf16>,
    return
  }
}

module attributes {stable_mosaic.version = 11 : i64} {
  func.func @_convt_tanh_kernel(%arg0: memref<72x2048xbf16, #tpu.memory_space<vmem>>, %arg1: memref<27x72xbf16, #tpu.memory_space<vmem>>, %arg2: memref<27x2048xf32, #tpu.memory_space<vmem>>) attributes {dimension_semantics = [], scalar_prefetch = 0 : i64, scratch_operands = 0 : i64, tpu.core_type = #tpu.core_type<tc>} {
    %c0 = arith.constant 0 : index
    %c0_0 = arith.constant 0 : index
    %0 = vector.load %arg0[%c0, %c0_0] : memref<72x2048xbf16, #tpu.memory_space<vmem>>, vector<72x2048xbf16>
    %1 = arith.extf %0 : vector<72x2048xbf16> to vector<72x2048xf32>
    %c0_1 = arith.constant 0 : index
    %c0_2 = arith.constant 0 : index
    %2 = vector.load %arg1[%c0_1, %c0_2] : memref<27x72xbf16, #tpu.memory_space<vmem>>, vector<27x72xbf16>
    %3 = arith.extf %2 : vector<27x72xbf16> to vector<27x72xf32>
    %cst = arith.constant dense<0.000000e+00> : vector<27x2048xf32>
    %4 = tpu.matmul %3, %1, %cst {dimension_numbers = #tpu.dot_dimension_numbers<[1], [0], [0], [1], [0, 0, 1, 1], [], []>} : vector<27x72xf32>, vector<72x2048xf32>, vector<27x2048xf32> -> vector<27x2048xf32>
    %5 = math.tanh %4 : vector<27x2048xf32>
    %c0_3 = arith.constant 0 : index
    %c0_4 = arith.constant 0 : index
    %6 = vector.load %arg2[%c0_3, %c0_4] : memref<27x2048xf32, #tpu.memory_space<vmem>>, vector<27x2048xf32>
    tpu.vector_store %arg2[%c0_3, %c0_4], %5 {strides = array<i32>} : memref<27x2048xf32, #tpu.memory_space<vmem>>, vector<27x2048xf32>,
    return
  }
}

</mosaic_0001>

<bundles_post_ra>
// kernel: generator_forward.5
= control target key start
LH: loop header
LB: loop body
LE: loop exit
PB: predicated region body
PF: predicated region fallthrough
CT: control target
= control target key end

     0   :  { %vm210_vm0 = vcmask 261120   ;;  %vm491_vm1 = vcmask 257024   ;;  %s999_s0 = inlined_call_operand.vmem [shape: bf16[256,32], index: 0, kind: input, shape index: {}]   ;;  %s1000_s1 = inlined_call_operand.vmem [shape: bf16[64,256], index: 1, kind: input, shape index: {}]   ;;  %s1001_s2 = inlined_call_operand.vmem [shape: f32[64,1], index: 2, kind: input, shape index: {}]   ;;  %s1002_s3 = inlined_call_operand.vmem [shape: f32[64,1], index: 3, kind: input, shape index: {}]   ;;  %s1003_s4 = inlined_call_operand.vmem [shape: bf16[64,32], index: 4, kind: output, shape index: {}]  }
   0x1   :  { %v591_v0 = vld [vmem:[%s999_s0 + $0x40] sm:$0xff]   ;;  %v592_v2 = vld [vmem:[%s999_s0 + $0x48] sm:$0xff]   ;;  %v593_v4 = vld [vmem:[%s999_s0 + $0x50] sm:$0xff]  }
   0x2   :  { %v521_v1 = vld [vmem:[%s999_s0] sm:$0xff]   ;;  %656 = vmatprep.subr.bf16.mxu0 %v591_v0  ;;  %687 = vmatprep.subr.bf16.mxu1 %v591_v0  ;;  %v584_v3 = vld [vmem:[%s999_s0 + $0x8] sm:$0xff]   ;;  %v585_v9 = vld [vmem:[%s999_s0 + $0x10] sm:$0xff]  }
   0x3   :  { %658 = vmatpush3.bf16.msra.mxu0 %v521_v1  ;;  %695 = vmatpush3.bf16.msra.mxu1 %v521_v1  ;;  %v81_v5 = vld [vmem:[%s1000_s1] sm:$0xff]  ;;  %v594_v10 = vld [vmem:[%s999_s0 + $0x58] sm:$0xff]   ;;  %v596_v14 = vld [vmem:[%s999_s0 + $0x68] sm:$0xff]  }
   0x4   :  { %660 = vmatprep.subr.bf16.mxu0 %v592_v2  ;;  %688 = vmatprep.subr.bf16.mxu1 %v592_v2  ;;  %v85_v6 = vld [vmem:[%s1000_s1 + $0x20] sm:$0xff]  ;;  %v90_v7 = vunpack.c.h.bf16 %v81_v5  ;;  %v586_v11 = vld [vmem:[%s999_s0 + $0x18] sm:$0xff]   ;;  %v588_v15 = vld [vmem:[%s999_s0 + $0x28] sm:$0xff]   ;;  %v89_v22 = vunpack.c.l.bf16 %v81_v5 }
   0x5   :  { %v98_v8 = vunpack.c.h.bf16 %v85_v6  ;;  %v595_v12 = vld [vmem:[%s999_s0 + $0x60] sm:$0xff]   ;;  %v597_v16 = vld [vmem:[%s999_s0 + $0x70] sm:$0xff]   ;;  %v598_v18 = vld [vmem:[%s999_s0 + $0x78] sm:$0xff]   ;;  %v97_v23 = vunpack.c.l.bf16 %v85_v6 }
   0x6   :  { %169 = vmatprep.mubr.f32.mxu0 %v90_v7  ;;  %v587_v13 = vld [vmem:[%s999_s0 + $0x20] sm:$0xff]   ;;  %v589_v17 = vld [vmem:[%s999_s0 + $0x30] sm:$0xff]   ;;  %v590_v19 = vld [vmem:[%s999_s0 + $0x38] sm:$0xff]  }
   0x7   :  { %662 = vmatpush3.bf16.msra.mxu0 %v584_v3  ;;  %696 = vmatpush3.bf16.msra.mxu1 %v584_v3  ;;  %v86_v20 = vld [vmem:[%s1000_s1 + $0x28] sm:$0xff]  ;;  %v83_v26 = vld [vmem:[%s1000_s1 + $0x10] sm:$0xff]  ;;  %v84_v32 = vld [vmem:[%s1000_s1 + $0x18] sm:$0xff] }
   0x8   :  { %664 = vmatprep.subr.bf16.mxu0 %v593_v4  ;;  %689 = vmatprep.subr.bf16.mxu1 %v593_v4  ;;  %v82_v21 = vld [vmem:[%s1000_s1 + $0x8] sm:$0xff]  ;;  %v100_v24 = vunpack.c.h.bf16 %v86_v20  ;;  %v87_v27 = vld [vmem:[%s1000_s1 + $0x30] sm:$0xff]  ;;  %v99_v28 = vunpack.c.l.bf16 %v86_v20  ;;  %v94_v30 = vunpack.c.h.bf16 %v83_v26  ;;  %v88_v33 = vld [vmem:[%s1000_s1 + $0x38] sm:$0xff]  ;;  %v93_v34 = vunpack.c.l.bf16 %v83_v26 }
   0x9   :  { %189 = vmatprep.mubr.f32.mxu1 %v98_v8  ;;  %v92_v25 = vunpack.c.h.bf16 %v82_v21  ;;  %v91_v29 = vunpack.c.l.bf16 %v82_v21  ;;  %v102_v31 = vunpack.c.h.bf16 %v87_v27  ;;  %v101_v35 = vunpack.c.l.bf16 %v87_v27 }
   0xa   :  { %v96_v36 = vunpack.c.h.bf16 %v84_v32  ;;  %v104_v37 = vunpack.c.h.bf16 %v88_v33  ;;  %v95_v38 = vunpack.c.l.bf16 %v84_v32  ;;  %v103_v39 = vunpack.c.l.bf16 %v88_v33 }
   0xb   :  { %666 = vmatpush3.bf16.msra.mxu0 %v585_v9  ;;  %697 = vmatpush3.bf16.msra.mxu1 %v585_v9 }
   0xc   :  { %668 = vmatprep.subr.bf16.mxu0 %v594_v10  ;;  %690 = vmatprep.subr.bf16.mxu1 %v594_v10 }
   0xf   :  { %670 = vmatpush3.bf16.msra.mxu0 %v586_v11  ;;  %698 = vmatpush3.bf16.msra.mxu1 %v586_v11 }
  0x10   :  { %672 = vmatprep.subr.bf16.mxu0 %v595_v12  ;;  %691 = vmatprep.subr.bf16.mxu1 %v595_v12 }
  0x13   :  { %674 = vmatpush3.bf16.msra.mxu0 %v587_v13  ;;  %699 = vmatpush3.bf16.msra.mxu1 %v587_v13 }
  0x14   :  { %676 = vmatprep.subr.bf16.mxu0 %v596_v14  ;;  %692 = vmatprep.subr.bf16.mxu1 %v596_v14 }
  0x17   :  { %678 = vmatpush3.bf16.msra.mxu0 %v588_v15  ;;  %700 = vmatpush3.bf16.msra.mxu1 %v588_v15 }
  0x18   :  { %680 = vmatprep.subr.bf16.mxu0 %v597_v16  ;;  %693 = vmatprep.subr.bf16.mxu1 %v597_v16 }
  0x1b   :  { %682 = vmatpush3.bf16.msra.mxu0 %v589_v17  ;;  %701 = vmatpush3.bf16.msra.mxu1 %v589_v17 }
  0x1c   :  { %684 = vmatprep.subr.bf16.mxu0 %v598_v18  ;;  %694 = vmatprep.subr.bf16.mxu1 %v598_v18 }
  0x1f   :  { %686 = vmatpush3.bf16.msra.mxu0 %v590_v19  ;;  %702 = vmatpush3.bf16.msra.mxu1 %v590_v19 }
  0x22   :  { %170 = vmatmul.mubr.f32.vlgmr.msra.gmra.mrb[0].mxu0 %v89_v22  ;;  %190 = vmatmul.mubr.f32.vlgmr.msra.gmra.mrb[0].mxu1 %v97_v23 }
  0x23   :  { %194 = vmatprep.mubr.f32.mxu1 %v100_v24  ;;  %174 = vmatprep.mubr.f32.mxu0 %v92_v25  ;;  %v722_v24 = vmov 0  }
  0x24   :  { %704 = vset.pattern.permute.xlu0 %v722_v24  ;;  %705 = vset.pattern.permute.xlu1 %v722_v24 }
  0x26   :  { %195 = vmatmul.mubr.f32.gmra.mrb[2].mxu1 %v99_v28  ;;  %175 = vmatmul.mubr.f32.gmra.mrb[2].mxu0 %v91_v29 }
  0x27   :  { %179 = vmatprep.mubr.f32.mxu0 %v94_v30  ;;  %199 = vmatprep.mubr.f32.mxu1 %v102_v31 }
  0x2a   :  { %180 = vmatmul.mubr.f32.gmra.mrb[4].mxu0 %v93_v34  ;;  %200 = vmatmul.mubr.f32.gmra.mrb[4].mxu1 %v101_v35 }
  0x2b   :  { %184 = vmatprep.mubr.f32.mxu0 %v96_v36  ;;  %204 = vmatprep.mubr.f32.mxu1 %v104_v37 }
  0x2e   :  { %185 = vmatmul.mubr.f32.gmra.mrb[6].mxu0 %v95_v38  ;;  %205 = vmatmul.mubr.f32.gmra.mrb[6].mxu1 %v103_v39 }
  0xf5   :  { %v631_v40 = vpop.f32.mrb[0].mxu0  ;;  %v643_v41 = vpop.f32.mrb[0].mxu1 }
  0xf6   :  { %v632_v42 = vpop.f32.mrb[1].mxu0  ;;  %v644_v43 = vpop.f32.mrb[1].mxu1 }
  0xf7   :  { %v820_v44 = vadd.f32 %v632_v42, %v631_v40  ;;  %v822_v45 = vadd.f32 %v644_v43, %v643_v41 }
  0xf9   :  { %v646_v46 = vpop.f32.mrb[2].mxu1  ;;  %v211_v47 = vsel %vm210_vm0, %v820_v44, 0.0  ;;  %v634_v48 = vpop.f32.mrb[2].mxu0  ;;  %v223_v53 = vsel %vm210_vm0, %v822_v45, 0.0  ;;  %v235_v56 = vmul.f32 %v820_v44, %v820_v44  ;;  %v239_v2 = vmul.f32 %v822_v45, %v822_v45 }
  0xfa   :  { %v647_v49 = vpop.f32.mrb[3].mxu1  ;;  %212 = vadd.xlane.f32.xlu0 %v211_v47  ;;  %v635_v50 = vpop.f32.mrb[3].mxu0 }
  0xfb   :  { %v826_v51 = vadd.f32 %v647_v49, %v646_v46  ;;  %v828_v52 = vadd.f32 %v635_v50, %v634_v48  ;;  %v243_v1 = vsel %vm210_vm0, %v235_v56, 0.0  ;;  %v255_v10 = vsel %vm210_vm0, %v239_v2, 0.0 }
  0xfd   :  { %v226_v54 = vsel %vm210_vm0, %v826_v51, 0.0  ;;  %v236_v55 = vmul.f32 %v828_v52, %v828_v52  ;;  %v637_v57 = vpop.f32.mrb[4].mxu0  ;;  %v649_v58 = vpop.f32.mrb[4].mxu1  ;;  %v240_v63 = vmul.f32 %v826_v51, %v826_v51  ;;  %v214_v12 = vsel %vm210_vm0, %v828_v52, 0.0 }
  0xfe   :  { %227 = vadd.xlane.f32.xlu1 %v226_v54  ;;  %224 = vadd.xlane.f32.xlu0 %v223_v53  ;;  %v638_v59 = vpop.f32.mrb[5].mxu0  ;;  %v650_v60 = vpop.f32.mrb[5].mxu1 }
  0xff   :  { %v246_v61 = vsel %vm210_vm0, %v236_v55, 0.0  ;;  %v839_v62 = vadd.f32 %v638_v59, %v637_v57  ;;  %v843_v0 = vadd.f32 %v650_v60, %v649_v58  ;;  %v258_v7 = vsel %vm210_vm0, %v240_v63, 0.0  ;;  %v299_v63 = vld [vmem:[%s1001_s2] sm:$0xff] }
 0x101   :  { %v640_v3 = vpop.f32.mrb[6].mxu0  ;;  %v652_v4 = vpop.f32.mrb[6].mxu1  ;;  %v217_v11 = vsel %vm210_vm0, %v839_v62, 0.0  ;;  %v229_v14 = vsel %vm210_vm0, %v843_v0, 0.0  ;;  %v237_v15 = vmul.f32 %v839_v62, %v839_v62  ;;  %v241_v19 = vmul.f32 %v843_v0, %v843_v0 }
 0x102   :  { %247 = vadd.xlane.f32.xlu1 %v246_v61  ;;  %244 = vadd.xlane.f32.xlu0 %v243_v1  ;;  %v641_v5 = vpop.f32.mrb[7].mxu0  ;;  %v653_v6 = vpop.f32.mrb[7].mxu1 }
 0x103   :  { %v849_v8 = vadd.f32 %v641_v5, %v640_v3  ;;  %v851_v9 = vadd.f32 %v653_v6, %v652_v4  ;;  %v249_v17 = vsel %vm210_vm0, %v237_v15, 0.0  ;;  %v261_v21 = vsel %vm210_vm0, %v241_v19, 0.0 }
 0x105   :  { %v220_v13 = vsel %vm210_vm0, %v849_v8, 0.0  ;;  %v232_v16 = vsel %vm210_vm0, %v851_v9, 0.0  ;;  %v238_v18 = vmul.f32 %v849_v8, %v849_v8  ;;  %v242_v22 = vmul.f32 %v851_v9, %v851_v9 }
 0x106   :  { %259 = vadd.xlane.f32.xlu1 %v258_v7  ;;  %256 = vadd.xlane.f32.xlu0 %v255_v10 }
 0x107   :  { %v252_v20 = vsel %vm210_vm0, %v238_v18, 0.0  ;;  %v264_v23 = vsel %vm210_vm0, %v242_v22, 0.0 }
 0x10a   :  { %218 = vadd.xlane.f32.xlu1 %v217_v11  ;;  %215 = vadd.xlane.f32.xlu0 %v214_v12 }
 0x10e   :  { %221 = vadd.xlane.f32.xlu1 %v220_v13  ;;  %230 = vadd.xlane.f32.xlu0 %v229_v14  ;;  %v303_v14 = vld [vmem:[%s1001_s2 + $0x20] sm:$0xff] }
 0x112   :  { %233 = vadd.xlane.f32.xlu1 %v232_v16  ;;  %250 = vadd.xlane.f32.xlu0 %v249_v17 }
 0x116   :  { %253 = vadd.xlane.f32.xlu1 %v252_v20  ;;  %262 = vadd.xlane.f32.xlu0 %v261_v21 }
 0x11a   :  { %265 = vadd.xlane.f32.xlu1 %v264_v23 }
 0x187   :  { %v213_v25 = vpop.xlane.xlu0 %212 }
 0x188   :  { %v876_v28 = vmul.f32 0.03125, %v213_v25  ;;  %v300_v25 = vld [vmem:[%s1001_s2 + $0x8] sm:$0xff] }
 0x18a   :  { %v283_v32 = vmul.f32 %v876_v28, %v876_v28 }
 0x18b   :  { %v228_v26 = vpop.xlane.xlu1 %227  ;;  %v225_v27 = vpop.xlane.xlu0 %224 }
 0x18c   :  { %v878_v29 = vmul.f32 0.03125, %v228_v26  ;;  %v882_v33 = vmul.f32 0.03125, %v225_v27 }
 0x18e   :  { %v288_v35 = vmul.f32 %v878_v29, %v878_v29  ;;  %v287_v39 = vmul.f32 %v882_v33, %v882_v33 }
 0x18f   :  { %v248_v30 = vpop.xlane.xlu1 %247  ;;  %v245_v31 = vpop.xlane.xlu0 %244 }
 0x190   :  { %v275_v34 = vmul.f32 0.03125, %v245_v31  ;;  %v276_v49 = vmul.f32 0.03125, %v248_v30  ;;  %v304_v30 = vld [vmem:[%s1001_s2 + $0x28] sm:$0xff] }
 0x192   :  { %v291_v36 = vsub.f32 %v275_v34, %v283_v32 }
 0x193   :  { %v260_v37 = vpop.xlane.xlu1 %259  ;;  %v257_v38 = vpop.xlane.xlu0 %256 }
 0x194   :  { %v307_v40 = vadd.f32 1e-05, %v291_v36  ;;  %v280_v41 = vmul.f32 0.03125, %v260_v37  ;;  %v279_v42 = vmul.f32 0.03125, %v257_v38 }
 0x196   :  { %706 = vrsqrt.f32 %v307_v40  ;;  %v296_v43 = vsub.f32 %v280_v41, %v288_v35  ;;  %v295_v46 = vsub.f32 %v279_v42, %v287_v39  ;;  %v332_v39 = vld [vmem:[%s1002_s3 + $0x8] sm:$0xff] }
 0x197   :  { %v219_v47 = vpop.xlane.xlu1 %218  ;;  %v216_v48 = vpop.xlane.xlu0 %215 }
 0x198   :  { %v311_v50 = vadd.f32 1e-05, %v295_v46  ;;  %v268_v53 = vmul.f32 0.03125, %v216_v48  ;;  %v312_v54 = vadd.f32 1e-05, %v296_v43  ;;  %v888_v59 = vmul.f32 0.03125, %v219_v47 }
 0x199   :  { %v331_v47 = vld [vmem:[%s1002_s3] sm:$0xff]  ;;  %v336_v48 = vld [vmem:[%s1002_s3 + $0x28] sm:$0xff] }
 0x19a   :  { %v284_v55 = vmul.f32 %v268_v53, %v268_v53  ;;  %708 = vrsqrt.f32 %v311_v50  ;;  %v285_v4 = vmul.f32 %v888_v59, %v888_v59 }
 0x19b   :  { %v222_v56 = vpop.xlane.xlu1 %221  ;;  %v231_v57 = vpop.xlane.xlu0 %230  ;;  %710 = vrsqrt.f32 %v312_v54  ;;  %v335_v54 = vld [vmem:[%s1002_s3 + $0x20] sm:$0xff] }
 0x19c   :  { %v292_v58 = vsub.f32 %v276_v49, %v284_v55  ;;  %v890_v61 = vmul.f32 0.03125, %v222_v56  ;;  %v897_v5 = vmul.f32 0.03125, %v231_v57  ;;  %v302_v49 = vld [vmem:[%s1001_s2 + $0x18] sm:$0xff] }
 0x19d   :  { %v334_v56 = vld [vmem:[%s1002_s3 + $0x18] sm:$0xff] }
 0x19e   :  { %v308_v60 = vadd.f32 1e-05, %v292_v58  ;;  %v286_v10 = vmul.f32 %v890_v61, %v890_v61  ;;  %v289_v17 = vmul.f32 %v897_v5, %v897_v5  ;;  %v306_v57 = vld [vmem:[%s1001_s2 + $0x38] sm:$0xff] }
 0x19f   :  { %v234_v1 = vpop.xlane.xlu1 %233  ;;  %v251_v2 = vpop.xlane.xlu0 %250 }
 0x1a0   :  { %v707_v3 = vpop.eup %706  ;;  %712 = vrsqrt.f32 %v308_v60  ;;  %v277_v6 = vmul.f32 0.03125, %v251_v2  ;;  %v901_v11 = vmul.f32 0.03125, %v234_v1  ;;  %v301_v1 = vld [vmem:[%s1001_s2 + $0x10] sm:$0xff] }
 0x1a1   :  { %v323_v7 = vmul.f32 %v707_v3, %v299_v63 }
 0x1a2   :  { %v293_v18 = vsub.f32 %v277_v6, %v285_v4  ;;  %v290_v19 = vmul.f32 %v901_v11, %v901_v11  ;;  %v338_v4 = vld [vmem:[%s1002_s3 + $0x38] sm:$0xff] }
 0x1a3   :  { %v254_v12 = vpop.xlane.xlu1 %253  ;;  %357 = vperm.xlu0 %704, %v323_v7   ;;  %v263_v13 = vpop.xlane.xlu0 %262  ;;  %v339_v43 = vmul.f32 %v323_v7, %v876_v28 }
 0x1a4   :  { %v278_v15 = vmul.f32 0.03125, %v254_v12  ;;  %v709_v16 = vpop.eup %708  ;;  %v281_v21 = vmul.f32 0.03125, %v263_v13  ;;  %v309_v31 = vadd.f32 1e-05, %v293_v18 }
 0x1a5   :  { %v327_v22 = vmul.f32 %v709_v16, %v303_v14  ;;  %v711_v24 = vpop.eup %710  ;;  %v347_v50 = vsub.f32 %v331_v47, %v339_v43 }
 0x1a6   :  { %v294_v20 = vsub.f32 %v278_v15, %v286_v10  ;;  %v297_v34 = vsub.f32 %v281_v21, %v289_v17  ;;  %v328_v37 = vmul.f32 %v711_v24, %v304_v30  ;;  %v333_v15 = vld [vmem:[%s1002_s3 + $0x10] sm:$0xff] }
 0x1a7   :  { %v266_v23 = vpop.xlane.xlu1 %265  ;;  %377 = vperm.xlu1 %705, %v327_v22   ;;  %v343_v28 = vmul.f32 %v327_v22, %v882_v33  ;;  %v337_v17 = vld [vmem:[%s1002_s3 + $0x30] sm:$0xff] }
 0x1a8   :  { %v310_v26 = vadd.f32 1e-05, %v294_v20  ;;  %v282_v27 = vmul.f32 0.03125, %v266_v23  ;;  %v313_v41 = vadd.f32 1e-05, %v297_v34  ;;  %v344_v46 = vmul.f32 %v328_v37, %v878_v29 }
 0x1a9   :  { %v351_v60 = vsub.f32 %v335_v54, %v343_v28 }
 0x1aa   :  { %v713_v32 = vpop.eup %712  ;;  %714 = vrsqrt.f32 %v310_v26  ;;  %v298_v35 = vsub.f32 %v282_v27, %v290_v19 }
 0x1ab   :  { %v324_v36 = vmul.f32 %v713_v32, %v300_v25  ;;  %716 = vrsqrt.f32 %v309_v31 }
 0x1ac   :  { %v314_v38 = vadd.f32 1e-05, %v298_v35 }
 0x1ad   :  { %v340_v40 = vmul.f32 %v324_v36, %v268_v53  ;;  %362 = vperm.xlu1 %705, %v324_v36   ;;  %v352_v53 = vsub.f32 %v336_v48, %v344_v46 }
 0x1ae   :  { %718 = vrsqrt.f32 %v314_v38 }
 0x1af   :  { %v348_v42 = vsub.f32 %v332_v39, %v340_v40  ;;  %720 = vrsqrt.f32 %v313_v41 }
 0x1b1   :  { %382 = vperm.xlu1 %705, %v328_v37   ;;  %410 = vperm.xlu0 %704, %v348_v42  }
 0x1b4   :  { %v715_v29 = vpop.eup %714 }
 0x1b5   :  { %405 = vperm.xlu1 %705, %v347_v50   ;;  %430 = vperm.xlu0 %704, %v352_v53   ;;  %v326_v55 = vmul.f32 %v715_v29, %v302_v49  ;;  %v717_v58 = vpop.eup %716 }
 0x1b6   :  { %v325_v6 = vmul.f32 %v717_v58, %v301_v1 }
 0x1b7   :  { %v342_v33 = vmul.f32 %v326_v55, %v890_v61  ;;  %v305_v61 = vld [vmem:[%s1001_s2 + $0x30] sm:$0xff] }
 0x1b8   :  { %v719_v63 = vpop.eup %718  ;;  %v341_v14 = vmul.f32 %v325_v6, %v888_v59 }
 0x1b9   :  { %425 = vperm.xlu1 %705, %v351_v60   ;;  %v350_v2 = vsub.f32 %v334_v56, %v342_v33  ;;  %v330_v3 = vmul.f32 %v719_v63, %v306_v57  ;;  %v721_v10 = vpop.eup %720 }
 0x1ba   :  { %v329_v13 = vmul.f32 %v721_v10, %v305_v61  ;;  %v349_v16 = vsub.f32 %v333_v15, %v341_v14 }
 0x1bb   :  { %420 = vperm.xlu0 %704, %v350_v2   ;;  %v346_v7 = vmul.f32 %v330_v3, %v901_v11 }
 0x1bc   :  { %v345_v11 = vmul.f32 %v329_v13, %v897_v5 }
 0x1bd   :  { %367 = vperm.xlu1 %705, %v325_v6   ;;  %v354_v12 = vsub.f32 %v338_v4, %v346_v7 }
 0x1be   :  { %v353_v18 = vsub.f32 %v337_v17, %v345_v11 }
 0x1bf   :  { %440 = vperm.xlu0 %704, %v354_v12  }
 0x1c1   :  { %387 = vperm.xlu1 %705, %v329_v13  }
 0x1c5   :  { %372 = vperm.xlu1 %705, %v326_v55  }
 0x1c9   :  { %392 = vperm.xlu1 %705, %v330_v3  }
 0x1cd   :  { %415 = vperm.xlu1 %705, %v349_v16  }
 0x1d1   :  { %435 = vperm.xlu1 %705, %v353_v18  }
 0x222   :  { %v358_v20 = vpop.permute.xlu0 %357 }
 0x223   :  { %v395_v25 = vmul.f32 %v820_v44, %v358_v20 }
 0x226   :  { %v378_v19 = vpop.permute.xlu1 %377 }
 0x227   :  { %v399_v35 = vmul.f32 %v822_v45, %v378_v19 }
 0x22c   :  { %v363_v21 = vpop.permute.xlu1 %362 }
 0x22d   :  { %v396_v59 = vmul.f32 %v828_v52, %v363_v21 }
 0x230   :  { %v383_v22 = vpop.permute.xlu1 %382  ;;  %v411_v23 = vpop.permute.xlu0 %410 }
 0x231   :  { %v444_v24 = vadd.f32 %v411_v23, %v396_v59  ;;  %v400_v26 = vmul.f32 %v826_v51, %v383_v22 }
 0x233   :  { %v452_v5 = vmax.f32 %v444_v24, 0.0 }
 0x234   :  { %v406_v27 = vpop.permute.xlu1 %405  ;;  %v431_v30 = vpop.permute.xlu0 %430 }
 0x235   :  { %v513_v31 = vpack.c.bf16 %v452_v5, %v452_v5  ;;  %v443_v32 = vadd.f32 %v406_v27, %v395_v25  ;;  %v448_v34 = vadd.f32 %v431_v30, %v400_v26 }
 0x237   :  { %493 = vst.msk [vmem:[%s1003_s4 + $0x4] sm:$0xf] %vm491_vm1, %v513_v31  ;;  %v451_v52 = vmax.f32 %v443_v32, 0.0  ;;  %v456_v36 = vmax.f32 %v448_v34, 0.0 }
 0x238   :  { %v426_v37 = vpop.permute.xlu1 %425 }
 0x239   :  { %v512_v44 = vpack.c.bf16 %v451_v52, %v451_v52  ;;  %v517_v38 = vpack.c.bf16 %v456_v36, %v456_v36  ;;  %v447_v51 = vadd.f32 %v426_v37, %v399_v35 }
 0x23a   :  { %v421_v42 = vpop.permute.xlu0 %420 }
 0x23b   :  { %492 = vst.msk [vmem:[%s1003_s4] sm:$0xf] %vm491_vm1, %v512_v44  ;;  %497 = vst.msk [vmem:[%s1003_s4 + $0x14] sm:$0xf] %vm491_vm1, %v517_v38  ;;  %v455_v45 = vmax.f32 %v447_v51, 0.0 }
 0x23c   :  { %v368_v39 = vpop.permute.xlu1 %367 }
 0x23d   :  { %v516_v40 = vpack.c.bf16 %v455_v45, %v455_v45  ;;  %v397_v28 = vmul.f32 %v839_v62, %v368_v39 }
 0x23e   :  { %v441_v53 = vpop.permute.xlu0 %440 }
 0x23f   :  { %496 = vst.msk [vmem:[%s1003_s4 + $0x10] sm:$0xf] %vm491_vm1, %v516_v40 }
 0x240   :  { %v388_v41 = vpop.permute.xlu1 %387 }
 0x244   :  { %v373_v43 = vpop.permute.xlu1 %372 }
 0x245   :  { %v398_v46 = vmul.f32 %v849_v8, %v373_v43  ;;  %v401_v8 = vmul.f32 %v843_v0, %v388_v41 }
 0x247   :  { %v446_v47 = vadd.f32 %v421_v42, %v398_v46 }
 0x248   :  { %v393_v48 = vpop.permute.xlu1 %392 }
 0x249   :  { %v454_v49 = vmax.f32 %v446_v47, 0.0  ;;  %v402_v50 = vmul.f32 %v851_v9, %v393_v48 }
 0x24b   :  { %v515_v29 = vpack.c.bf16 %v454_v49, %v454_v49  ;;  %v450_v54 = vadd.f32 %v441_v53, %v402_v50 }
 0x24c   :  { %v416_v55 = vpop.permute.xlu1 %415 }
 0x24d   :  { %495 = vst.msk [vmem:[%s1003_s4 + $0xc] sm:$0xf] %vm491_vm1, %v515_v29  ;;  %v458_v56 = vmax.f32 %v450_v54, 0.0  ;;  %v445_v57 = vadd.f32 %v416_v55, %v397_v28 }
 0x24f   :  { %v519_v58 = vpack.c.bf16 %v458_v56, %v458_v56  ;;  %v453_v60 = vmax.f32 %v445_v57, 0.0 }
 0x250   :  { %v436_v33 = vpop.permute.xlu1 %435 }
 0x251   :  { %499 = vst.msk [vmem:[%s1003_s4 + $0x1c] sm:$0xf] %vm491_vm1, %v519_v58  ;;  %v514_v62 = vpack.c.bf16 %v453_v60, %v453_v60  ;;  %v449_v9 = vadd.f32 %v436_v33, %v401_v8 }
 0x253   :  { %494 = vst.msk [vmem:[%s1003_s4 + $0x8] sm:$0xf] %vm491_vm1, %v514_v62  ;;  %v457_v63 = vmax.f32 %v449_v9, 0.0 }
 0x255   :  { %v518_v1 = vpack.c.bf16 %v457_v63, %v457_v63 }
 0x257   :  { %498 = vst.msk [vmem:[%s1003_s4 + $0x18] sm:$0xf] %vm491_vm1, %v518_v1 }

// kernel: generator_forward.6
= control target key start
LH: loop header
LB: loop body
LE: loop exit
PB: predicated region body
PF: predicated region fallthrough
CT: control target
= control target key end

     0   :  { %vm289_vm0 = vcmask 523264   ;;  %vm773_vm1 = vcmask 261120   ;;  %vm1106_vm2 = vcmask 257024   ;;  %s2197_s0 = inlined_call_operand.vmem [shape: bf16[576,32], index: 0, kind: input, shape index: {}]   ;;  %s2198_s1 = inlined_call_operand.vmem [shape: bf16[128,576], index: 1, kind: input, shape index: {}]   ;;  %s2199_s2 = inlined_call_operand.vmem [shape: f32[32,1], index: 2, kind: input, shape index: {}]   ;;  %s2200_s3 = inlined_call_operand.vmem [shape: f32[32,1], index: 3, kind: input, shape index: {}]   ;;  %s2201_s4 = inlined_call_operand.vmem [shape: bf16[128,32], index: 4, kind: output, shape index: {}]  }
   0x1   :  { %v1326_v0 = vld [vmem:[%s2197_s0 + $0x40] sm:$0xff]   ;;  %v1327_v4 = vld [vmem:[%s2197_s0 + $0x48] sm:$0xff]   ;;  %v1328_v8 = vld [vmem:[%s2197_s0 + $0x50] sm:$0xff]  }
   0x2   :  { %v1342_v1 = vld [vmem:[%s2197_s0 + $0xc0] sm:$0xff]   ;;  %1579 = vmatprep.subr.bf16.mxu0 %v1326_v0  ;;  %v1343_v5 = vld [vmem:[%s2197_s0 + $0xc8] sm:$0xff]   ;;  %v1344_v9 = vld [vmem:[%s2197_s0 + $0xd0] sm:$0xff]  }
   0x3   :  { %v1176_v2 = vld [vmem:[%s2197_s0] sm:$0xff]   ;;  %1611 = vmatprep.subr.bf16.mxu1 %v1342_v1  ;;  %v1319_v6 = vld [vmem:[%s2197_s0 + $0x8] sm:$0xff]   ;;  %v1320_v10 = vld [vmem:[%s2197_s0 + $0x10] sm:$0xff]  }
   0x4   :  { %v1334_v3 = vld [vmem:[%s2197_s0 + $0x80] sm:$0xff]   ;;  %1581 = vmatpush3.bf16.msra.mxu0 %v1176_v2  ;;  %v1335_v7 = vld [vmem:[%s2197_s0 + $0x88] sm:$0xff]   ;;  %v1336_v11 = vld [vmem:[%s2197_s0 + $0x90] sm:$0xff]  }
   0x5   :  { %1613 = vmatpush3.bf16.msra.mxu1 %v1334_v3  ;;  %1583 = vmatprep.subr.bf16.mxu0 %v1327_v4  ;;  %v1329_v12 = vld [vmem:[%s2197_s0 + $0x58] sm:$0xff]   ;;  %v161_v14 = vld [vmem:[%s2198_s1] sm:$0xff]  ;;  %v162_v18 = vld [vmem:[%s2198_s1 + $0x8] sm:$0xff] }
   0x6   :  { %1615 = vmatprep.subr.bf16.mxu1 %v1343_v5  ;;  %v1345_v13 = vld [vmem:[%s2197_s0 + $0xd8] sm:$0xff]   ;;  %v210_v17 = vunpack.c.h.bf16 %v161_v14  ;;  %v1330_v19 = vld [vmem:[%s2197_s0 + $0x60] sm:$0xff]   ;;  %v212_v21 = vunpack.c.h.bf16 %v162_v18  ;;  %v1331_v24 = vld [vmem:[%s2197_s0 + $0x68] sm:$0xff]   ;;  %v209_v39 = vunpack.c.l.bf16 %v161_v14  ;;  %v211_v40 = vunpack.c.l.bf16 %v162_v18 }
   0x7   :  { %v1321_v15 = vld [vmem:[%s2197_s0 + $0x18] sm:$0xff]   ;;  %v1346_v20 = vld [vmem:[%s2197_s0 + $0xe0] sm:$0xff]   ;;  %v1347_v25 = vld [vmem:[%s2197_s0 + $0xe8] sm:$0xff]  }
   0x8   :  { %1585 = vmatpush3.bf16.msra.mxu0 %v1319_v6  ;;  %v1337_v16 = vld [vmem:[%s2197_s0 + $0x98] sm:$0xff]   ;;  %402 = vmatprep.mubr.f32.mxu0 %v210_v17  ;;  %v1322_v22 = vld [vmem:[%s2197_s0 + $0x20] sm:$0xff]   ;;  %v1323_v26 = vld [vmem:[%s2197_s0 + $0x28] sm:$0xff]  }
   0x9   :  { %1617 = vmatpush3.bf16.msra.mxu1 %v1335_v7  ;;  %1587 = vmatprep.subr.bf16.mxu0 %v1328_v8  ;;  %v1338_v23 = vld [vmem:[%s2197_s0 + $0xa0] sm:$0xff]   ;;  %v1339_v27 = vld [vmem:[%s2197_s0 + $0xa8] sm:$0xff]   ;;  %v1332_v28 = vld [vmem:[%s2197_s0 + $0x70] sm:$0xff]  }
   0xa   :  { %1619 = vmatprep.subr.bf16.mxu1 %v1344_v9  ;;  %547 = vmatprep.mubr.f32.mxu1 %v212_v21  ;;  %v1348_v29 = vld [vmem:[%s2197_s0 + $0xf0] sm:$0xff]   ;;  %v1333_v32 = vld [vmem:[%s2197_s0 + $0x78] sm:$0xff]   ;;  %v1350_v37 = vld [vmem:[%s2197_s0 + $0x100] sm:$0xff]  }
   0xb   :  { %v1324_v30 = vld [vmem:[%s2197_s0 + $0x30] sm:$0xff]   ;;  %v1349_v33 = vld [vmem:[%s2197_s0 + $0xf8] sm:$0xff]   ;;  %v167_v43 = vld [vmem:[%s2198_s1 + $0x28] sm:$0xff] }
   0xc   :  { %1589 = vmatpush3.bf16.msra.mxu0 %v1320_v10  ;;  %v1340_v31 = vld [vmem:[%s2197_s0 + $0xb0] sm:$0xff]   ;;  %v1325_v34 = vld [vmem:[%s2197_s0 + $0x38] sm:$0xff]   ;;  %v1351_v47 = vld [vmem:[%s2197_s0 + $0x108] sm:$0xff]   ;;  %v220_v48 = vunpack.c.h.bf16 %v167_v43  ;;  %v219_v52 = vunpack.c.l.bf16 %v167_v43 }
   0xd   :  { %1621 = vmatpush3.bf16.msra.mxu1 %v1336_v11  ;;  %1591 = vmatprep.subr.bf16.mxu0 %v1329_v12  ;;  %v1341_v35 = vld [vmem:[%s2197_s0 + $0xb8] sm:$0xff]   ;;  %v168_v44 = vld [vmem:[%s2198_s1 + $0x30] sm:$0xff]  ;;  %v171_v51 = vld [vmem:[%s2198_s1 + $0x44] sm:$0xff] }
   0xe   :  { %1623 = vmatprep.subr.bf16.mxu1 %v1345_v13  ;;  %v164_v36 = vld [vmem:[%s2198_s1 + $0x14] sm:$0xff]  ;;  %v165_v38 = vld [vmem:[%s2198_s1 + $0x1c] sm:$0xff]  ;;  %v222_v49 = vunpack.c.h.bf16 %v168_v44  ;;  %v221_v53 = vunpack.c.l.bf16 %v168_v44  ;;  %v227_v56 = vunpack.c.h.bf16 %v171_v51  ;;  %v226_v60 = vunpack.c.l.bf16 %v171_v51  ;;  %v176_v0 = vld [vmem:[%s2198_s1 + $0x64] sm:$0xff] }
   0xf   :  { %v215_v41 = vunpack.c.h.bf16 %v164_v36  ;;  %v217_v42 = vunpack.c.h.bf16 %v165_v38  ;;  %v214_v45 = vunpack.c.l.bf16 %v164_v36  ;;  %v216_v46 = vunpack.c.l.bf16 %v165_v38  ;;  %v170_v50 = vld [vmem:[%s2198_s1 + $0x3c] sm:$0xff]  ;;  %v1352_v54 = vld [vmem:[%s2197_s0 + $0x110] sm:$0xff]  }
  0x10   :  { %1593 = vmatpush3.bf16.msra.mxu0 %v1321_v15  ;;  %v225_v55 = vunpack.c.h.bf16 %v170_v50  ;;  %v173_v57 = vld [vmem:[%s2198_s1 + $0x50] sm:$0xff]  ;;  %v174_v58 = vld [vmem:[%s2198_s1 + $0x58] sm:$0xff]  ;;  %v224_v59 = vunpack.c.l.bf16 %v170_v50  ;;  %v235_v4 = vunpack.c.h.bf16 %v176_v0  ;;  %v180_v7 = vld [vmem:[%s2198_s1 + $0x80] sm:$0xff]  ;;  %v234_v8 = vunpack.c.l.bf16 %v176_v0 }
  0x11   :  { %1625 = vmatpush3.bf16.msra.mxu1 %v1337_v16  ;;  %1595 = vmatprep.subr.bf16.mxu0 %v1330_v19  ;;  %v1353_v61 = vld [vmem:[%s2197_s0 + $0x118] sm:$0xff]   ;;  %v230_v62 = vunpack.c.h.bf16 %v173_v57  ;;  %v232_v63 = vunpack.c.h.bf16 %v174_v58  ;;  %v177_v1 = vld [vmem:[%s2198_s1 + $0x6c] sm:$0xff]  ;;  %v229_v2 = vunpack.c.l.bf16 %v173_v57  ;;  %v231_v3 = vunpack.c.l.bf16 %v174_v58  ;;  %v185_v18 = vld [vmem:[%s2198_s1 + $0xa0] sm:$0xff] }
  0x12   :  { %1627 = vmatprep.subr.bf16.mxu1 %v1346_v20  ;;  %v237_v5 = vunpack.c.h.bf16 %v177_v1  ;;  %v179_v6 = vld [vmem:[%s2198_s1 + $0x78] sm:$0xff]  ;;  %v236_v9 = vunpack.c.l.bf16 %v177_v1  ;;  %v242_v11 = vunpack.c.h.bf16 %v180_v7  ;;  %v182_v12 = vld [vmem:[%s2198_s1 + $0x8c] sm:$0xff]  ;;  %v241_v15 = vunpack.c.l.bf16 %v180_v7 }
  0x13   :  { %v240_v10 = vunpack.c.h.bf16 %v179_v6  ;;  %v183_v13 = vld [vmem:[%s2198_s1 + $0x94] sm:$0xff]  ;;  %v239_v14 = vunpack.c.l.bf16 %v179_v6  ;;  %v245_v16 = vunpack.c.h.bf16 %v182_v12  ;;  %v186_v19 = vld [vmem:[%s2198_s1 + $0xa8] sm:$0xff]  ;;  %v244_v20 = vunpack.c.l.bf16 %v182_v12  ;;  %v194_v36 = vld [vmem:[%s2198_s1 + $0xdc] sm:$0xff] }
  0x14   :  { %1597 = vmatpush3.bf16.msra.mxu0 %v1322_v22  ;;  %v247_v17 = vunpack.c.h.bf16 %v183_v13  ;;  %v246_v21 = vunpack.c.l.bf16 %v183_v13  ;;  %v250_v22 = vunpack.c.h.bf16 %v185_v18  ;;  %v198_v43 = vld [vmem:[%s2198_s1 + $0xf8] sm:$0xff]  ;;  %v264_v44 = vunpack.c.l.bf16 %v194_v36 }
  0x15   :  { %1629 = vmatpush3.bf16.msra.mxu1 %v1338_v23  ;;  %1599 = vmatprep.subr.bf16.mxu0 %v1331_v24  ;;  %v252_v23 = vunpack.c.h.bf16 %v186_v19  ;;  %v188_v24 = vld [vmem:[%s2198_s1 + $0xb4] sm:$0xff]  ;;  %v271_v51 = vunpack.c.l.bf16 %v198_v43 }
  0x16   :  { %1631 = vmatprep.subr.bf16.mxu1 %v1347_v25  ;;  %v189_v25 = vld [vmem:[%s2198_s1 + $0xbc] sm:$0xff] }
  0x18   :  { %1601 = vmatpush3.bf16.msra.mxu0 %v1323_v26  ;;  %v249_v26 = vunpack.c.l.bf16 %v185_v18 }
  0x19   :  { %1633 = vmatpush3.bf16.msra.mxu1 %v1339_v27  ;;  %1603 = vmatprep.subr.bf16.mxu0 %v1332_v28  ;;  %v251_v27 = vunpack.c.l.bf16 %v186_v19  ;;  %v255_v28 = vunpack.c.h.bf16 %v188_v24 }
  0x1a   :  { %1635 = vmatprep.subr.bf16.mxu1 %v1348_v29  ;;  %v257_v29 = vunpack.c.h.bf16 %v189_v25 }
  0x1c   :  { %1605 = vmatpush3.bf16.msra.mxu0 %v1324_v30  ;;  %v191_v30 = vld [vmem:[%s2198_s1 + $0xc8] sm:$0xff] }
  0x1d   :  { %1637 = vmatpush3.bf16.msra.mxu1 %v1340_v31  ;;  %1607 = vmatprep.subr.bf16.mxu0 %v1333_v32  ;;  %v192_v31 = vld [vmem:[%s2198_s1 + $0xd0] sm:$0xff]  ;;  %v254_v32 = vunpack.c.l.bf16 %v188_v24  ;;  %v259_v38 = vunpack.c.l.bf16 %v191_v30 }
  0x1e   :  { %1639 = vmatprep.subr.bf16.mxu1 %v1349_v33  ;;  %v256_v33 = vunpack.c.l.bf16 %v189_v25 }
  0x20   :  { %1609 = vmatpush3.bf16.msra.mxu0 %v1325_v34  ;;  %v260_v34 = vunpack.c.h.bf16 %v191_v30 }
  0x21   :  { %1641 = vmatpush3.bf16.msra.mxu1 %v1341_v35  ;;  %1643 = vmatprep.subr.bf16.mxu0 %v1350_v37  ;;  %v262_v35 = vunpack.c.h.bf16 %v192_v31 }
  0x22   :  { %1658 = vmatprep.subr.bf16.mxu1 %v1350_v37 }
  0x23   :  { %403 = vmatmul.mubr.f32.vlgmr.msra.gmra.mrb[0].mxu0 %v209_v39  ;;  %v261_v39 = vunpack.c.l.bf16 %v192_v31 }
  0x24   :  { %548 = vmatmul.mubr.f32.vlgmr.msra.gmra.mrb[0].mxu1 %v211_v40  ;;  %407 = vmatprep.mubr.f32.mxu0 %v215_v41  ;;  %v265_v40 = vunpack.c.h.bf16 %v194_v36 }
  0x25   :  { %1662 = vmatpush3.bf16.msra.mxu1 %v1350_v37  ;;  %552 = vmatprep.mubr.f32.mxu1 %v217_v42  ;;  %v197_v42 = vld [vmem:[%s2198_s1 + $0xf0] sm:$0xff] }
  0x26   :  { %1645 = vmatpush3.bf16.msra.mxu0 %v1350_v37  ;;  %1659 = vmatprep.subr.bf16.mxu1 %v1351_v47  ;;  %v195_v37 = vld [vmem:[%s2198_s1 + $0xe4] sm:$0xff]  ;;  %v269_v50 = vunpack.c.l.bf16 %v197_v42 }
  0x27   :  { %1647 = vmatprep.subr.bf16.mxu0 %v1351_v47  ;;  %408 = vmatmul.mubr.f32.gmra.mrb[2].mxu0 %v214_v45  ;;  %v267_v41 = vunpack.c.h.bf16 %v195_v37  ;;  %v266_v45 = vunpack.c.l.bf16 %v195_v37 }
  0x28   :  { %553 = vmatmul.mubr.f32.gmra.mrb[2].mxu1 %v216_v46  ;;  %412 = vmatprep.mubr.f32.mxu0 %v220_v48  ;;  %v270_v46 = vunpack.c.h.bf16 %v197_v42  ;;  %v200_v48 = vld [vmem:[%s2198_s1 + $0x104] sm:$0xff] }
  0x29   :  { %557 = vmatprep.mubr.f32.mxu1 %v222_v49  ;;  %1663 = vmatpush3.bf16.msra.mxu1 %v1351_v47  ;;  %v201_v49 = vld [vmem:[%s2198_s1 + $0x10c] sm:$0xff] }
  0x2a   :  { %1649 = vmatpush3.bf16.msra.mxu0 %v1351_v47  ;;  %1660 = vmatprep.subr.bf16.mxu1 %v1352_v54  ;;  %v272_v47 = vunpack.c.h.bf16 %v198_v43  ;;  %v276_v57 = vunpack.c.l.bf16 %v201_v49 }
  0x2b   :  { %1651 = vmatprep.subr.bf16.mxu0 %v1352_v54  ;;  %413 = vmatmul.mubr.f32.gmra.mrb[4].mxu0 %v219_v52  ;;  %v275_v52 = vunpack.c.h.bf16 %v200_v48 }
  0x2c   :  { %558 = vmatmul.mubr.f32.gmra.mrb[4].mxu1 %v221_v53  ;;  %417 = vmatprep.mubr.f32.mxu0 %v225_v55  ;;  %v277_v53 = vunpack.c.h.bf16 %v201_v49  ;;  %v204_v55 = vld [vmem:[%s2198_s1 + $0x120] sm:$0xff] }
  0x2d   :  { %562 = vmatprep.mubr.f32.mxu1 %v227_v56  ;;  %1664 = vmatpush3.bf16.msra.mxu1 %v1352_v54  ;;  %v274_v56 = vunpack.c.l.bf16 %v200_v48 }
  0x2e   :  { %1653 = vmatpush3.bf16.msra.mxu0 %v1352_v54  ;;  %1661 = vmatprep.subr.bf16.mxu1 %v1353_v61  ;;  %v203_v54 = vld [vmem:[%s2198_s1 + $0x118] sm:$0xff] }
  0x2f   :  { %1655 = vmatprep.subr.bf16.mxu0 %v1353_v61  ;;  %418 = vmatmul.mubr.f32.gmra.mrb[6].mxu0 %v224_v59  ;;  %v280_v58 = vunpack.c.h.bf16 %v203_v54  ;;  %v282_v59 = vunpack.c.h.bf16 %v204_v55 }
  0x30   :  { %563 = vmatmul.mubr.f32.gmra.mrb[6].mxu1 %v226_v60  ;;  %422 = vmatprep.mubr.f32.mxu0 %v230_v62  ;;  %v206_v60 = vld [vmem:[%s2198_s1 + $0x12c] sm:$0xff]  ;;  %v279_v62 = vunpack.c.l.bf16 %v203_v54 }
  0x31   :  { %567 = vmatprep.mubr.f32.mxu1 %v232_v63  ;;  %1665 = vmatpush3.bf16.msra.mxu1 %v1353_v61  ;;  %v281_v63 = vunpack.c.l.bf16 %v204_v55  ;;  %v285_v0 = vunpack.c.h.bf16 %v206_v60 }
  0x32   :  { %1657 = vmatpush3.bf16.msra.mxu0 %v1353_v61  ;;  %v207_v61 = vld [vmem:[%s2198_s1 + $0x134] sm:$0xff] }
  0x33   :  { %423 = vmatmul.mubr.f32.gmra.mrb[8].mxu0 %v229_v2  ;;  %v287_v1 = vunpack.c.h.bf16 %v207_v61  ;;  %v163_v2 = vld [vmem:[%s2198_s1 + $0x10] ss:$20 sps:$4 sm:$0xff]  }
  0x34   :  { %568 = vmatmul.mubr.f32.gmra.mrb[8].mxu1 %v231_v3  ;;  %427 = vmatprep.mubr.f32.mxu0 %v235_v4  ;;  %v187_v3 = vld [vmem:[%s2198_s1 + $0xb0] ss:$20 sps:$4 sm:$0xff]   ;;  %v284_v4 = vunpack.c.l.bf16 %v206_v60  ;;  %v213_v6 = vunpack.c.l.bf16 %v163_v2 }
  0x35   :  { %572 = vmatprep.mubr.f32.mxu1 %v237_v5  ;;  %v286_v5 = vunpack.c.l.bf16 %v207_v61  ;;  %v253_v7 = vunpack.c.l.bf16 %v187_v3 }
  0x37   :  { %428 = vmatmul.mubr.f32.gmra.mrb[10].mxu0 %v234_v8  ;;  %v169_v8 = vld [vmem:[%s2198_s1 + $0x38] ss:$20 sps:$4 sm:$0xff]  }
  0x38   :  { %573 = vmatmul.mubr.f32.gmra.mrb[10].mxu1 %v236_v9  ;;  %432 = vmatprep.mubr.f32.mxu0 %v240_v10  ;;  %v193_v9 = vld [vmem:[%s2198_s1 + $0xd8] ss:$20 sps:$4 sm:$0xff]   ;;  %v218_v10 = vunpack.c.h.bf16 %v163_v2  ;;  %v223_v12 = vunpack.c.l.bf16 %v169_v8 }
  0x39   :  { %577 = vmatprep.mubr.f32.mxu1 %v242_v11  ;;  %v258_v11 = vunpack.c.h.bf16 %v187_v3  ;;  %v263_v13 = vunpack.c.l.bf16 %v193_v9 }
  0x3b   :  { %433 = vmatmul.mubr.f32.gmra.mrb[12].mxu0 %v239_v14  ;;  %v175_v14 = vld [vmem:[%s2198_s1 + $0x60] ss:$20 sps:$4 sm:$0xff]  }
  0x3c   :  { %578 = vmatmul.mubr.f32.gmra.mrb[12].mxu1 %v241_v15  ;;  %437 = vmatprep.mubr.f32.mxu0 %v245_v16  ;;  %v199_v15 = vld [vmem:[%s2198_s1 + $0x100] ss:$20 sps:$4 sm:$0xff]   ;;  %v228_v16 = vunpack.c.h.bf16 %v169_v8  ;;  %v233_v18 = vunpack.c.l.bf16 %v175_v14 }
  0x3d   :  { %582 = vmatprep.mubr.f32.mxu1 %v247_v17  ;;  %v268_v17 = vunpack.c.h.bf16 %v193_v9  ;;  %v273_v19 = vunpack.c.l.bf16 %v199_v15 }
  0x3f   :  { %438 = vmatmul.mubr.f32.gmra.mrb[14].mxu0 %v244_v20  ;;  %v181_v20 = vld [vmem:[%s2198_s1 + $0x88] ss:$20 sps:$4 sm:$0xff]  }
  0x40   :  { %583 = vmatmul.mubr.f32.gmra.mrb[14].mxu1 %v246_v21  ;;  %442 = vmatprep.mubr.f32.mxu0 %v250_v22  ;;  %v205_v21 = vld [vmem:[%s2198_s1 + $0x128] ss:$20 sps:$4 sm:$0xff]   ;;  %v238_v22 = vunpack.c.h.bf16 %v175_v14  ;;  %v243_v24 = vunpack.c.l.bf16 %v181_v20 }
  0x41   :  { %587 = vmatprep.mubr.f32.mxu1 %v252_v23  ;;  %v278_v23 = vunpack.c.h.bf16 %v199_v15  ;;  %v283_v25 = vunpack.c.l.bf16 %v205_v21 }
  0x43   :  { %443 = vmatmul.mubr.f32.gmra.mrb[16].mxu0 %v249_v26  ;;  %v248_v26 = vunpack.c.h.bf16 %v181_v20 }
  0x44   :  { %588 = vmatmul.mubr.f32.gmra.mrb[16].mxu1 %v251_v27  ;;  %447 = vmatprep.mubr.f32.mxu0 %v255_v28  ;;  %v288_v27 = vunpack.c.h.bf16 %v205_v21 }
  0x45   :  { %592 = vmatprep.mubr.f32.mxu1 %v257_v29 }
  0x47   :  { %448 = vmatmul.mubr.f32.gmra.mrb[18].mxu0 %v254_v32 }
  0x48   :  { %593 = vmatmul.mubr.f32.gmra.mrb[18].mxu1 %v256_v33  ;;  %452 = vmatprep.mubr.f32.mxu0 %v260_v34 }
  0x49   :  { %597 = vmatprep.mubr.f32.mxu1 %v262_v35 }
  0x4b   :  { %453 = vmatmul.mubr.f32.gmra.mrb[20].mxu0 %v259_v38 }
  0x4c   :  { %598 = vmatmul.mubr.f32.gmra.mrb[20].mxu1 %v261_v39  ;;  %457 = vmatprep.mubr.f32.mxu0 %v265_v40 }
  0x4d   :  { %602 = vmatprep.mubr.f32.mxu1 %v267_v41 }
  0x4f   :  { %458 = vmatmul.mubr.f32.gmra.mrb[22].mxu0 %v264_v44 }
  0x50   :  { %603 = vmatmul.mubr.f32.gmra.mrb[22].mxu1 %v266_v45  ;;  %462 = vmatprep.mubr.f32.mxu0 %v270_v46 }
  0x51   :  { %607 = vmatprep.mubr.f32.mxu1 %v272_v47 }
  0x53   :  { %463 = vmatmul.mubr.f32.gmra.mrb[24].mxu0 %v269_v50 }
  0x54   :  { %608 = vmatmul.mubr.f32.gmra.mrb[24].mxu1 %v271_v51  ;;  %467 = vmatprep.mubr.f32.mxu0 %v275_v52 }
  0x55   :  { %612 = vmatprep.mubr.f32.mxu1 %v277_v53 }
  0x57   :  { %468 = vmatmul.mubr.f32.gmra.mrb[26].mxu0 %v274_v56 }
  0x58   :  { %613 = vmatmul.mubr.f32.gmra.mrb[26].mxu1 %v276_v57  ;;  %472 = vmatprep.mubr.f32.mxu0 %v280_v58 }
  0x59   :  { %617 = vmatprep.mubr.f32.mxu1 %v282_v59 }
  0x5b   :  { %473 = vmatmul.mubr.f32.gmra.mrb[28].mxu0 %v279_v62 }
  0x5c   :  { %618 = vmatmul.mubr.f32.gmra.mrb[28].mxu1 %v281_v63  ;;  %477 = vmatprep.mubr.f32.mxu0 %v285_v0 }
  0x5d   :  { %622 = vmatprep.mubr.f32.mxu1 %v287_v1 }
  0x5f   :  { %478 = vmatmul.mubr.f32.gmra.mrb[30].mxu0 %v284_v4 }
  0x60   :  { %623 = vmatmul.mubr.f32.gmra.mrb[30].mxu1 %v286_v5  ;;  %1554 = vmatprep.mubr.msk.f32.mxu0 %vm289_vm0, %v213_v6 }
  0x61   :  { %1566 = vmatprep.mubr.msk.f32.mxu1 %vm289_vm0, %v253_v7 }
  0x63   :  { %1555 = vmatmul.mubr.msk.f32.vlgmr.msra.gmra.mrb[32].mxu0 %vm289_vm0, %v218_v10 }
  0x64   :  { %1567 = vmatmul.mubr.msk.f32.vlgmr.msra.gmra.mrb[32].mxu1 %vm289_vm0, %v258_v11  ;;  %1557 = vmatprep.mubr.msk.f32.mxu0 %vm289_vm0, %v223_v12 }
  0x65   :  { %1569 = vmatprep.mubr.msk.f32.mxu1 %vm289_vm0, %v263_v13 }
  0x67   :  { %1558 = vmatmul.mubr.msk.f32.gmra.mrb[34].mxu0 %vm289_vm0, %v228_v16 }
  0x68   :  { %1570 = vmatmul.mubr.msk.f32.gmra.mrb[34].mxu1 %vm289_vm0, %v268_v17  ;;  %1560 = vmatprep.mubr.msk.f32.mxu0 %vm289_vm0, %v233_v18 }
  0x69   :  { %1572 = vmatprep.mubr.msk.f32.mxu1 %vm289_vm0, %v273_v19 }
  0x6b   :  { %1561 = vmatmul.mubr.msk.f32.gmra.mrb[36].mxu0 %vm289_vm0, %v238_v22 }
  0x6c   :  { %1573 = vmatmul.mubr.msk.f32.gmra.mrb[36].mxu1 %vm289_vm0, %v278_v23  ;;  %1563 = vmatprep.mubr.msk.f32.mxu0 %vm289_vm0, %v243_v24 }
  0x6d   :  { %1575 = vmatprep.mubr.msk.f32.mxu1 %vm289_vm0, %v283_v25 }
  0x6f   :  { %1564 = vmatmul.mubr.msk.f32.gmra.mrb[38].mxu0 %vm289_vm0, %v248_v26 }
  0x70   :  { %1576 = vmatmul.mubr.msk.f32.gmra.mrb[38].mxu1 %vm289_vm0, %v288_v27 }
  0xf6   :  { %v1386_v28 = vpop.f32.mrb[0].mxu0 }
  0xf7   :  { %v1466_v29 = vpop.f32.mrb[0].mxu1  ;;  %v1387_v30 = vpop.f32.mrb[1].mxu0 }
  0xf8   :  { %v1467_v31 = vpop.f32.mrb[1].mxu1  ;;  %v1388_v32 = vadd.f32 %v1387_v30, %v1386_v28 }
  0xf9   :  { %v1468_v33 = vadd.f32 %v1467_v31, %v1466_v29 }
  0xfa   :  { %v1389_v34 = vpop.f32.mrb[2].mxu0 }
  0xfb   :  { %v1469_v35 = vpop.f32.mrb[2].mxu1  ;;  %v1947_v36 = vadd.f32 %v1468_v33, %v1388_v32  ;;  %v1390_v37 = vpop.f32.mrb[3].mxu0 }
  0xfc   :  { %v1470_v38 = vpop.f32.mrb[3].mxu1  ;;  %v1391_v39 = vadd.f32 %v1390_v37, %v1389_v34 }
  0xfd   :  { %v1471_v40 = vadd.f32 %v1470_v38, %v1469_v35 }
  0xfe   :  { %v1392_v41 = vpop.f32.mrb[4].mxu0 }
  0xff   :  { %v1472_v42 = vpop.f32.mrb[4].mxu1  ;;  %v1949_v43 = vadd.f32 %v1471_v40, %v1391_v39  ;;  %v1393_v44 = vpop.f32.mrb[5].mxu0 }
 0x100   :  { %v1473_v45 = vpop.f32.mrb[5].mxu1  ;;  %v1394_v46 = vadd.f32 %v1393_v44, %v1392_v41 }
 0x101   :  { %v1474_v47 = vadd.f32 %v1473_v45, %v1472_v42 }
 0x102   :  { %v1395_v48 = vpop.f32.mrb[6].mxu0 }
 0x103   :  { %v1475_v49 = vpop.f32.mrb[6].mxu1  ;;  %v1951_v50 = vadd.f32 %v1474_v47, %v1394_v46  ;;  %v1396_v51 = vpop.f32.mrb[7].mxu0 }
 0x104   :  { %v1476_v52 = vpop.f32.mrb[7].mxu1  ;;  %v1397_v53 = vadd.f32 %v1396_v51, %v1395_v48 }
 0x105   :  { %v1477_v54 = vadd.f32 %v1476_v52, %v1475_v49 }
 0x106   :  { %v1398_v55 = vpop.f32.mrb[8].mxu0 }
 0x107   :  { %v1478_v56 = vpop.f32.mrb[8].mxu1  ;;  %v1953_v57 = vadd.f32 %v1477_v54, %v1397_v53  ;;  %v1399_v58 = vpop.f32.mrb[9].mxu0 }
 0x108   :  { %v1479_v59 = vpop.f32.mrb[9].mxu1  ;;  %v1400_v60 = vadd.f32 %v1399_v58, %v1398_v55 }
 0x109   :  { %v1480_v61 = vadd.f32 %v1479_v59, %v1478_v56 }
 0x10a   :  { %v1401_v62 = vpop.f32.mrb[10].mxu0 }
 0x10b   :  { %v1481_v63 = vpop.f32.mrb[10].mxu1  ;;  %v1955_v0 = vadd.f32 %v1480_v61, %v1400_v60  ;;  %v1402_v1 = vpop.f32.mrb[11].mxu0 }
 0x10c   :  { %v1482_v2 = vpop.f32.mrb[11].mxu1  ;;  %v1403_v3 = vadd.f32 %v1402_v1, %v1401_v62 }
 0x10d   :  { %v1483_v4 = vadd.f32 %v1482_v2, %v1481_v63 }
 0x10e   :  { %v1404_v5 = vpop.f32.mrb[12].mxu0 }
 0x10f   :  { %v1484_v6 = vpop.f32.mrb[12].mxu1  ;;  %v1957_v7 = vadd.f32 %v1483_v4, %v1403_v3  ;;  %v1405_v8 = vpop.f32.mrb[13].mxu0 }
 0x110   :  { %v1485_v9 = vpop.f32.mrb[13].mxu1  ;;  %v1406_v10 = vadd.f32 %v1405_v8, %v1404_v5 }
 0x111   :  { %v1486_v11 = vadd.f32 %v1485_v9, %v1484_v6 }
 0x112   :  { %v1407_v12 = vpop.f32.mrb[14].mxu0 }
 0x113   :  { %v1487_v13 = vpop.f32.mrb[14].mxu1  ;;  %v1959_v14 = vadd.f32 %v1486_v11, %v1406_v10  ;;  %v1408_v15 = vpop.f32.mrb[15].mxu0 }
 0x114   :  { %v1488_v16 = vpop.f32.mrb[15].mxu1  ;;  %v1409_v17 = vadd.f32 %v1408_v15, %v1407_v12 }
 0x115   :  { %v1489_v18 = vadd.f32 %v1488_v16, %v1487_v13 }
 0x116   :  { %v1410_v19 = vpop.f32.mrb[16].mxu0 }
 0x117   :  { %v1490_v20 = vpop.f32.mrb[16].mxu1  ;;  %v1961_v21 = vadd.f32 %v1489_v18, %v1409_v17  ;;  %v1411_v22 = vpop.f32.mrb[17].mxu0 }
 0x118   :  { %v1491_v23 = vpop.f32.mrb[17].mxu1  ;;  %v1412_v24 = vadd.f32 %v1411_v22, %v1410_v19 }
 0x119   :  { %v1492_v25 = vadd.f32 %v1491_v23, %v1490_v20 }
 0x11a   :  { %v1413_v26 = vpop.f32.mrb[18].mxu0 }
 0x11b   :  { %v1493_v27 = vpop.f32.mrb[18].mxu1  ;;  %v590_v28 = vadd.f32 %v1492_v25, %v1412_v24  ;;  %v1414_v29 = vpop.f32.mrb[19].mxu0 }
 0x11c   :  { %v1494_v30 = vpop.f32.mrb[19].mxu1  ;;  %v1415_v31 = vadd.f32 %v1414_v29, %v1413_v26 }
 0x11d   :  { %v1495_v32 = vadd.f32 %v1494_v30, %v1493_v27 }
 0x11e   :  { %v1416_v33 = vpop.f32.mrb[20].mxu0 }
 0x11f   :  { %v1496_v34 = vpop.f32.mrb[20].mxu1  ;;  %v595_v35 = vadd.f32 %v1495_v32, %v1415_v31  ;;  %v1417_v37 = vpop.f32.mrb[21].mxu0 }
 0x120   :  { %v1497_v38 = vpop.f32.mrb[21].mxu1  ;;  %v1418_v39 = vadd.f32 %v1417_v37, %v1416_v33 }
 0x121   :  { %v1498_v40 = vadd.f32 %v1497_v38, %v1496_v34 }
 0x122   :  { %v1419_v41 = vpop.f32.mrb[22].mxu0 }
 0x123   :  { %v1499_v42 = vpop.f32.mrb[22].mxu1  ;;  %v600_v44 = vadd.f32 %v1498_v40, %v1418_v39  ;;  %v1420_v45 = vpop.f32.mrb[23].mxu0 }
 0x124   :  { %v1500_v46 = vpop.f32.mrb[23].mxu1  ;;  %v1421_v47 = vadd.f32 %v1420_v45, %v1419_v41 }
 0x125   :  { %v1501_v48 = vadd.f32 %v1500_v46, %v1499_v42 }
 0x126   :  { %v1422_v49 = vpop.f32.mrb[24].mxu0 }
 0x127   :  { %v1502_v51 = vpop.f32.mrb[24].mxu1  ;;  %v605_v52 = vadd.f32 %v1501_v48, %v1421_v47  ;;  %v1423_v53 = vpop.f32.mrb[25].mxu0 }
 0x128   :  { %v1503_v54 = vpop.f32.mrb[25].mxu1  ;;  %v1424_v55 = vadd.f32 %v1423_v53, %v1422_v49 }
 0x129   :  { %v1504_v56 = vadd.f32 %v1503_v54, %v1502_v51 }
 0x12a   :  { %v1425_v58 = vpop.f32.mrb[26].mxu0 }
 0x12b   :  { %v1505_v59 = vpop.f32.mrb[26].mxu1  ;;  %v610_v60 = vadd.f32 %v1504_v56, %v1424_v55  ;;  %v1426_v61 = vpop.f32.mrb[27].mxu0 }
 0x12c   :  { %v1506_v62 = vpop.f32.mrb[27].mxu1  ;;  %v1427_v63 = vadd.f32 %v1426_v61, %v1425_v58 }
 0x12d   :  { %v1507_v1 = vadd.f32 %v1506_v62, %v1505_v59 }
 0x12e   :  { %v1428_v2 = vpop.f32.mrb[28].mxu0 }
 0x12f   :  { %v1508_v3 = vpop.f32.mrb[28].mxu1  ;;  %v615_v4 = vadd.f32 %v1507_v1, %v1427_v63  ;;  %v1429_v5 = vpop.f32.mrb[29].mxu0 }
 0x130   :  { %v1509_v6 = vpop.f32.mrb[29].mxu1  ;;  %v1430_v8 = vadd.f32 %v1429_v5, %v1428_v2 }
 0x131   :  { %v1510_v9 = vadd.f32 %v1509_v6, %v1508_v3 }
 0x132   :  { %v1431_v10 = vpop.f32.mrb[30].mxu0 }
 0x133   :  { %v1511_v11 = vpop.f32.mrb[30].mxu1  ;;  %v620_v12 = vadd.f32 %v1510_v9, %v1430_v8  ;;  %v1432_v13 = vpop.f32.mrb[31].mxu0 }
 0x134   :  { %v1512_v15 = vpop.f32.mrb[31].mxu1  ;;  %v1433_v16 = vadd.f32 %v1432_v13, %v1431_v10 }
 0x135   :  { %v1513_v17 = vadd.f32 %v1512_v15, %v1511_v11 }
 0x136   :  { %v1556_v18 = vpop.f32.mrb[32].mxu0 }
 0x137   :  { %v1568_v19 = vpop.f32.mrb[32].mxu1  ;;  %v625_v20 = vadd.f32 %v1513_v17, %v1433_v16  ;;  %v1964_v22 = vadd.f32 %v1556_v18, %v1949_v43  ;;  %v694_v24 = vpop.f32.mrb[33].mxu0 }
 0x138   :  { %v1966_v23 = vadd.f32 %v1568_v19, %v595_v35  ;;  %v734_v25 = vpop.f32.mrb[33].mxu1  ;;  %v1969_v26 = vadd.f32 %v694_v24, %v1947_v36 }
 0x139   :  { %v1971_v27 = vadd.f32 %v734_v25, %v590_v28  ;;  %v777_v30 = vsel %vm773_vm1, %v1964_v22, 0.0  ;;  %v823_v31 = vmul.f32 %v1964_v22, %v1964_v22 }
 0x13a   :  { %v801_v29 = vsel %vm773_vm1, %v1966_v23, 0.0  ;;  %v1559_v43 = vpop.f32.mrb[34].mxu0  ;;  %778 = vadd.xlane.f32.xlu0 %v777_v30  ;;  %v774_v39 = vsel %vm773_vm1, %v1969_v26, 0.0  ;;  %v831_v40 = vmul.f32 %v1966_v23, %v1966_v23  ;;  %v822_v51 = vmul.f32 %v1969_v26, %v1969_v26 }
 0x13b   :  { %v1571_v32 = vpop.f32.mrb[34].mxu1  ;;  %802 = vadd.xlane.f32.xlu1 %v801_v29  ;;  %v1980_v33 = vadd.f32 %v1559_v43, %v1953_v57  ;;  %v704_v28 = vpop.f32.mrb[35].mxu0  ;;  %v841_v38 = vsel %vm773_vm1, %v823_v31, 0.0  ;;  %v798_v49 = vsel %vm773_vm1, %v1971_v27, 0.0  ;;  %v830_v61 = vmul.f32 %v1971_v27, %v1971_v27 }
 0x13c   :  { %v1982_v36 = vadd.f32 %v1571_v32, %v605_v52  ;;  %v744_v34 = vpop.f32.mrb[35].mxu1  ;;  %v1985_v35 = vadd.f32 %v704_v28, %v1951_v50  ;;  %v865_v48 = vsel %vm773_vm1, %v831_v40, 0.0 }
 0x13d   :  { %v1987_v37 = vadd.f32 %v744_v34, %v600_v44  ;;  %v783_v59 = vsel %vm773_vm1, %v1980_v33, 0.0  ;;  %v862_v62 = vsel %vm773_vm1, %v830_v61, 0.0  ;;  %v825_v1 = vmul.f32 %v1980_v33, %v1980_v33 }
 0x13e   :  { %v1562_v41 = vpop.f32.mrb[36].mxu0  ;;  %775 = vadd.xlane.f32.xlu0 %v774_v39  ;;  %v824_v2 = vmul.f32 %v1985_v35, %v1985_v35  ;;  %v833_v5 = vmul.f32 %v1982_v36, %v1982_v36 }
 0x13f   :  { %v1574_v57 = vpop.f32.mrb[36].mxu1  ;;  %842 = vadd.xlane.f32.xlu1 %v841_v38  ;;  %v1995_v42 = vadd.f32 %v1562_v41, %v1957_v7  ;;  %v714_v50 = vpop.f32.mrb[37].mxu0  ;;  %v804_v63 = vsel %vm773_vm1, %v1987_v37, 0.0  ;;  %v847_v3 = vsel %vm773_vm1, %v825_v1, 0.0  ;;  %v832_v6 = vmul.f32 %v1987_v37, %v1987_v37 }
 0x140   :  { %v1997_v45 = vadd.f32 %v1574_v57, %v615_v4  ;;  %v754_v44 = vpop.f32.mrb[37].mxu1  ;;  %v2000_v46 = vadd.f32 %v714_v50, %v1955_v0  ;;  %v844_v4 = vsel %vm773_vm1, %v824_v2, 0.0  ;;  %v871_v8 = vsel %vm773_vm1, %v833_v5, 0.0 }
 0x141   :  { %v2002_v47 = vadd.f32 %v754_v44, %v610_v60  ;;  %v838_v60 = vsel %vm773_vm1, %v822_v51, 0.0  ;;  %v868_v9 = vsel %vm773_vm1, %v832_v6, 0.0  ;;  %v789_v10 = vsel %vm773_vm1, %v1995_v42, 0.0 }
 0x142   :  { %v1565_v52 = vpop.f32.mrb[38].mxu0  ;;  %799 = vadd.xlane.f32.xlu0 %v798_v49  ;;  %v786_v11 = vsel %vm773_vm1, %v2000_v46, 0.0  ;;  %v827_v15 = vmul.f32 %v1995_v42, %v1995_v42  ;;  %v826_v16 = vmul.f32 %v2000_v46, %v2000_v46  ;;  %v835_v19 = vmul.f32 %v1997_v45, %v1997_v45 }
 0x143   :  { %v1577_v7 = vpop.f32.mrb[38].mxu1  ;;  %866 = vadd.xlane.f32.xlu1 %v865_v48  ;;  %v2010_v53 = vadd.f32 %v1565_v52, %v1961_v21  ;;  %v724_v0 = vpop.f32.mrb[39].mxu0  ;;  %v807_v21 = vsel %vm773_vm1, %v1982_v36, 0.0  ;;  %v810_v13 = vsel %vm773_vm1, %v2002_v47, 0.0  ;;  %v1677_v50 = vmov 0  }
 0x144   :  { %v2012_v54 = vadd.f32 %v1577_v7, %v625_v20  ;;  %v764_v55 = vpop.f32.mrb[39].mxu1  ;;  %v2015_v56 = vadd.f32 %v724_v0, %v1959_v14  ;;  %v780_v14 = vsel %vm773_vm1, %v1985_v35, 0.0  ;;  %v853_v17 = vsel %vm773_vm1, %v827_v15, 0.0  ;;  %1668 = vset.pattern.permute.xlu1 %v1677_v50  ;;  %1667 = vset.pattern.permute.xlu0 %v1677_v50 }
 0x145   :  { %v2017_v58 = vadd.f32 %v764_v55, %v620_v12  ;;  %v813_v12 = vsel %vm773_vm1, %v1997_v45, 0.0  ;;  %v850_v18 = vsel %vm773_vm1, %v826_v16, 0.0  ;;  %v834_v20 = vmul.f32 %v2002_v47, %v2002_v47 }
 0x146   :  { %839 = vadd.xlane.f32.xlu0 %v838_v60  ;;  %v877_v24 = vsel %vm773_vm1, %v835_v19, 0.0  ;;  %v795_v29 = vsel %vm773_vm1, %v2010_v53, 0.0  ;;  %v792_v30 = vsel %vm773_vm1, %v2015_v56, 0.0  ;;  %v819_v31 = vsel %vm773_vm1, %v2012_v54, 0.0 }
 0x147   :  { %784 = vadd.xlane.f32.xlu1 %v783_v59  ;;  %v874_v25 = vsel %vm773_vm1, %v834_v20, 0.0  ;;  %v816_v43 = vsel %vm773_vm1, %v2017_v58, 0.0  ;;  %v829_v32 = vmul.f32 %v2010_v53, %v2010_v53  ;;  %v828_v28 = vmul.f32 %v2015_v56, %v2015_v56 }
 0x148   :  { %v837_v39 = vmul.f32 %v2012_v54, %v2012_v54  ;;  %v836_v40 = vmul.f32 %v2017_v58, %v2017_v58 }
 0x149   :  { %v859_v34 = vsel %vm773_vm1, %v829_v32, 0.0  ;;  %v856_v38 = vsel %vm773_vm1, %v828_v28, 0.0 }
 0x14a   :  { %863 = vadd.xlane.f32.xlu0 %v862_v62  ;;  %v883_v41 = vsel %vm773_vm1, %v837_v39, 0.0  ;;  %v880_v57 = vsel %vm773_vm1, %v836_v40, 0.0 }
 0x14b   :  { %808 = vadd.xlane.f32.xlu1 %v807_v21 }
 0x14e   :  { %805 = vadd.xlane.f32.xlu0 %v804_v63 }
 0x14f   :  { %781 = vadd.xlane.f32.xlu1 %v780_v14 }
 0x152   :  { %845 = vadd.xlane.f32.xlu0 %v844_v4 }
 0x153   :  { %848 = vadd.xlane.f32.xlu1 %v847_v3 }
 0x156   :  { %869 = vadd.xlane.f32.xlu0 %v868_v9 }
 0x157   :  { %872 = vadd.xlane.f32.xlu1 %v871_v8 }
 0x15a   :  { %787 = vadd.xlane.f32.xlu0 %v786_v11 }
 0x15b   :  { %790 = vadd.xlane.f32.xlu1 %v789_v10 }
 0x15e   :  { %811 = vadd.xlane.f32.xlu0 %v810_v13 }
 0x15f   :  { %814 = vadd.xlane.f32.xlu1 %v813_v12 }
 0x162   :  { %851 = vadd.xlane.f32.xlu0 %v850_v18 }
 0x163   :  { %854 = vadd.xlane.f32.xlu1 %v853_v17 }
 0x166   :  { %875 = vadd.xlane.f32.xlu0 %v874_v25 }
 0x167   :  { %878 = vadd.xlane.f32.xlu1 %v877_v24 }
 0x16a   :  { %793 = vadd.xlane.f32.xlu0 %v792_v30 }
 0x16b   :  { %796 = vadd.xlane.f32.xlu1 %v795_v29 }
 0x16e   :  { %817 = vadd.xlane.f32.xlu0 %v816_v43 }
 0x16f   :  { %820 = vadd.xlane.f32.xlu1 %v819_v31 }
 0x172   :  { %857 = vadd.xlane.f32.xlu0 %v856_v38 }
 0x173   :  { %860 = vadd.xlane.f32.xlu1 %v859_v34 }
 0x176   :  { %881 = vadd.xlane.f32.xlu0 %v880_v57 }
 0x177   :  { %884 = vadd.xlane.f32.xlu1 %v883_v41 }
 0x1c7   :  { %v779_v48 = vpop.xlane.xlu0 %778 }
 0x1c8   :  { %v803_v44 = vpop.xlane.xlu1 %802 }
 0x1cb   :  { %v776_v51 = vpop.xlane.xlu0 %775 }
 0x1cc   :  { %v843_v49 = vpop.xlane.xlu1 %842 }
 0x1cf   :  { %v800_v7 = vpop.xlane.xlu0 %799 }
 0x1d0   :  { %v867_v52 = vpop.xlane.xlu1 %866 }
 0x1d3   :  { %v840_v55 = vpop.xlane.xlu0 %839 }
 0x1d4   :  { %v785_v0 = vpop.xlane.xlu1 %784 }
 0x1d7   :  { %v864_v60 = vpop.xlane.xlu0 %863 }
 0x1d8   :  { %v809_v59 = vpop.xlane.xlu1 %808 }
 0x1db   :  { %v806_v21 = vpop.xlane.xlu0 %805 }
 0x1dc   :  { %v782_v61 = vpop.xlane.xlu1 %781 }
 0x1df   :  { %v846_v14 = vpop.xlane.xlu0 %845 }
 0x1e0   :  { %v849_v62 = vpop.xlane.xlu1 %848 }
 0x1e3   :  { %v870_v1 = vpop.xlane.xlu0 %869 }
 0x1e4   :  { %v873_v63 = vpop.xlane.xlu1 %872 }
 0x1e7   :  { %v788_v3 = vpop.xlane.xlu0 %787 }
 0x1e8   :  { %v791_v2 = vpop.xlane.xlu1 %790  ;;  %v886_v5 = vadd.f32 %v788_v3, %v776_v51 }
 0x1e9   :  { %v887_v4 = vadd.f32 %v791_v2, %v779_v48 }
 0x1ea   :  { %v894_v8 = vadd.f32 %v886_v5, %v800_v7 }
 0x1eb   :  { %v895_v6 = vadd.f32 %v887_v4, %v803_v44  ;;  %v812_v10 = vpop.xlane.xlu0 %811 }
 0x1ec   :  { %v815_v9 = vpop.xlane.xlu1 %814  ;;  %v902_v12 = vadd.f32 %v894_v8, %v812_v10 }
 0x1ed   :  { %v903_v11 = vadd.f32 %v895_v6, %v815_v9 }
 0x1ee   :  { %v2085_v19 = vmul.f32 0.0078125, %v902_v12 }
 0x1ef   :  { %v852_v15 = vpop.xlane.xlu0 %851  ;;  %v2083_v18 = vmul.f32 0.0078125, %v903_v11 }
 0x1f0   :  { %v855_v13 = vpop.xlane.xlu1 %854  ;;  %v890_v17 = vadd.f32 %v852_v15, %v840_v55  ;;  %v918_v32 = vmul.f32 %v2085_v19, %v2085_v19 }
 0x1f1   :  { %v891_v16 = vadd.f32 %v855_v13, %v843_v49  ;;  %v919_v43 = vmul.f32 %v2083_v18, %v2083_v18 }
 0x1f2   :  { %v898_v24 = vadd.f32 %v890_v17, %v864_v60 }
 0x1f3   :  { %v899_v20 = vadd.f32 %v891_v16, %v867_v52  ;;  %v876_v29 = vpop.xlane.xlu0 %875 }
 0x1f4   :  { %v879_v25 = vpop.xlane.xlu1 %878  ;;  %v906_v31 = vadd.f32 %v898_v24, %v876_v29 }
 0x1f5   :  { %v907_v30 = vadd.f32 %v899_v20, %v879_v25 }
 0x1f6   :  { %v914_v34 = vmul.f32 0.0078125, %v906_v31 }
 0x1f7   :  { %v915_v28 = vmul.f32 0.0078125, %v907_v30  ;;  %v794_v39 = vpop.xlane.xlu0 %793  ;;  %v929_v30 = vld [vmem:[%s2199_s2 + $0x18] sm:$0xff] }
 0x1f8   :  { %v797_v38 = vpop.xlane.xlu1 %796  ;;  %v922_v41 = vsub.f32 %v914_v34, %v918_v32  ;;  %v888_v50 = vadd.f32 %v794_v39, %v782_v61  ;;  %v928_v39 = vld [vmem:[%s2199_s2 + $0x10] sm:$0xff] }
 0x1f9   :  { %v923_v40 = vsub.f32 %v915_v28, %v919_v43  ;;  %v889_v57 = vadd.f32 %v797_v38, %v785_v0  ;;  %v943_v28 = vld [vmem:[%s2200_s3 + $0x8] sm:$0xff] }
 0x1fa   :  { %v930_v48 = vadd.f32 1e-05, %v922_v41  ;;  %v896_v7 = vadd.f32 %v888_v50, %v806_v21  ;;  %v926_v21 = vld [vmem:[%s2199_s2] sm:$0xff] }
 0x1fb   :  { %v931_v44 = vadd.f32 1e-05, %v923_v40  ;;  %v897_v49 = vadd.f32 %v889_v57, %v809_v59  ;;  %v818_v52 = vpop.xlane.xlu0 %817  ;;  %v927_v59 = vld [vmem:[%s2199_s2 + $0x8] sm:$0xff]  ;;  %v942_v57 = vld [vmem:[%s2200_s3] sm:$0xff] }
 0x1fc   :  { %v821_v51 = vpop.xlane.xlu1 %820  ;;  %v904_v3 = vadd.f32 %v896_v7, %v818_v52 }
 0x1fd   :  { %1669 = vrsqrt.f32 %v931_v44  ;;  %v905_v55 = vadd.f32 %v897_v49, %v821_v51  ;;  %v944_v44 = vld [vmem:[%s2200_s3 + $0x10] sm:$0xff]  ;;  %v945_v51 = vld [vmem:[%s2200_s3 + $0x18] sm:$0xff] }
 0x1fe   :  { %1671 = vrsqrt.f32 %v930_v48  ;;  %v912_v61 = vmul.f32 0.0078125, %v904_v3 }
 0x1ff   :  { %v858_v2 = vpop.xlane.xlu0 %857  ;;  %v913_v6 = vmul.f32 0.0078125, %v905_v55 }
 0x200   :  { %v861_v60 = vpop.xlane.xlu1 %860  ;;  %v892_v5 = vadd.f32 %v858_v2, %v846_v14 }
 0x201   :  { %v893_v4 = vadd.f32 %v861_v60, %v849_v62  ;;  %v921_v15 = vmul.f32 %v913_v6, %v913_v6 }
 0x202   :  { %v900_v9 = vadd.f32 %v892_v5, %v870_v1  ;;  %v920_v1 = vmul.f32 %v912_v61, %v912_v61 }
 0x203   :  { %v901_v8 = vadd.f32 %v893_v4, %v873_v63  ;;  %v882_v0 = vpop.xlane.xlu0 %881 }
 0x204   :  { %v885_v10 = vpop.xlane.xlu1 %884  ;;  %v908_v12 = vadd.f32 %v900_v9, %v882_v0 }
 0x205   :  { %v909_v11 = vadd.f32 %v901_v8, %v885_v10 }
 0x206   :  { %v916_v14 = vmul.f32 0.0078125, %v908_v12 }
 0x207   :  { %v1670_v13 = vpop.eup %1669  ;;  %v917_v62 = vmul.f32 0.0078125, %v909_v11 }
 0x208   :  { %v1672_v16 = vpop.eup %1671  ;;  %v939_v63 = vmul.f32 %v1670_v13, %v927_v59  ;;  %v924_v25 = vsub.f32 %v916_v14, %v920_v1 }
 0x209   :  { %v925_v17 = vsub.f32 %v917_v62, %v921_v15  ;;  %v938_v20 = vmul.f32 %v1672_v16, %v926_v21 }
 0x20a   :  { %961 = vperm.xlu1 %1668, %v939_v63   ;;  %v932_v29 = vadd.f32 1e-05, %v924_v25  ;;  %v947_v32 = vmul.f32 %v939_v63, %v2083_v18 }
 0x20b   :  { %v933_v24 = vadd.f32 1e-05, %v925_v17  ;;  %956 = vperm.xlu0 %1667, %v938_v20   ;;  %v946_v41 = vmul.f32 %v938_v20, %v2085_v19 }
 0x20c   :  { %v951_v34 = vsub.f32 %v943_v28, %v947_v32 }
 0x20d   :  { %1673 = vrsqrt.f32 %v933_v24  ;;  %v950_v18 = vsub.f32 %v942_v57, %v946_v41 }
 0x20e   :  { %1675 = vrsqrt.f32 %v932_v29 }
 0x217   :  { %v1674_v31 = vpop.eup %1673 }
 0x218   :  { %v941_v43 = vmul.f32 %v1674_v31, %v929_v30  ;;  %v1676_v38 = vpop.eup %1675 }
 0x219   :  { %v940_v40 = vmul.f32 %v1676_v38, %v928_v39 }
 0x21a   :  { %971 = vperm.xlu1 %1668, %v941_v43   ;;  %v949_v49 = vmul.f32 %v941_v43, %v913_v6 }
 0x21b   :  { %v948_v50 = vmul.f32 %v940_v40, %v912_v61 }
 0x21c   :  { %v953_v19 = vsub.f32 %v945_v51, %v949_v49 }
 0x21d   :  { %v952_v48 = vsub.f32 %v944_v44, %v948_v50 }
 0x21e   :  { %997 = vperm.xlu1 %1668, %v951_v34  }
 0x222   :  { %966 = vperm.xlu1 %1668, %v940_v40  }
 0x226   :  { %992 = vperm.xlu1 %1668, %v950_v18  }
 0x22a   :  { %1002 = vperm.xlu1 %1668, %v952_v48  }
 0x22e   :  { %1007 = vperm.xlu1 %1668, %v953_v19  }
 0x289   :  { %v962_v52 = vpop.permute.xlu1 %961 }
 0x28a   :  { %v975_v55 = vmul.f32 %v962_v52, %v1964_v22  ;;  %v979_v60 = vmul.f32 %v962_v52, %v1995_v42  ;;  %v983_v2 = vmul.f32 %v962_v52, %v1966_v23  ;;  %v987_v3 = vmul.f32 %v962_v52, %v1997_v45  ;;  %v957_v12 = vpop.permute.xlu0 %956 }
 0x28b   :  { %v974_v23 = vmul.f32 %v957_v12, %v1969_v26  ;;  %v978_v45 = vmul.f32 %v957_v12, %v2000_v46  ;;  %v982_v15 = vmul.f32 %v957_v12, %v1971_v27  ;;  %v986_v62 = vmul.f32 %v957_v12, %v2002_v47 }
 0x299   :  { %v972_v7 = vpop.permute.xlu1 %971 }
 0x29d   :  { %v998_v4 = vpop.permute.xlu1 %997 }
 0x29e   :  { %v1011_v5 = vadd.f32 %v998_v4, %v975_v55  ;;  %v1015_v6 = vadd.f32 %v998_v4, %v979_v60  ;;  %v1019_v8 = vadd.f32 %v998_v4, %v983_v2  ;;  %v1023_v9 = vadd.f32 %v998_v4, %v987_v3 }
 0x2a0   :  { %v1027_v10 = vmax.f32 %v1011_v5, 0.0  ;;  %v1031_v0 = vmax.f32 %v1015_v6, 0.0  ;;  %v1035_v61 = vmax.f32 %v1019_v8, 0.0  ;;  %v1039_v11 = vmax.f32 %v1023_v9, 0.0 }
 0x2a1   :  { %v967_v59 = vpop.permute.xlu1 %966 }
 0x2a2   :  { %v1160_v21 = vpack.c.bf16 %v1027_v10, %v1027_v10  ;;  %v1164_v22 = vpack.c.bf16 %v1031_v0, %v1031_v0  ;;  %v1168_v13 = vpack.c.bf16 %v1035_v61, %v1035_v61  ;;  %v1172_v42 = vpack.c.bf16 %v1039_v11, %v1039_v11 }
 0x2a3   :  { %v976_v20 = vmul.f32 %v967_v59, %v1985_v35  ;;  %v980_v24 = vmul.f32 %v967_v59, %v2015_v56  ;;  %v984_v25 = vmul.f32 %v967_v59, %v1987_v37  ;;  %v988_v29 = vmul.f32 %v967_v59, %v2017_v58 }
 0x2a4   :  { %1108 = vst.msk [vmem:[%s2201_s4 + $0x4] sm:$0xf] %vm1106_vm2, %v1160_v21  ;;  %1112 = vst.msk [vmem:[%s2201_s4 + $0x14] sm:$0xf] %vm1106_vm2, %v1164_v22  ;;  %v977_v35 = vmul.f32 %v972_v7, %v1980_v33  ;;  %v981_v37 = vmul.f32 %v972_v7, %v2010_v53  ;;  %v985_v56 = vmul.f32 %v972_v7, %v1982_v36 }
 0x2a5   :  { %1116 = vst.msk [vmem:[%s2201_s4 + $0x24] sm:$0xf] %vm1106_vm2, %v1168_v13  ;;  %1120 = vst.msk [vmem:[%s2201_s4 + $0x34] sm:$0xf] %vm1106_vm2, %v1172_v42  ;;  %v993_v26 = vpop.permute.xlu1 %992  ;;  %v989_v58 = vmul.f32 %v972_v7, %v2012_v54 }
 0x2a6   :  { %v1010_v27 = vadd.f32 %v993_v26, %v974_v23  ;;  %v1014_v46 = vadd.f32 %v993_v26, %v978_v45  ;;  %v1018_v47 = vadd.f32 %v993_v26, %v982_v15  ;;  %v1022_v14 = vadd.f32 %v993_v26, %v986_v62 }
 0x2a8   :  { %v1026_v16 = vmax.f32 %v1010_v27, 0.0  ;;  %v1030_v63 = vmax.f32 %v1014_v46, 0.0  ;;  %v1034_v1 = vmax.f32 %v1018_v47, 0.0  ;;  %v1038_v17 = vmax.f32 %v1022_v14, 0.0 }
 0x2a9   :  { %v1003_v30 = vpop.permute.xlu1 %1002 }
 0x2aa   :  { %v1159_v31 = vpack.c.bf16 %v1026_v16, %v1026_v16  ;;  %v1163_v43 = vpack.c.bf16 %v1030_v63, %v1030_v63  ;;  %v1167_v32 = vpack.c.bf16 %v1034_v1, %v1034_v1  ;;  %v1171_v28 = vpack.c.bf16 %v1038_v17, %v1038_v17 }
 0x2ab   :  { %v1012_v34 = vadd.f32 %v1003_v30, %v976_v20  ;;  %v1016_v38 = vadd.f32 %v1003_v30, %v980_v24  ;;  %v1020_v39 = vadd.f32 %v1003_v30, %v984_v25  ;;  %v1024_v40 = vadd.f32 %v1003_v30, %v988_v29 }
 0x2ac   :  { %1107 = vst.msk [vmem:[%s2201_s4] sm:$0xf] %vm1106_vm2, %v1159_v31  ;;  %1111 = vst.msk [vmem:[%s2201_s4 + $0x10] sm:$0xf] %vm1106_vm2, %v1163_v43 }
 0x2ad   :  { %1115 = vst.msk [vmem:[%s2201_s4 + $0x20] sm:$0xf] %vm1106_vm2, %v1167_v32  ;;  %1119 = vst.msk [vmem:[%s2201_s4 + $0x30] sm:$0xf] %vm1106_vm2, %v1171_v28  ;;  %v1028_v41 = vmax.f32 %v1012_v34, 0.0  ;;  %v1032_v57 = vmax.f32 %v1016_v38, 0.0  ;;  %v1008_v44 = vpop.permute.xlu1 %1007 }
 0x2ae   :  { %v1036_v18 = vmax.f32 %v1020_v39, 0.0  ;;  %v1040_v50 = vmax.f32 %v1024_v40, 0.0  ;;  %v1013_v48 = vadd.f32 %v1008_v44, %v977_v35  ;;  %v1017_v49 = vadd.f32 %v1008_v44, %v981_v37 }
 0x2af   :  { %v1021_v51 = vadd.f32 %v1008_v44, %v985_v56  ;;  %v1025_v19 = vadd.f32 %v1008_v44, %v989_v58  ;;  %v1161_v52 = vpack.c.bf16 %v1028_v41, %v1028_v41  ;;  %v1165_v55 = vpack.c.bf16 %v1032_v57, %v1032_v57 }
 0x2b0   :  { %v1169_v60 = vpack.c.bf16 %v1036_v18, %v1036_v18  ;;  %v1173_v2 = vpack.c.bf16 %v1040_v50, %v1040_v50  ;;  %v1029_v33 = vmax.f32 %v1013_v48, 0.0  ;;  %v1033_v3 = vmax.f32 %v1017_v49, 0.0 }
 0x2b1   :  { %v1037_v53 = vmax.f32 %v1021_v51, 0.0  ;;  %v1041_v4 = vmax.f32 %v1025_v19, 0.0  ;;  %1109 = vst.msk [vmem:[%s2201_s4 + $0x8] sm:$0xf] %vm1106_vm2, %v1161_v52  ;;  %1113 = vst.msk [vmem:[%s2201_s4 + $0x18] sm:$0xf] %vm1106_vm2, %v1165_v55 }
 0x2b2   :  { %1117 = vst.msk [vmem:[%s2201_s4 + $0x28] sm:$0xf] %vm1106_vm2, %v1169_v60  ;;  %1121 = vst.msk [vmem:[%s2201_s4 + $0x38] sm:$0xf] %vm1106_vm2, %v1173_v2  ;;  %v1162_v36 = vpack.c.bf16 %v1029_v33, %v1029_v33  ;;  %v1166_v54 = vpack.c.bf16 %v1033_v3, %v1033_v3 }
 0x2b3   :  { %v1170_v7 = vpack.c.bf16 %v1037_v53, %v1037_v53  ;;  %v1174_v5 = vpack.c.bf16 %v1041_v4, %v1041_v4 }
 0x2b4   :  { %1110 = vst.msk [vmem:[%s2201_s4 + $0xc] sm:$0xf] %vm1106_vm2, %v1162_v36  ;;  %1114 = vst.msk [vmem:[%s2201_s4 + $0x1c] sm:$0xf] %vm1106_vm2, %v1166_v54 }
 0x2b5   :  { %1118 = vst.msk [vmem:[%s2201_s4 + $0x2c] sm:$0xf] %vm1106_vm2, %v1170_v7  ;;  %1122 = vst.msk [vmem:[%s2201_s4 + $0x3c] sm:$0xf] %vm1106_vm2, %v1174_v5 }

// kernel: generator_forward.7
= control target key start
LH: loop header
LB: loop body
LE: loop exit
PB: predicated region body
PF: predicated region fallthrough
CT: control target
= control target key end

     0   :  { %vm129_vm0 = vcmask 261120   ;;  %s1009_s0 = inlined_call_operand.vmem [shape: bf16[288,128], index: 0, kind: input, shape index: {}]   ;;  %s1010_s1 = inlined_call_operand.vmem [shape: bf16[64,288], index: 1, kind: input, shape index: {}]   ;;  %s1011_s2 = inlined_call_operand.vmem [shape: f32[16,1], index: 2, kind: input, shape index: {}]   ;;  %s1012_s3 = inlined_call_operand.vmem [shape: f32[16,1], index: 3, kind: input, shape index: {}]   ;;  %s1013_s4 = inlined_call_operand.vmem [shape: bf16[64,128], index: 4, kind: output, shape index: {}]  }
   0x1   :  { %v649_v0 = vld [vmem:[%s1009_s0 + $0x40] sm:$0xff]   ;;  %v650_v2 = vld [vmem:[%s1009_s0 + $0x48] sm:$0xff]   ;;  %v651_v4 = vld [vmem:[%s1009_s0 + $0x50] sm:$0xff]  }
   0x2   :  { %v551_v1 = vld [vmem:[%s1009_s0] sm:$0xff]   ;;  %751 = vmatprep.subr.bf16.mxu0 %v649_v0  ;;  %790 = vmatprep.subr.bf16.mxu1 %v649_v0  ;;  %v642_v3 = vld [vmem:[%s1009_s0 + $0x8] sm:$0xff]   ;;  %v643_v9 = vld [vmem:[%s1009_s0 + $0x10] sm:$0xff]  }
   0x3   :  { %753 = vmatpush3.bf16.msra.mxu0 %v551_v1  ;;  %798 = vmatpush3.bf16.msra.mxu1 %v551_v1  ;;  %v89_v5 = vld [vmem:[%s1010_s1] sm:$0xff]  ;;  %v101_v6 = vld [vmem:[%s1010_s1 + $0x48] sm:$0xff]  ;;  %v652_v10 = vld [vmem:[%s1009_s0 + $0x58] sm:$0xff]  }
   0x4   :  { %755 = vmatprep.subr.bf16.mxu0 %v650_v2  ;;  %791 = vmatprep.subr.bf16.mxu1 %v650_v2  ;;  %v106_v7 = vunpack.c.h.bf16 %v89_v5  ;;  %v124_v8 = vunpack.c.h.bf16 %v101_v6  ;;  %v644_v11 = vld [vmem:[%s1009_s0 + $0x18] sm:$0xff]   ;;  %v653_v12 = vld [vmem:[%s1009_s0 + $0x60] sm:$0xff]   ;;  %v654_v14 = vld [vmem:[%s1009_s0 + $0x68] sm:$0xff]   ;;  %v105_v23 = vunpack.c.l.bf16 %v89_v5  ;;  %v123_v24 = vunpack.c.l.bf16 %v101_v6 }
   0x5   :  { %v645_v13 = vld [vmem:[%s1009_s0 + $0x20] sm:$0xff]   ;;  %v646_v15 = vld [vmem:[%s1009_s0 + $0x28] sm:$0xff]   ;;  %v655_v16 = vld [vmem:[%s1009_s0 + $0x70] sm:$0xff]  }
   0x6   :  { %218 = vmatprep.mubr.f32.mxu0 %v106_v7  ;;  %248 = vmatprep.mubr.f32.mxu1 %v124_v8  ;;  %v647_v17 = vld [vmem:[%s1009_s0 + $0x30] sm:$0xff]   ;;  %v656_v18 = vld [vmem:[%s1009_s0 + $0x78] sm:$0xff]   ;;  %v657_v21 = vld [vmem:[%s1009_s0 + $0x80] sm:$0xff]  }
   0x7   :  { %757 = vmatpush3.bf16.msra.mxu0 %v642_v3  ;;  %799 = vmatpush3.bf16.msra.mxu1 %v642_v3  ;;  %v648_v19 = vld [vmem:[%s1009_s0 + $0x38] sm:$0xff]   ;;  %v91_v20 = vld [vmem:[%s1010_s1 + $0xc] sm:$0xff]  ;;  %v90_v29 = vld [vmem:[%s1010_s1 + $0x8] ss:$12 sps:$4 sm:$0xff]  }
   0x8   :  { %759 = vmatprep.subr.bf16.mxu0 %v651_v4  ;;  %792 = vmatprep.subr.bf16.mxu1 %v651_v4  ;;  %v103_v22 = vld [vmem:[%s1010_s1 + $0x54] sm:$0xff]  ;;  %v109_v25 = vunpack.c.h.bf16 %v91_v20  ;;  %v658_v28 = vld [vmem:[%s1009_s0 + $0x88] sm:$0xff]   ;;  %v108_v30 = vunpack.c.l.bf16 %v91_v20  ;;  %v107_v33 = vunpack.c.l.bf16 %v90_v29  ;;  %v110_v37 = vunpack.c.h.bf16 %v90_v29  ;;  %v99_v46 = vld [vmem:[%s1010_s1 + $0x3c] sm:$0xff] }
   0x9   :  { %v127_v26 = vunpack.c.h.bf16 %v103_v22  ;;  %v93_v27 = vld [vmem:[%s1010_s1 + $0x18] sm:$0xff]  ;;  %v126_v31 = vunpack.c.l.bf16 %v103_v22  ;;  %v95_v34 = vld [vmem:[%s1010_s1 + $0x24] sm:$0xff]  ;;  %v94_v35 = vld [vmem:[%s1010_s1 + $0x20] ss:$12 sps:$4 sm:$0xff]   ;;  %v121_v50 = vunpack.c.h.bf16 %v99_v46  ;;  %v120_v52 = vunpack.c.l.bf16 %v99_v46 }
   0xa   :  { %v112_v32 = vunpack.c.h.bf16 %v93_v27  ;;  %v111_v36 = vunpack.c.l.bf16 %v93_v27  ;;  %v115_v38 = vunpack.c.h.bf16 %v95_v34  ;;  %v113_v39 = vunpack.c.l.bf16 %v94_v35  ;;  %v97_v40 = vld [vmem:[%s1010_s1 + $0x30] sm:$0xff]  ;;  %v98_v41 = vld [vmem:[%s1010_s1 + $0x38] ss:$12 sps:$4 sm:$0xff]  }
   0xb   :  { %761 = vmatpush3.bf16.msra.mxu0 %v643_v9  ;;  %800 = vmatpush3.bf16.msra.mxu1 %v643_v9  ;;  %v114_v42 = vunpack.c.l.bf16 %v95_v34  ;;  %v116_v43 = vunpack.c.h.bf16 %v94_v35  ;;  %v118_v44 = vunpack.c.h.bf16 %v97_v40  ;;  %v119_v45 = vunpack.c.l.bf16 %v98_v41  ;;  %v102_v47 = vld [vmem:[%s1010_s1 + $0x50] ss:$12 sps:$4 sm:$0xff]  }
   0xc   :  { %763 = vmatprep.subr.bf16.mxu0 %v652_v10  ;;  %793 = vmatprep.subr.bf16.mxu1 %v652_v10  ;;  %v117_v48 = vunpack.c.l.bf16 %v97_v40  ;;  %v122_v49 = vunpack.c.h.bf16 %v98_v41  ;;  %v125_v51 = vunpack.c.l.bf16 %v102_v47  ;;  %v128_v53 = vunpack.c.h.bf16 %v102_v47 }
   0xf   :  { %765 = vmatpush3.bf16.msra.mxu0 %v644_v11  ;;  %801 = vmatpush3.bf16.msra.mxu1 %v644_v11 }
  0x10   :  { %767 = vmatprep.subr.bf16.mxu0 %v653_v12  ;;  %794 = vmatprep.subr.bf16.mxu1 %v653_v12 }
  0x13   :  { %769 = vmatpush3.bf16.msra.mxu0 %v645_v13  ;;  %802 = vmatpush3.bf16.msra.mxu1 %v645_v13 }
  0x14   :  { %771 = vmatprep.subr.bf16.mxu0 %v654_v14  ;;  %795 = vmatprep.subr.bf16.mxu1 %v654_v14 }
  0x17   :  { %773 = vmatpush3.bf16.msra.mxu0 %v646_v15  ;;  %803 = vmatpush3.bf16.msra.mxu1 %v646_v15 }
  0x18   :  { %775 = vmatprep.subr.bf16.mxu0 %v655_v16  ;;  %796 = vmatprep.subr.bf16.mxu1 %v655_v16 }
  0x1b   :  { %777 = vmatpush3.bf16.msra.mxu0 %v647_v17  ;;  %804 = vmatpush3.bf16.msra.mxu1 %v647_v17 }
  0x1c   :  { %779 = vmatprep.subr.bf16.mxu0 %v656_v18  ;;  %797 = vmatprep.subr.bf16.mxu1 %v656_v18 }
  0x1f   :  { %781 = vmatpush3.bf16.msra.mxu0 %v648_v19  ;;  %805 = vmatpush3.bf16.msra.mxu1 %v648_v19 }
  0x20   :  { %783 = vmatprep.subr.bf16.mxu1 %v657_v21 }
  0x22   :  { %219 = vmatmul.mubr.f32.vlgmr.msra.gmra.mrb[0].mxu0 %v105_v23  ;;  %249 = vmatmul.mubr.f32.vlgmr.msra.gmra.mrb[0].mxu1 %v123_v24 }
  0x23   :  { %785 = vmatpush3.bf16.msra.mxu1 %v657_v21  ;;  %223 = vmatprep.mubr.f32.mxu0 %v109_v25 }
  0x24   :  { %253 = vmatprep.mubr.f32.mxu1 %v127_v26  ;;  %787 = vmatprep.subr.bf16.mxu1 %v658_v28 }
  0x26   :  { %224 = vmatmul.mubr.f32.gmra.mrb[2].mxu0 %v108_v30  ;;  %254 = vmatmul.mubr.f32.gmra.mrb[2].mxu1 %v126_v31 }
  0x27   :  { %789 = vmatpush3.bf16.msra.mxu1 %v658_v28  ;;  %228 = vmatprep.mubr.f32.mxu0 %v112_v32 }
  0x28   :  { %738 = vmatprep.mubr.msk.f32.mxu1 %vm129_vm0, %v107_v33 }
  0x2a   :  { %229 = vmatmul.mubr.f32.gmra.mrb[4].mxu0 %v111_v36  ;;  %739 = vmatmul.mubr.msk.f32.vlgmr.msra.gmra.mrb[4].mxu1 %vm129_vm0, %v110_v37 }
  0x2b   :  { %233 = vmatprep.mubr.f32.mxu0 %v115_v38  ;;  %741 = vmatprep.mubr.msk.f32.mxu1 %vm129_vm0, %v113_v39  ;;  %v813_v38 = vmov 0  }
  0x2c   :  { %807 = vset.pattern.permute.xlu0 %v813_v38  ;;  %808 = vset.pattern.permute.xlu1 %v813_v38 }
  0x2e   :  { %234 = vmatmul.mubr.f32.gmra.mrb[6].mxu0 %v114_v42  ;;  %742 = vmatmul.mubr.msk.f32.gmra.mrb[6].mxu1 %vm129_vm0, %v116_v43 }
  0x2f   :  { %238 = vmatprep.mubr.f32.mxu0 %v118_v44  ;;  %744 = vmatprep.mubr.msk.f32.mxu1 %vm129_vm0, %v119_v45 }
  0x32   :  { %239 = vmatmul.mubr.f32.gmra.mrb[8].mxu0 %v117_v48  ;;  %745 = vmatmul.mubr.msk.f32.gmra.mrb[8].mxu1 %vm129_vm0, %v122_v49 }
  0x33   :  { %243 = vmatprep.mubr.f32.mxu0 %v121_v50  ;;  %747 = vmatprep.mubr.msk.f32.mxu1 %vm129_vm0, %v125_v51 }
  0x36   :  { %244 = vmatmul.mubr.f32.gmra.mrb[10].mxu0 %v120_v52  ;;  %748 = vmatmul.mubr.msk.f32.gmra.mrb[10].mxu1 %vm129_vm0, %v128_v53 }
  0xf5   :  { %v712_v54 = vpop.f32.mrb[0].mxu1  ;;  %v694_v55 = vpop.f32.mrb[0].mxu0 }
  0xf6   :  { %v713_v56 = vpop.f32.mrb[1].mxu1  ;;  %v695_v57 = vpop.f32.mrb[1].mxu0 }
  0xf7   :  { %v714_v58 = vadd.f32 %v713_v56, %v712_v54  ;;  %v696_v59 = vadd.f32 %v695_v57, %v694_v55 }
  0xf9   :  { %v715_v60 = vpop.f32.mrb[2].mxu1  ;;  %v697_v61 = vpop.f32.mrb[2].mxu0 }
  0xfa   :  { %v716_v62 = vpop.f32.mrb[3].mxu1  ;;  %v698_v63 = vpop.f32.mrb[3].mxu0 }
  0xfb   :  { %v717_v0 = vadd.f32 %v716_v62, %v715_v60  ;;  %v699_v1 = vadd.f32 %v698_v63, %v697_v61 }
  0xfd   :  { %v740_v2 = vpop.f32.mrb[4].mxu1  ;;  %v700_v3 = vpop.f32.mrb[4].mxu0 }
  0xfe   :  { %v937_v4 = vadd.f32 %v740_v2, %v699_v1  ;;  %v325_v5 = vpop.f32.mrb[5].mxu1  ;;  %v701_v6 = vpop.f32.mrb[5].mxu0 }
  0xff   :  { %v939_v7 = vadd.f32 %v696_v59, %v325_v5  ;;  %v702_v8 = vadd.f32 %v701_v6, %v700_v3 }
 0x100   :  { %366 = vadd.xlane.f32.xlu0 %v937_v4  ;;  %v381_v9 = vmul.f32 %v937_v4, %v937_v4 }
 0x101   :  { %v703_v10 = vpop.f32.mrb[6].mxu0  ;;  %v743_v11 = vpop.f32.mrb[6].mxu1  ;;  %v380_v21 = vmul.f32 %v939_v7, %v939_v7 }
 0x102   :  { %v704_v12 = vpop.f32.mrb[7].mxu0  ;;  %390 = vadd.xlane.f32.xlu1 %v381_v9  ;;  %v335_v13 = vpop.f32.mrb[7].mxu1 }
 0x103   :  { %v705_v14 = vadd.f32 %v704_v12, %v703_v10  ;;  %v944_v15 = vadd.f32 %v702_v8, %v335_v13 }
 0x104   :  { %364 = vadd.xlane.f32.xlu0 %v939_v7 }
 0x105   :  { %v947_v16 = vadd.f32 %v743_v11, %v705_v14  ;;  %v706_v17 = vpop.f32.mrb[8].mxu0  ;;  %v746_v18 = vpop.f32.mrb[8].mxu1  ;;  %v382_v29 = vmul.f32 %v944_v15, %v944_v15 }
 0x106   :  { %368 = vadd.xlane.f32.xlu1 %v944_v15  ;;  %v707_v19 = vpop.f32.mrb[9].mxu0  ;;  %v345_v20 = vpop.f32.mrb[9].mxu1 }
 0x107   :  { %v708_v22 = vadd.f32 %v707_v19, %v706_v17  ;;  %v383_v32 = vmul.f32 %v947_v16, %v947_v16  ;;  %v424_v17 = vld [vmem:[%s1011_s2] sm:$0xff]  ;;  %v425_v19 = vld [vmem:[%s1011_s2 + $0x8] sm:$0xff] }
 0x108   :  { %388 = vadd.xlane.f32.xlu0 %v380_v21 }
 0x109   :  { %v952_v23 = vadd.f32 %v708_v22, %v345_v20  ;;  %v709_v24 = vpop.f32.mrb[10].mxu0  ;;  %v749_v25 = vpop.f32.mrb[10].mxu1 }
 0x10a   :  { %v954_v26 = vadd.f32 %v749_v25, %v717_v0  ;;  %v710_v27 = vpop.f32.mrb[11].mxu0  ;;  %v355_v28 = vpop.f32.mrb[11].mxu1  ;;  %370 = vadd.xlane.f32.xlu1 %v947_v16  ;;  %v432_v25 = vld [vmem:[%s1012_s3] sm:$0xff] }
 0x10b   :  { %v711_v30 = vadd.f32 %v710_v27, %v709_v24  ;;  %v959_v31 = vadd.f32 %v714_v58, %v355_v28  ;;  %v384_v34 = vmul.f32 %v952_v23, %v952_v23 }
 0x10c   :  { %392 = vadd.xlane.f32.xlu0 %v382_v29  ;;  %v387_v37 = vmul.f32 %v954_v26, %v954_v26  ;;  %v433_v29 = vld [vmem:[%s1012_s3 + $0x8] sm:$0xff] }
 0x10d   :  { %v963_v33 = vadd.f32 %v746_v18, %v711_v30  ;;  %v386_v36 = vmul.f32 %v959_v31, %v959_v31 }
 0x10e   :  { %394 = vadd.xlane.f32.xlu1 %v383_v32 }
 0x10f   :  { %v385_v35 = vmul.f32 %v963_v33, %v963_v33 }
 0x110   :  { %372 = vadd.xlane.f32.xlu0 %v952_v23 }
 0x112   :  { %378 = vadd.xlane.f32.xlu1 %v954_v26 }
 0x114   :  { %376 = vadd.xlane.f32.xlu0 %v959_v31 }
 0x116   :  { %374 = vadd.xlane.f32.xlu1 %v963_v33 }
 0x118   :  { %396 = vadd.xlane.f32.xlu0 %v384_v34 }
 0x11a   :  { %398 = vadd.xlane.f32.xlu1 %v385_v35 }
 0x11c   :  { %400 = vadd.xlane.f32.xlu0 %v386_v36 }
 0x11e   :  { %402 = vadd.xlane.f32.xlu1 %v387_v37 }
 0x18d   :  { %v367_v39 = vpop.xlane.xlu0 %366 }
 0x18f   :  { %v391_v40 = vpop.xlane.xlu1 %390 }
 0x191   :  { %v365_v41 = vpop.xlane.xlu0 %364 }
 0x193   :  { %v369_v42 = vpop.xlane.xlu1 %368 }
 0x194   :  { %v404_v49 = vadd.f32 %v369_v42, %v365_v41 }
 0x195   :  { %v389_v43 = vpop.xlane.xlu0 %388 }
 0x197   :  { %v371_v44 = vpop.xlane.xlu1 %370 }
 0x198   :  { %v405_v51 = vadd.f32 %v371_v44, %v367_v39 }
 0x199   :  { %v393_v45 = vpop.xlane.xlu0 %392 }
 0x19a   :  { %v406_v57 = vadd.f32 %v393_v45, %v389_v43 }
 0x19b   :  { %v395_v46 = vpop.xlane.xlu1 %394 }
 0x19c   :  { %v407_v60 = vadd.f32 %v395_v46, %v391_v40 }
 0x19d   :  { %v373_v47 = vpop.xlane.xlu0 %372 }
 0x19e   :  { %v408_v52 = vadd.f32 %v404_v49, %v373_v47 }
 0x19f   :  { %v379_v48 = vpop.xlane.xlu1 %378 }
 0x1a1   :  { %v377_v50 = vpop.xlane.xlu0 %376 }
 0x1a2   :  { %v412_v54 = vadd.f32 %v408_v52, %v377_v50 }
 0x1a3   :  { %v375_v53 = vpop.xlane.xlu1 %374 }
 0x1a4   :  { %v409_v55 = vadd.f32 %v405_v51, %v375_v53  ;;  %v416_v61 = vmul.f32 0.001953125, %v412_v54 }
 0x1a5   :  { %v397_v56 = vpop.xlane.xlu0 %396 }
 0x1a6   :  { %v413_v58 = vadd.f32 %v409_v55, %v379_v48  ;;  %v410_v62 = vadd.f32 %v406_v57, %v397_v56  ;;  %v420_v5 = vmul.f32 %v416_v61, %v416_v61 }
 0x1a7   :  { %v399_v59 = vpop.xlane.xlu1 %398 }
 0x1a8   :  { %v417_v0 = vmul.f32 0.001953125, %v413_v58  ;;  %v411_v1 = vadd.f32 %v407_v60, %v399_v59 }
 0x1a9   :  { %v401_v63 = vpop.xlane.xlu0 %400 }
 0x1aa   :  { %v414_v2 = vadd.f32 %v410_v62, %v401_v63  ;;  %v421_v10 = vmul.f32 %v417_v0, %v417_v0 }
 0x1ab   :  { %v403_v3 = vpop.xlane.xlu1 %402 }
 0x1ac   :  { %v418_v6 = vmul.f32 0.001953125, %v414_v2  ;;  %v415_v8 = vadd.f32 %v411_v1, %v403_v3 }
 0x1ae   :  { %v422_v9 = vsub.f32 %v418_v6, %v420_v5  ;;  %v419_v11 = vmul.f32 0.001953125, %v415_v8 }
 0x1b0   :  { %v426_v12 = vadd.f32 1e-05, %v422_v9  ;;  %v423_v13 = vsub.f32 %v419_v11, %v421_v10 }
 0x1b2   :  { %809 = vrsqrt.f32 %v426_v12  ;;  %v427_v14 = vadd.f32 1e-05, %v423_v13 }
 0x1b4   :  { %811 = vrsqrt.f32 %v427_v14 }
 0x1bc   :  { %v810_v18 = vpop.eup %809 }
 0x1bd   :  { %v430_v20 = vmul.f32 %v810_v18, %v424_v17 }
 0x1be   :  { %v812_v21 = vpop.eup %811 }
 0x1bf   :  { %440 = vperm.xlu0 %807, %v430_v20   ;;  %v431_v22 = vmul.f32 %v812_v21, %v425_v19  ;;  %v434_v24 = vmul.f32 %v430_v20, %v416_v61 }
 0x1c1   :  { %445 = vperm.xlu1 %808, %v431_v22   ;;  %v436_v27 = vsub.f32 %v432_v25, %v434_v24  ;;  %v435_v28 = vmul.f32 %v431_v22, %v417_v0 }
 0x1c3   :  { %v437_v30 = vsub.f32 %v433_v29, %v435_v28 }
 0x1c5   :  { %458 = vperm.xlu1 %808, %v436_v27  }
 0x1c9   :  { %463 = vperm.xlu1 %808, %v437_v30  }
 0x23e   :  { %v441_v34 = vpop.permute.xlu0 %440 }
 0x23f   :  { %v448_v35 = vmul.f32 %v441_v34, %v939_v7  ;;  %v450_v36 = vmul.f32 %v441_v34, %v944_v15  ;;  %v452_v37 = vmul.f32 %v441_v34, %v952_v23  ;;  %v454_v38 = vmul.f32 %v441_v34, %v959_v31 }
 0x240   :  { %v446_v32 = vpop.permute.xlu1 %445 }
 0x241   :  { %v449_v44 = vmul.f32 %v446_v32, %v937_v4  ;;  %v451_v45 = vmul.f32 %v446_v32, %v947_v16  ;;  %v453_v46 = vmul.f32 %v446_v32, %v963_v33  ;;  %v455_v47 = vmul.f32 %v446_v32, %v954_v26 }
 0x244   :  { %v459_v39 = vpop.permute.xlu1 %458 }
 0x245   :  { %v466_v40 = vadd.f32 %v459_v39, %v448_v35  ;;  %v468_v41 = vadd.f32 %v459_v39, %v450_v36  ;;  %v470_v42 = vadd.f32 %v459_v39, %v452_v37  ;;  %v472_v43 = vadd.f32 %v459_v39, %v454_v38 }
 0x247   :  { %v474_v50 = vmax.f32 %v466_v40, 0.0  ;;  %v476_v31 = vmax.f32 %v468_v41, 0.0  ;;  %v478_v51 = vmax.f32 %v470_v42, 0.0  ;;  %v480_v52 = vmax.f32 %v472_v43, 0.0 }
 0x248   :  { %v464_v7 = vpop.permute.xlu1 %463 }
 0x249   :  { %v467_v48 = vadd.f32 %v464_v7, %v449_v44  ;;  %v469_v15 = vadd.f32 %v464_v7, %v451_v45  ;;  %v471_v49 = vadd.f32 %v464_v7, %v453_v46  ;;  %v473_v23 = vadd.f32 %v464_v7, %v455_v47 }
 0x24b   :  { %v475_v53 = vmax.f32 %v467_v48, 0.0  ;;  %v477_v54 = vmax.f32 %v469_v15, 0.0  ;;  %v479_v55 = vmax.f32 %v471_v49, 0.0  ;;  %v481_v56 = vmax.f32 %v473_v23, 0.0 }
 0x24d   :  { %v625_v4 = vpack.c.bf16 %v475_v53, %v474_v50  ;;  %v630_v57 = vpack.c.bf16 %v477_v54, %v476_v31  ;;  %v635_v16 = vpack.c.bf16 %v479_v55, %v478_v51  ;;  %v640_v58 = vpack.c.bf16 %v481_v56, %v480_v52 }
 0x24f   :  { %626 = vst [vmem:[%s1013_s4] sm:$0xff] %v625_v4   ;;  %659 = vst [vmem:[%s1013_s4 + $0x8] sm:$0xff] %v630_v57  }
 0x250   :  { %660 = vst [vmem:[%s1013_s4 + $0x10] sm:$0xff] %v635_v16   ;;  %661 = vst [vmem:[%s1013_s4 + $0x18] sm:$0xff] %v640_v58  }

// kernel: generator_forward.8
= control target key start
LH: loop header
LB: loop body
LE: loop exit
PB: predicated region body
PF: predicated region fallthrough
CT: control target
= control target key end

     0   :  { %vm137_vm0 = vcmask 130048   ;;  %s984_s0 = inlined_call_operand.vmem [shape: bf16[144,512], index: 0, kind: input, shape index: {}]   ;;  %s985_s1 = inlined_call_operand.vmem [shape: bf16[32,144], index: 1, kind: input, shape index: {}]   ;;  %s986_s2 = inlined_call_operand.vmem [shape: f32[8,1], index: 2, kind: input, shape index: {}]   ;;  %s987_s3 = inlined_call_operand.vmem [shape: f32[8,1], index: 3, kind: input, shape index: {}]   ;;  %s988_s4 = inlined_call_operand.vmem [shape: bf16[32,512], index: 4, kind: output, shape index: {}]  }
   0x1   :  { %v654_v0 = vld [vmem:[%s984_s0 + $0x4] ss:$16 sps:$4 sm:$0xff]   ;;  %v656_v1 = vld [vmem:[%s984_s0] ss:$16 sps:$4 sm:$0xff]   ;;  %v657_v2 = vld [vmem:[%s984_s0 + $0xc] ss:$16 sps:$4 sm:$0xff]  }
   0x2   :  { %544 = vmatprep.subr.bf16.mxu0 %v654_v0  ;;  %v659_v3 = vld [vmem:[%s984_s0 + $0x8] ss:$16 sps:$4 sm:$0xff]   ;;  %v660_v4 = vld [vmem:[%s984_s0 + $0x24] ss:$16 sps:$4 sm:$0xff]   ;;  %v662_v5 = vld [vmem:[%s984_s0 + $0x20] ss:$16 sps:$4 sm:$0xff]   ;;  %580 = vmatprep.subr.bf16.mxu1 %v657_v2 }
   0x3   :  { %546 = vmatpush1.bf16.msra.mxu0 %v656_v1  ;;  %v663_v6 = vld [vmem:[%s984_s0 + $0x2c] ss:$16 sps:$4 sm:$0xff]   ;;  %582 = vmatpush1.bf16.msra.mxu1 %v659_v3  ;;  %v665_v7 = vld [vmem:[%s984_s0 + $0x28] ss:$16 sps:$4 sm:$0xff]   ;;  %v666_v8 = vld [vmem:[%s984_s0 + $0x44] ss:$16 sps:$4 sm:$0xff]  }
   0x4   :  { %548 = vmatprep.subr.bf16.mxu0 %v660_v4  ;;  %584 = vmatprep.subr.bf16.mxu1 %v663_v6  ;;  %v668_v9 = vld [vmem:[%s984_s0 + $0x40] ss:$16 sps:$4 sm:$0xff]   ;;  %v669_v10 = vld [vmem:[%s984_s0 + $0x4c] ss:$16 sps:$4 sm:$0xff]   ;;  %v672_v11 = vld [vmem:[%s984_s0 + $0x64] ss:$16 sps:$4 sm:$0xff]  }
   0x5   :  { %v671_v12 = vld [vmem:[%s984_s0 + $0x48] ss:$16 sps:$4 sm:$0xff]   ;;  %v675_v13 = vld [vmem:[%s984_s0 + $0x6c] ss:$16 sps:$4 sm:$0xff]   ;;  %v674_v14 = vld [vmem:[%s984_s0 + $0x60] ss:$16 sps:$4 sm:$0xff]  }
   0x6   :  { %v678_v15 = vld [vmem:[%s984_s0 + $0x84] ss:$16 sps:$4 sm:$0xff]   ;;  %v677_v16 = vld [vmem:[%s984_s0 + $0x68] ss:$16 sps:$4 sm:$0xff]   ;;  %v681_v17 = vld [vmem:[%s984_s0 + $0x8c] ss:$16 sps:$4 sm:$0xff]  }
   0x7   :  { %550 = vmatpush1.bf16.msra.mxu0 %v662_v5  ;;  %586 = vmatpush1.bf16.msra.mxu1 %v665_v7  ;;  %v680_v18 = vld [vmem:[%s984_s0 + $0x80] ss:$16 sps:$4 sm:$0xff]   ;;  %v684_v19 = vld [vmem:[%s984_s0 + $0xa4] ss:$16 sps:$4 sm:$0xff]   ;;  %v683_v20 = vld [vmem:[%s984_s0 + $0x88] ss:$16 sps:$4 sm:$0xff]  }
   0x8   :  { %552 = vmatprep.subr.bf16.mxu0 %v666_v8  ;;  %588 = vmatprep.subr.bf16.mxu1 %v669_v10  ;;  %v687_v21 = vld [vmem:[%s984_s0 + $0xac] ss:$16 sps:$4 sm:$0xff]   ;;  %v686_v22 = vld [vmem:[%s984_s0 + $0xa0] ss:$16 sps:$4 sm:$0xff]   ;;  %v690_v23 = vld [vmem:[%s984_s0 + $0xc4] ss:$16 sps:$4 sm:$0xff]  }
   0x9   :  { %v689_v24 = vld [vmem:[%s984_s0 + $0xa8] ss:$16 sps:$4 sm:$0xff]   ;;  %v693_v25 = vld [vmem:[%s984_s0 + $0xcc] ss:$16 sps:$4 sm:$0xff]   ;;  %v692_v26 = vld [vmem:[%s984_s0 + $0xc0] ss:$16 sps:$4 sm:$0xff]  }
   0xa   :  { %v125_v27 = vld [vmem:[%s985_s1] sm:$0xff]  ;;  %v695_v30 = vld [vmem:[%s984_s0 + $0xc8] ss:$16 sps:$4 sm:$0xff]   ;;  %v699_v31 = vld [vmem:[%s984_s0 + $0xec] ss:$16 sps:$4 sm:$0xff]  }
   0xb   :  { %554 = vmatpush1.bf16.msra.mxu0 %v668_v9  ;;  %590 = vmatpush1.bf16.msra.mxu1 %v671_v12  ;;  %v696_v28 = vld [vmem:[%s984_s0 + $0xe4] ss:$16 sps:$4 sm:$0xff]   ;;  %v130_v29 = vunpack.c.h.bf16 %v125_v27  ;;  %v698_v32 = vld [vmem:[%s984_s0 + $0xe0] ss:$16 sps:$4 sm:$0xff]   ;;  %v701_v34 = vld [vmem:[%s984_s0 + $0xe8] ss:$16 sps:$4 sm:$0xff]   ;;  %v129_v39 = vunpack.c.l.bf16 %v125_v27 }
   0xc   :  { %556 = vmatprep.subr.bf16.mxu0 %v672_v11  ;;  %592 = vmatprep.subr.bf16.mxu1 %v675_v13  ;;  %v702_v33 = vld [vmem:[%s984_s0 + $0x104] ss:$16 sps:$4 sm:$0xff]   ;;  %v705_v35 = vld [vmem:[%s984_s0 + $0x10c] ss:$16 sps:$4 sm:$0xff]   ;;  %v704_v36 = vld [vmem:[%s984_s0 + $0x100] ss:$16 sps:$4 sm:$0xff]  }
   0xd   :  { %519 = vmatprep.mubr.msk.f32.mxu0 %vm137_vm0, %v130_v29  ;;  %523 = vmatprep.mubr.msk.f32.mxu1 %vm137_vm0, %v130_v29  ;;  %v126_v37 = vld [vmem:[%s985_s1 + $0x8] sm:$0xff]  ;;  %v127_v41 = vld [vmem:[%s985_s1 + $0x10] sm:$0xff]  ;;  %v128_v44 = vld [vmem:[%s985_s1 + $0x18] sm:$0xff] }
   0xe   :  { %v707_v38 = vld [vmem:[%s984_s0 + $0x108] ss:$16 sps:$4 sm:$0xff]   ;;  %v132_v40 = vunpack.c.h.bf16 %v126_v37  ;;  %v131_v42 = vunpack.c.l.bf16 %v126_v37  ;;  %v134_v43 = vunpack.c.h.bf16 %v127_v41  ;;  %v133_v45 = vunpack.c.l.bf16 %v127_v41 }
   0xf   :  { %558 = vmatpush1.bf16.msra.mxu0 %v674_v14  ;;  %594 = vmatpush1.bf16.msra.mxu1 %v677_v16  ;;  %v136_v46 = vunpack.c.h.bf16 %v128_v44  ;;  %v135_v47 = vunpack.c.l.bf16 %v128_v44 }
  0x10   :  { %560 = vmatprep.subr.bf16.mxu0 %v678_v15  ;;  %596 = vmatprep.subr.bf16.mxu1 %v681_v17 }
  0x13   :  { %562 = vmatpush1.bf16.msra.mxu0 %v680_v18  ;;  %598 = vmatpush1.bf16.msra.mxu1 %v683_v20 }
  0x14   :  { %564 = vmatprep.subr.bf16.mxu0 %v684_v19  ;;  %600 = vmatprep.subr.bf16.mxu1 %v687_v21 }
  0x17   :  { %566 = vmatpush1.bf16.msra.mxu0 %v686_v22  ;;  %602 = vmatpush1.bf16.msra.mxu1 %v689_v24 }
  0x18   :  { %568 = vmatprep.subr.bf16.mxu0 %v690_v23  ;;  %604 = vmatprep.subr.bf16.mxu1 %v693_v25 }
  0x1b   :  { %570 = vmatpush1.bf16.msra.mxu0 %v692_v26  ;;  %606 = vmatpush1.bf16.msra.mxu1 %v695_v30 }
  0x1c   :  { %572 = vmatprep.subr.bf16.mxu0 %v696_v28  ;;  %608 = vmatprep.subr.bf16.mxu1 %v699_v31 }
  0x1f   :  { %574 = vmatpush1.bf16.msra.mxu0 %v698_v32  ;;  %610 = vmatpush1.bf16.msra.mxu1 %v701_v34 }
  0x20   :  { %576 = vmatprep.subr.bf16.mxu0 %v702_v33  ;;  %612 = vmatprep.subr.bf16.mxu1 %v705_v35 }
  0x23   :  { %578 = vmatpush1.bf16.msra.mxu0 %v704_v36  ;;  %614 = vmatpush1.bf16.msra.mxu1 %v707_v38 }
  0x26   :  { %215 = vmatmul.mubr.f32.vlgmr.msra.gmra.mrb[0].mxu0 %v129_v39  ;;  %304 = vmatmul.mubr.f32.vlgmr.msra.gmra.mrb[0].mxu1 %v129_v39 }
  0x27   :  { %520 = vmatprep.mubr.msk.f32.mxu0 %vm137_vm0, %v132_v40  ;;  %524 = vmatprep.mubr.msk.f32.mxu1 %vm137_vm0, %v132_v40  ;;  %v710_v40 = vmov 0  }
  0x28   :  { %652 = vset.pattern.permute.xlu0 %v710_v40  ;;  %653 = vset.pattern.permute.xlu1 %v710_v40 }
  0x2a   :  { %221 = vmatmul.mubr.f32.gmra.mrb[2].mxu0 %v131_v42  ;;  %310 = vmatmul.mubr.f32.gmra.mrb[2].mxu1 %v131_v42 }
  0x2b   :  { %521 = vmatprep.mubr.msk.f32.mxu0 %vm137_vm0, %v134_v43  ;;  %525 = vmatprep.mubr.msk.f32.mxu1 %vm137_vm0, %v134_v43 }
  0x2e   :  { %227 = vmatmul.mubr.f32.gmra.mrb[4].mxu0 %v133_v45  ;;  %316 = vmatmul.mubr.f32.gmra.mrb[4].mxu1 %v133_v45 }
  0x2f   :  { %522 = vmatprep.mubr.msk.f32.mxu0 %vm137_vm0, %v136_v46  ;;  %526 = vmatprep.mubr.msk.f32.mxu1 %vm137_vm0, %v136_v46 }
  0x32   :  { %233 = vmatmul.mubr.f32.gmra.mrb[6].mxu0 %v135_v47  ;;  %322 = vmatmul.mubr.f32.gmra.mrb[6].mxu1 %v135_v47 }
  0xf9   :  { %v864_v48 = vpop.f32.mrb[0].mxu0  ;;  %v874_v53 = vpop.f32.mrb[0].mxu1 }
  0xfa   :  { %v348_v49 = vmul.f32 %v864_v48, %v864_v48  ;;  %v868_v50 = vpop.f32.mrb[1].mxu0  ;;  %v350_v54 = vmul.f32 %v874_v53, %v874_v53  ;;  %v878_v55 = vpop.f32.mrb[1].mxu1 }
  0xfb   :  { %v328_v51 = vadd.f32 %v868_v50, %v864_v48  ;;  %v349_v52 = vmul.f32 %v868_v50, %v868_v50  ;;  %v351_v61 = vmul.f32 %v878_v55, %v878_v55 }
  0xfd   :  { %v880_v56 = vpop.f32.mrb[2].mxu0  ;;  %v329_v57 = vadd.f32 %v328_v51, %v874_v53  ;;  %v364_v58 = vadd.f32 %v349_v52, %v348_v49  ;;  %v893_v0 = vpop.f32.mrb[2].mxu1 }
  0xfe   :  { %v352_v59 = vmul.f32 %v880_v56, %v880_v56  ;;  %v885_v60 = vpop.f32.mrb[3].mxu0  ;;  %v354_v3 = vmul.f32 %v893_v0, %v893_v0  ;;  %v898_v4 = vpop.f32.mrb[3].mxu1 }
  0xff   :  { %v333_v62 = vadd.f32 %v885_v60, %v880_v56  ;;  %v353_v63 = vmul.f32 %v885_v60, %v885_v60  ;;  %v330_v1 = vadd.f32 %v329_v57, %v878_v55  ;;  %v365_v2 = vadd.f32 %v364_v58, %v350_v54 }
 0x100   :  { %v355_v11 = vmul.f32 %v898_v4, %v898_v4 }
 0x101   :  { %331 = vadd.xlane.f32.xlu0 %v330_v1  ;;  %v900_v5 = vpop.f32.mrb[4].mxu0  ;;  %v366_v6 = vadd.f32 %v365_v2, %v351_v61  ;;  %v334_v7 = vadd.f32 %v333_v62, %v893_v0  ;;  %v369_v8 = vadd.f32 %v353_v63, %v352_v59  ;;  %v913_v14 = vpop.f32.mrb[4].mxu1 }
 0x102   :  { %v356_v9 = vmul.f32 %v900_v5, %v900_v5  ;;  %v905_v10 = vpop.f32.mrb[5].mxu0  ;;  %v358_v17 = vmul.f32 %v913_v14, %v913_v14  ;;  %v918_v18 = vpop.f32.mrb[5].mxu1 }
 0x103   :  { %v338_v12 = vadd.f32 %v905_v10, %v900_v5  ;;  %v357_v13 = vmul.f32 %v905_v10, %v905_v10  ;;  %367 = vadd.xlane.f32.xlu1 %v366_v6  ;;  %v335_v15 = vadd.f32 %v334_v7, %v898_v4  ;;  %v370_v16 = vadd.f32 %v369_v8, %v354_v3  ;;  %v394_v3 = vld [vmem:[%s986_s2] sm:$0xff] }
 0x104   :  { %v359_v25 = vmul.f32 %v918_v18, %v918_v18  ;;  %v398_v8 = vld [vmem:[%s987_s3] sm:$0xff] }
 0x105   :  { %336 = vadd.xlane.f32.xlu0 %v335_v15  ;;  %v920_v19 = vpop.f32.mrb[6].mxu0  ;;  %v371_v20 = vadd.f32 %v370_v16, %v355_v11  ;;  %v339_v21 = vadd.f32 %v338_v12, %v913_v14  ;;  %v374_v22 = vadd.f32 %v357_v13, %v356_v9  ;;  %v933_v28 = vpop.f32.mrb[6].mxu1 }
 0x106   :  { %v360_v23 = vmul.f32 %v920_v19, %v920_v19  ;;  %v925_v24 = vpop.f32.mrb[7].mxu0  ;;  %v362_v31 = vmul.f32 %v933_v28, %v933_v28  ;;  %v325_v32 = vpop.f32.mrb[7].mxu1 }
 0x107   :  { %v343_v26 = vadd.f32 %v925_v24, %v920_v19  ;;  %v361_v27 = vmul.f32 %v925_v24, %v925_v24  ;;  %v340_v29 = vadd.f32 %v339_v21, %v918_v18  ;;  %v375_v30 = vadd.f32 %v374_v22, %v358_v17 }
 0x108   :  { %v363_v36 = vmul.f32 %v325_v32, %v325_v32 }
 0x109   :  { %v379_v33 = vadd.f32 %v361_v27, %v360_v23  ;;  %372 = vadd.xlane.f32.xlu0 %v371_v20  ;;  %341 = vadd.xlane.f32.xlu1 %v340_v29  ;;  %v376_v34 = vadd.f32 %v375_v30, %v359_v25  ;;  %v344_v35 = vadd.f32 %v343_v26, %v933_v28 }
 0x10b   :  { %v380_v37 = vadd.f32 %v379_v33, %v362_v31  ;;  %v345_v38 = vadd.f32 %v344_v35, %v325_v32 }
 0x10d   :  { %377 = vadd.xlane.f32.xlu0 %v376_v34  ;;  %v381_v39 = vadd.f32 %v380_v37, %v363_v36  ;;  %346 = vadd.xlane.f32.xlu1 %v345_v38 }
 0x111   :  { %382 = vadd.xlane.f32.xlu1 %v381_v39 }
 0x18e   :  { %v332_v41 = vpop.xlane.xlu0 %331 }
 0x190   :  { %v368_v42 = vpop.xlane.xlu1 %367 }
 0x192   :  { %v337_v43 = vpop.xlane.xlu0 %336 }
 0x193   :  { %v384_v46 = vadd.f32 %v337_v43, %v332_v41 }
 0x196   :  { %v373_v44 = vpop.xlane.xlu0 %372  ;;  %v342_v45 = vpop.xlane.xlu1 %341 }
 0x197   :  { %v386_v47 = vadd.f32 %v384_v46, %v342_v45  ;;  %v385_v52 = vadd.f32 %v373_v44, %v368_v42 }
 0x19a   :  { %v378_v49 = vpop.xlane.xlu0 %377  ;;  %v347_v51 = vpop.xlane.xlu1 %346 }
 0x19b   :  { %v388_v54 = vadd.f32 %v386_v47, %v347_v51  ;;  %v387_v57 = vadd.f32 %v385_v52, %v378_v49 }
 0x19d   :  { %v390_v58 = vmul.f32 0.00048828125, %v388_v54 }
 0x19e   :  { %v383_v59 = vpop.xlane.xlu1 %382 }
 0x19f   :  { %v389_v61 = vadd.f32 %v387_v57, %v383_v59  ;;  %v392_v62 = vmul.f32 %v390_v58, %v390_v58 }
 0x1a1   :  { %v391_v63 = vmul.f32 0.00048828125, %v389_v61 }
 0x1a3   :  { %v393_v1 = vsub.f32 %v391_v63, %v392_v62 }
 0x1a5   :  { %v395_v2 = vadd.f32 1e-05, %v393_v1 }
 0x1a7   :  { %708 = vrsqrt.f32 %v395_v2 }
 0x1b1   :  { %v709_v6 = vpop.eup %708 }
 0x1b2   :  { %v397_v7 = vmul.f32 %v709_v6, %v394_v3 }
 0x1b4   :  { %403 = vperm.xlu0 %652, %v397_v7   ;;  %v399_v9 = vmul.f32 %v397_v7, %v390_v58 }
 0x1b6   :  { %v400_v11 = vsub.f32 %v398_v8, %v399_v9 }
 0x1b8   :  { %424 = vperm.xlu1 %653, %v400_v11  }
 0x233   :  { %v404_v12 = vpop.permute.xlu0 %403 }
 0x234   :  { %v406_v13 = vmul.f32 %v404_v12, %v864_v48  ;;  %v407_v15 = vmul.f32 %v404_v12, %v868_v50  ;;  %v408_v16 = vmul.f32 %v404_v12, %v874_v53  ;;  %v409_v17 = vmul.f32 %v404_v12, %v878_v55 }
 0x235   :  { %v410_v20 = vmul.f32 %v404_v12, %v880_v56  ;;  %v411_v21 = vmul.f32 %v404_v12, %v885_v60  ;;  %v412_v22 = vmul.f32 %v404_v12, %v893_v0  ;;  %v413_v23 = vmul.f32 %v404_v12, %v898_v4 }
 0x236   :  { %v414_v25 = vmul.f32 %v404_v12, %v900_v5  ;;  %v415_v26 = vmul.f32 %v404_v12, %v905_v10  ;;  %v416_v48 = vmul.f32 %v404_v12, %v913_v14  ;;  %v417_v50 = vmul.f32 %v404_v12, %v918_v18 }
 0x237   :  { %v418_v53 = vmul.f32 %v404_v12, %v920_v19  ;;  %v419_v55 = vmul.f32 %v404_v12, %v925_v24  ;;  %v420_v56 = vmul.f32 %v404_v12, %v933_v28  ;;  %v421_v27 = vmul.f32 %v404_v12, %v325_v32  ;;  %v425_v60 = vpop.permute.xlu1 %424 }
 0x238   :  { %v427_v29 = vadd.f32 %v425_v60, %v406_v13  ;;  %v428_v0 = vadd.f32 %v425_v60, %v407_v15  ;;  %v429_v30 = vadd.f32 %v425_v60, %v408_v16  ;;  %v430_v4 = vadd.f32 %v425_v60, %v409_v17 }
 0x239   :  { %v431_v31 = vadd.f32 %v425_v60, %v410_v20  ;;  %v432_v5 = vadd.f32 %v425_v60, %v411_v21  ;;  %v433_v33 = vadd.f32 %v425_v60, %v412_v22  ;;  %v434_v10 = vadd.f32 %v425_v60, %v413_v23 }
 0x23a   :  { %v435_v34 = vadd.f32 %v425_v60, %v414_v25  ;;  %v436_v14 = vadd.f32 %v425_v60, %v415_v26  ;;  %v437_v35 = vadd.f32 %v425_v60, %v416_v48  ;;  %v438_v18 = vadd.f32 %v425_v60, %v417_v50 }
 0x23b   :  { %v439_v36 = vadd.f32 %v425_v60, %v418_v53  ;;  %v440_v19 = vadd.f32 %v425_v60, %v419_v55  ;;  %v441_v37 = vadd.f32 %v425_v60, %v420_v56  ;;  %v442_v24 = vadd.f32 %v425_v60, %v421_v27 }
 0x23c   :  { %v443_v38 = vmax.f32 %v427_v29, 0.0  ;;  %v444_v28 = vmax.f32 %v428_v0, 0.0  ;;  %v445_v32 = vmax.f32 %v429_v30, 0.0  ;;  %v446_v39 = vmax.f32 %v430_v4, 0.0 }
 0x23d   :  { %v447_v40 = vmax.f32 %v431_v31, 0.0  ;;  %v448_v41 = vmax.f32 %v432_v5, 0.0  ;;  %v449_v42 = vmax.f32 %v433_v33, 0.0  ;;  %v450_v43 = vmax.f32 %v434_v10, 0.0 }
 0x23e   :  { %v451_v44 = vmax.f32 %v435_v34, 0.0  ;;  %v452_v45 = vmax.f32 %v436_v14, 0.0  ;;  %v453_v46 = vmax.f32 %v437_v35, 0.0  ;;  %v454_v47 = vmax.f32 %v438_v18, 0.0 }
 0x23f   :  { %v455_v49 = vmax.f32 %v439_v36, 0.0  ;;  %v456_v51 = vmax.f32 %v440_v19, 0.0  ;;  %v457_v52 = vmax.f32 %v441_v37, 0.0  ;;  %v458_v54 = vmax.f32 %v442_v24, 0.0 }
 0x240   :  { %v535_v57 = vpack.c.bf16 %v444_v28, %v443_v38  ;;  %v536_v58 = vpack.c.bf16 %v446_v39, %v445_v32  ;;  %v537_v59 = vpack.c.bf16 %v448_v41, %v447_v40  ;;  %v538_v61 = vpack.c.bf16 %v450_v43, %v449_v42 }
 0x241   :  { %v539_v62 = vpack.c.bf16 %v452_v45, %v451_v44  ;;  %v540_v63 = vpack.c.bf16 %v454_v47, %v453_v46  ;;  %v541_v1 = vpack.c.bf16 %v456_v51, %v455_v49  ;;  %v542_v2 = vpack.c.bf16 %v458_v54, %v457_v52 }
 0x242   :  { %507 = vst [vmem:[%s988_s4] sm:$0xff] %v535_v57  ;;  %508 = vst [vmem:[%s988_s4 + $0x8] sm:$0xff] %v536_v58 }
 0x243   :  { %509 = vst [vmem:[%s988_s4 + $0x10] sm:$0xff] %v537_v59  ;;  %510 = vst [vmem:[%s988_s4 + $0x18] sm:$0xff] %v538_v61 }
 0x244   :  { %511 = vst [vmem:[%s988_s4 + $0x20] sm:$0xff] %v539_v62  ;;  %512 = vst [vmem:[%s988_s4 + $0x28] sm:$0xff] %v540_v63 }
 0x245   :  { %513 = vst [vmem:[%s988_s4 + $0x30] sm:$0xff] %v541_v1  ;;  %514 = vst [vmem:[%s988_s4 + $0x38] sm:$0xff] %v542_v2 }

// kernel: generator_forward.9
= control target key start
LH: loop header
LB: loop body
LE: loop exit
PB: predicated region body
PF: predicated region fallthrough
CT: control target
= control target key end

     0   :  { %v1449_v3 = vmov 0.0   ;;  %vm235_vm0 = vcmask 588800   ;;  %s1986_s0 = inlined_call_operand.vmem [shape: bf16[72,2048], index: 0, kind: input, shape index: {}]   ;;  %s1987_s1 = inlined_call_operand.vmem [shape: bf16[27,72], index: 1, kind: input, shape index: {}]   ;;  %s1988_s2 = inlined_call_operand.vmem [shape: f32[27,2048], index: 2, kind: output, shape index: {}]  }
   0x1   :  { %v11_v0 = vld [vmem:[%s1986_s0] sm:$0xff]  ;;  %v12_v2 = vld [vmem:[%s1986_s0 + $0x8] sm:$0xff]  ;;  %312 = vmatprep.mubr.f32.mxu0 %v1449_v3  ;;  %401 = vmatprep.mubr.f32.mxu1 %v1449_v3  ;;  %v13_v38 = vld [vmem:[%s1986_s0 + $0x10] sm:$0xff] }
   0x2   :  { %v19_v1 = vld [vmem:[%s1986_s0 + $0x40] sm:$0xff]  ;;  %v20_v5 = vld [vmem:[%s1986_s0 + $0x48] sm:$0xff]  ;;  %v21_v39 = vld [vmem:[%s1986_s0 + $0x50] sm:$0xff] }
   0x3   :  { %v1256_v4 = vcombine.high %v11_v0, %v19_v1  ;;  %v1257_v6 = vcombine.low %v11_v0, %v19_v1  ;;  %v27_v7 = vld [vmem:[%s1986_s0 + $0x80] sm:$0xff]  ;;  %v1264_v9 = vcombine.high %v12_v2, %v20_v5  ;;  %v1265_v10 = vcombine.low %v12_v2, %v20_v5  ;;  %v28_v12 = vld [vmem:[%s1986_s0 + $0x88] sm:$0xff]  ;;  %v14_v41 = vld [vmem:[%s1986_s0 + $0x18] sm:$0xff] }
   0x4   :  { %v35_v8 = vld [vmem:[%s1986_s0 + $0xc0] sm:$0xff]  ;;  %v36_v13 = vld [vmem:[%s1986_s0 + $0xc8] sm:$0xff]  ;;  %v22_v42 = vld [vmem:[%s1986_s0 + $0x58] sm:$0xff]  ;;  %v1272_v47 = vcombine.high %v13_v38, %v21_v39  ;;  %v1273_v50 = vcombine.low %v13_v38, %v21_v39 }
   0x5   :  { %v1258_v11 = vcombine.high %v27_v7, %v35_v8  ;;  %v43_v14 = vld [vmem:[%s1986_s0 + $0x100] sm:$0xff]  ;;  %1129 = vmatprep.subr.bf16.mxu0 %v1256_v4  ;;  %v1266_v15 = vcombine.high %v28_v12, %v36_v13  ;;  %v44_v17 = vld [vmem:[%s1986_s0 + $0x108] sm:$0xff]  ;;  %1145 = vmatprep.subr.bf16.mxu1 %v1264_v9  ;;  %v1259_v19 = vcombine.low %v27_v7, %v35_v8  ;;  %v29_v45 = vld [vmem:[%s1986_s0 + $0x90] sm:$0xff] }
   0x6   :  { %v51_v16 = vld [vmem:[%s1986_s0 + $0x140] sm:$0xff]  ;;  %v52_v18 = vld [vmem:[%s1986_s0 + $0x148] sm:$0xff]  ;;  %1131 = vmatpush1.bf16.msra.mxu0 %v1257_v6  ;;  %1147 = vmatpush1.bf16.msra.mxu1 %v1265_v10  ;;  %v1267_v20 = vcombine.low %v28_v12, %v36_v13  ;;  %v37_v46 = vld [vmem:[%s1986_s0 + $0xd0] sm:$0xff]  ;;  %v1280_v51 = vcombine.high %v14_v41, %v22_v42  ;;  %v1281_v52 = vcombine.low %v14_v41, %v22_v42 }
   0x7   :  { %1133 = vmatprep.subr.bf16.mxu0 %v1258_v11  ;;  %v1260_v21 = vcombine.high %v43_v14, %v51_v16  ;;  %1149 = vmatprep.subr.bf16.mxu1 %v1266_v15  ;;  %v1268_v22 = vcombine.high %v44_v17, %v52_v18  ;;  %v59_v23 = vld [vmem:[%s1986_s0 + $0x180] sm:$0xff]  ;;  %v60_v25 = vld [vmem:[%s1986_s0 + $0x188] sm:$0xff]  ;;  %v1261_v27 = vcombine.low %v43_v14, %v51_v16  ;;  %v30_v48 = vld [vmem:[%s1986_s0 + $0x98] sm:$0xff] }
   0x8   :  { %v67_v24 = vld [vmem:[%s1986_s0 + $0x1c0] sm:$0xff]  ;;  %v68_v26 = vld [vmem:[%s1986_s0 + $0x1c8] sm:$0xff]  ;;  %v1269_v28 = vcombine.low %v44_v17, %v52_v18  ;;  %v38_v49 = vld [vmem:[%s1986_s0 + $0xd8] sm:$0xff]  ;;  %v1274_v53 = vcombine.high %v29_v45, %v37_v46  ;;  %v1275_v60 = vcombine.low %v29_v45, %v37_v46 }
   0x9   :  { %v1262_v29 = vcombine.high %v59_v23, %v67_v24  ;;  %v1270_v30 = vcombine.high %v60_v25, %v68_v26  ;;  %v75_v31 = vld [vmem:[%s1986_s0 + $0x200] sm:$0xff]  ;;  %v76_v32 = vld [vmem:[%s1986_s0 + $0x208] sm:$0xff]  ;;  %v1263_v33 = vcombine.low %v59_v23, %v67_v24  ;;  %v1271_v34 = vcombine.low %v60_v25, %v68_v26  ;;  %v45_v55 = vld [vmem:[%s1986_s0 + $0x110] sm:$0xff] }
   0xa   :  { %1135 = vmatpush1.bf16.msra.mxu0 %v1259_v19  ;;  %1151 = vmatpush1.bf16.msra.mxu1 %v1267_v20  ;;  %v212_v35 = vunpack.c.h.bf16 %v75_v31  ;;  %v214_v36 = vunpack.c.h.bf16 %v76_v32  ;;  %v1125_v37 = vld [vmem:[%s1987_s1] sm:$0xff]   ;;  %v211_v40 = vunpack.c.l.bf16 %v75_v31  ;;  %v213_v43 = vunpack.c.l.bf16 %v76_v32  ;;  %v53_v56 = vld [vmem:[%s1986_s0 + $0x150] sm:$0xff]  ;;  %v46_v58 = vld [vmem:[%s1986_s0 + $0x118] sm:$0xff] }
   0xb   :  { %1137 = vmatprep.subr.bf16.mxu0 %v1260_v21  ;;  %1153 = vmatprep.subr.bf16.mxu1 %v1268_v22  ;;  %v1536_v44 = vunpack.c.l.bf16 %v1125_v37  ;;  %v1282_v54 = vcombine.high %v30_v48, %v38_v49  ;;  %v1560_v57 = vunpack.c.h.bf16 %v1125_v37  ;;  %v54_v59 = vld [vmem:[%s1986_s0 + $0x158] sm:$0xff]  ;;  %v229_v61 = vld [vmem:[%s1987_s1 + $0x8] sm:$0xf]  ;;  %v1283_v62 = vcombine.low %v30_v48, %v38_v49  ;;  %v61_v1 = vld [vmem:[%s1986_s0 + $0x190] sm:$0xff] }
   0xc   :  { %v1276_v63 = vcombine.high %v45_v55, %v53_v56  ;;  %v1284_v0 = vcombine.high %v46_v58, %v54_v59  ;;  %v69_v2 = vld [vmem:[%s1986_s0 + $0x1d0] sm:$0xff]  ;;  %v1581_v4 = vunpack.c.l.bf16 %v229_v61  ;;  %v62_v5 = vld [vmem:[%s1986_s0 + $0x198] sm:$0xff]  ;;  %v1277_v7 = vcombine.low %v45_v55, %v53_v56  ;;  %v230_v8 = vld [vmem:[%s1987_s1 + $0xc] sm:$0x3] }
   0xd   :  { %v70_v6 = vld [vmem:[%s1986_s0 + $0x1d8] sm:$0xff]  ;;  %v1285_v9 = vcombine.low %v46_v58, %v54_v59  ;;  %v1278_v10 = vcombine.high %v61_v1, %v69_v2  ;;  %v77_v12 = vld [vmem:[%s1986_s0 + $0x210] sm:$0xff]  ;;  %v1601_v13 = vunpack.c.l.bf16 %v230_v8  ;;  %v1279_v15 = vcombine.low %v61_v1, %v69_v2  ;;  %v15_v19 = vld [vmem:[%s1986_s0 + $0x20] sm:$0xff] }
   0xe   :  { %1139 = vmatpush1.bf16.msra.mxu0 %v1261_v27  ;;  %1155 = vmatpush1.bf16.msra.mxu1 %v1269_v28  ;;  %v1286_v11 = vcombine.high %v62_v5, %v70_v6  ;;  %v78_v14 = vld [vmem:[%s1986_s0 + $0x218] sm:$0xff]  ;;  %v1287_v16 = vcombine.low %v62_v5, %v70_v6  ;;  %v216_v17 = vunpack.c.h.bf16 %v77_v12  ;;  %v23_v20 = vld [vmem:[%s1986_s0 + $0x60] sm:$0xff]  ;;  %v215_v21 = vunpack.c.l.bf16 %v77_v12  ;;  %v16_v22 = vld [vmem:[%s1986_s0 + $0x28] sm:$0xff] }
   0xf   :  { %1141 = vmatprep.subr.bf16.mxu0 %v1262_v29  ;;  %1157 = vmatprep.subr.bf16.mxu1 %v1270_v30  ;;  %v218_v18 = vunpack.c.h.bf16 %v78_v14  ;;  %v24_v23 = vld [vmem:[%s1986_s0 + $0x68] sm:$0xff]  ;;  %v217_v24 = vunpack.c.l.bf16 %v78_v14  ;;  %v31_v25 = vld [vmem:[%s1986_s0 + $0xa0] sm:$0xff]  ;;  %v1288_v27 = vcombine.high %v15_v19, %v23_v20  ;;  %v1289_v30 = vcombine.low %v15_v19, %v23_v20  ;;  %v17_v59 = vld [vmem:[%s1986_s0 + $0x30] sm:$0xff] }
  0x10   :  { %v39_v26 = vld [vmem:[%s1986_s0 + $0xe0] sm:$0xff]  ;;  %v32_v28 = vld [vmem:[%s1986_s0 + $0xa8] sm:$0xff]  ;;  %v1296_v31 = vcombine.high %v16_v22, %v24_v23  ;;  %v1297_v32 = vcombine.low %v16_v22, %v24_v23  ;;  %v33_v1 = vld [vmem:[%s1986_s0 + $0xb0] sm:$0xff] }
  0x11   :  { %v40_v29 = vld [vmem:[%s1986_s0 + $0xe8] sm:$0xff]  ;;  %v1291_v39 = vcombine.low %v31_v25, %v39_v26  ;;  %v71_v45 = vld [vmem:[%s1986_s0 + $0x1e0] sm:$0xff]  ;;  %v41_v2 = vld [vmem:[%s1986_s0 + $0xf0] sm:$0xff] }
  0x12   :  { %1143 = vmatpush1.bf16.msra.mxu0 %v1263_v33  ;;  %1159 = vmatpush1.bf16.msra.mxu1 %v1271_v34  ;;  %v1290_v33 = vcombine.high %v31_v25, %v39_v26  ;;  %v1298_v34 = vcombine.high %v32_v28, %v40_v29  ;;  %v48_v37 = vld [vmem:[%s1986_s0 + $0x128] sm:$0xff]  ;;  %v34_v6 = vld [vmem:[%s1986_s0 + $0xb8] sm:$0xff]  ;;  %v49_v14 = vld [vmem:[%s1986_s0 + $0x130] sm:$0xff] }
  0x13   :  { %264 = vmatprep.subr.mxu0 %v212_v35  ;;  %353 = vmatprep.subr.mxu1 %v214_v36  ;;  %v47_v35 = vld [vmem:[%s1986_s0 + $0x120] sm:$0xff]  ;;  %v56_v38 = vld [vmem:[%s1986_s0 + $0x168] sm:$0xff]  ;;  %v65_v22 = vld [vmem:[%s1986_s0 + $0x1b0] sm:$0xff] }
  0x14   :  { %v55_v36 = vld [vmem:[%s1986_s0 + $0x160] sm:$0xff]  ;;  %v1300_v42 = vcombine.high %v48_v37, %v56_v38  ;;  %v64_v46 = vld [vmem:[%s1986_s0 + $0x1a8] sm:$0xff]  ;;  %v1301_v49 = vcombine.low %v48_v37, %v56_v38  ;;  %v73_v23 = vld [vmem:[%s1986_s0 + $0x1f0] sm:$0xff] }
  0x15   :  { %v1292_v41 = vcombine.high %v47_v35, %v55_v36  ;;  %v1293_v48 = vcombine.low %v47_v35, %v55_v36  ;;  %v74_v25 = vld [vmem:[%s1986_s0 + $0x1f8] sm:$0xff] }
  0x16   :  { %265 = vmatpush1.msra.mxu0 %v211_v40  ;;  %354 = vmatpush1.msra.mxu1 %v213_v43  ;;  %v1299_v40 = vcombine.low %v32_v28, %v40_v29  ;;  %v63_v43 = vld [vmem:[%s1986_s0 + $0x1a0] sm:$0xff]  ;;  %v1310_v28 = vcombine.high %v65_v22, %v73_v23 }
  0x17   :  { %1092 = vmatmul.mubr.msk.f32.vlgmr.msra.gmra.mrb[0].mxu0 %vm235_vm0, %v1536_v44  ;;  %1096 = vmatmul.mubr.msk.f32.vlgmr.msra.gmra.mrb[0].mxu1 %vm235_vm0, %v1536_v44 }
  0x18   :  { %1161 = vmatprep.subr.bf16.mxu0 %v1272_v47  ;;  %1177 = vmatprep.subr.bf16.mxu1 %v1280_v51  ;;  %v72_v47 = vld [vmem:[%s1986_s0 + $0x1e8] sm:$0xff] }
  0x19   :  { %1163 = vmatpush1.bf16.msra.mxu0 %v1273_v50  ;;  %1179 = vmatpush1.bf16.msra.mxu1 %v1281_v52  ;;  %v1294_v50 = vcombine.high %v63_v43, %v71_v45  ;;  %v1302_v51 = vcombine.high %v64_v46, %v72_v47  ;;  %v79_v52 = vld [vmem:[%s1986_s0 + $0x220] sm:$0xff]  ;;  %v1303_v55 = vcombine.low %v64_v46, %v72_v47 }
  0x1a   :  { %1165 = vmatprep.subr.bf16.mxu0 %v1274_v53  ;;  %1181 = vmatprep.subr.bf16.mxu1 %v1282_v54  ;;  %v80_v53 = vld [vmem:[%s1986_s0 + $0x228] sm:$0xff]  ;;  %v1295_v54 = vcombine.low %v63_v43, %v71_v45  ;;  %v220_v56 = vunpack.c.h.bf16 %v79_v52  ;;  %v219_v61 = vunpack.c.l.bf16 %v79_v52 }
  0x1b   :  { %318 = vmatprep.mubr.f32.mxu0 %v1449_v3  ;;  %407 = vmatprep.mubr.f32.mxu1 %v1449_v3  ;;  %v222_v58 = vunpack.c.h.bf16 %v80_v53 }
  0x1c   :  { %1093 = vmatmul.mubr.msk.f32.gmra.mrb[2].mxu0 %vm235_vm0, %v1560_v57  ;;  %1097 = vmatmul.mubr.msk.f32.gmra.mrb[2].mxu1 %vm235_vm0, %v1560_v57 }
  0x1d   :  { %1167 = vmatpush1.bf16.msra.mxu0 %v1275_v60  ;;  %1183 = vmatpush1.bf16.msra.mxu1 %v1283_v62  ;;  %v25_v60 = vld [vmem:[%s1986_s0 + $0x70] sm:$0xff]  ;;  %v18_v62 = vld [vmem:[%s1986_s0 + $0x38] sm:$0xff] }
  0x1e   :  { %1169 = vmatprep.subr.bf16.mxu0 %v1276_v63  ;;  %1185 = vmatprep.subr.bf16.mxu1 %v1284_v0  ;;  %v26_v63 = vld [vmem:[%s1986_s0 + $0x78] sm:$0xff]  ;;  %v221_v0 = vunpack.c.l.bf16 %v80_v53  ;;  %v1304_v5 = vcombine.high %v17_v59, %v25_v60  ;;  %v1305_v8 = vcombine.low %v17_v59, %v25_v60 }
  0x1f   :  { %324 = vmatprep.mubr.f32.mxu0 %v1449_v3  ;;  %413 = vmatprep.mubr.f32.mxu1 %v1449_v3 }
  0x20   :  { %1094 = vmatmul.mubr.msk.f32.gmra.mrb[4].mxu0 %vm235_vm0, %v1581_v4  ;;  %1098 = vmatmul.mubr.msk.f32.gmra.mrb[4].mxu1 %vm235_vm0, %v1581_v4 }
  0x21   :  { %1171 = vmatpush1.bf16.msra.mxu0 %v1277_v7  ;;  %1187 = vmatpush1.bf16.msra.mxu1 %v1285_v9  ;;  %v42_v7 = vld [vmem:[%s1986_s0 + $0xf8] sm:$0xff]  ;;  %v1312_v9 = vcombine.high %v18_v62, %v26_v63 }
  0x22   :  { %1173 = vmatprep.subr.bf16.mxu0 %v1278_v10  ;;  %1189 = vmatprep.subr.bf16.mxu1 %v1286_v11  ;;  %v1313_v10 = vcombine.low %v18_v62, %v26_v63  ;;  %v1306_v11 = vcombine.high %v33_v1, %v41_v2  ;;  %v1314_v12 = vcombine.high %v34_v6, %v42_v7 }
  0x23   :  { %330 = vmatprep.mubr.f32.mxu0 %v1449_v3  ;;  %419 = vmatprep.mubr.f32.mxu1 %v1449_v3  ;;  %v1315_v19 = vcombine.low %v34_v6, %v42_v7 }
  0x24   :  { %1095 = vmatmul.mubr.msk.f32.gmra.mrb[6].mxu0 %vm235_vm0, %v1601_v13  ;;  %1099 = vmatmul.mubr.msk.f32.gmra.mrb[6].mxu1 %vm235_vm0, %v1601_v13 }
  0x25   :  { %1175 = vmatpush1.bf16.msra.mxu0 %v1279_v15  ;;  %1191 = vmatpush1.bf16.msra.mxu1 %v1287_v16  ;;  %v57_v15 = vld [vmem:[%s1986_s0 + $0x170] sm:$0xff]  ;;  %v50_v16 = vld [vmem:[%s1986_s0 + $0x138] sm:$0xff] }
  0x26   :  { %442 = vmatprep.subr.mxu0 %v216_v17  ;;  %531 = vmatprep.subr.mxu1 %v218_v18  ;;  %v58_v17 = vld [vmem:[%s1986_s0 + $0x178] sm:$0xff]  ;;  %v1307_v18 = vcombine.low %v33_v1, %v41_v2  ;;  %v1308_v20 = vcombine.high %v49_v14, %v57_v15  ;;  %v1309_v26 = vcombine.low %v49_v14, %v57_v15 }
  0x27   :  { %490 = vmatprep.mubr.f32.mxu0 %v1449_v3  ;;  %579 = vmatprep.mubr.f32.mxu1 %v1449_v3 }
  0x29   :  { %443 = vmatpush1.msra.mxu0 %v215_v21  ;;  %532 = vmatpush1.msra.mxu1 %v217_v24  ;;  %v1316_v21 = vcombine.high %v50_v16, %v58_v17  ;;  %v66_v24 = vld [vmem:[%s1986_s0 + $0x1b8] sm:$0xff] }
  0x2a   :  { %1100 = vmatmul.mubr.msk.f32.vlgmr.msra.gmra.mrb[8].mxu0 %vm235_vm0, %v1536_v44  ;;  %1104 = vmatmul.mubr.msk.f32.vlgmr.msra.gmra.mrb[8].mxu1 %vm235_vm0, %v1536_v44  ;;  %v1318_v29 = vcombine.high %v66_v24, %v74_v25 }
  0x2b   :  { %1193 = vmatprep.subr.bf16.mxu0 %v1288_v27  ;;  %1209 = vmatprep.subr.bf16.mxu1 %v1296_v31  ;;  %v1317_v27 = vcombine.low %v50_v16, %v58_v17  ;;  %v82_v31 = vld [vmem:[%s1986_s0 + $0x238] sm:$0xff] }
  0x2c   :  { %1195 = vmatpush1.bf16.msra.mxu0 %v1289_v30  ;;  %1211 = vmatpush1.bf16.msra.mxu1 %v1297_v32  ;;  %v81_v30 = vld [vmem:[%s1986_s0 + $0x230] sm:$0xff]  ;;  %v1311_v32 = vcombine.low %v65_v22, %v73_v23  ;;  %v226_v35 = vunpack.c.h.bf16 %v82_v31  ;;  %v225_v37 = vunpack.c.l.bf16 %v82_v31 }
  0x2d   :  { %1197 = vmatprep.subr.bf16.mxu0 %v1290_v33  ;;  %1213 = vmatprep.subr.bf16.mxu1 %v1298_v34  ;;  %v1319_v33 = vcombine.low %v66_v24, %v74_v25  ;;  %v224_v34 = vunpack.c.h.bf16 %v81_v30  ;;  %v223_v36 = vunpack.c.l.bf16 %v81_v30 }
  0x2e   :  { %496 = vmatprep.mubr.f32.mxu0 %v1449_v3  ;;  %585 = vmatprep.mubr.f32.mxu1 %v1449_v3 }
  0x2f   :  { %1101 = vmatmul.mubr.msk.f32.gmra.mrb[10].mxu0 %vm235_vm0, %v1560_v57  ;;  %1105 = vmatmul.mubr.msk.f32.gmra.mrb[10].mxu1 %vm235_vm0, %v1560_v57 }
  0x30   :  { %1199 = vmatpush1.bf16.msra.mxu0 %v1291_v39  ;;  %1215 = vmatpush1.bf16.msra.mxu1 %v1299_v40 }
  0x31   :  { %1201 = vmatprep.subr.bf16.mxu0 %v1292_v41  ;;  %1217 = vmatprep.subr.bf16.mxu1 %v1300_v42 }
  0x32   :  { %502 = vmatprep.mubr.f32.mxu0 %v1449_v3  ;;  %591 = vmatprep.mubr.f32.mxu1 %v1449_v3 }
  0x33   :  { %1102 = vmatmul.mubr.msk.f32.gmra.mrb[12].mxu0 %vm235_vm0, %v1581_v4  ;;  %1106 = vmatmul.mubr.msk.f32.gmra.mrb[12].mxu1 %vm235_vm0, %v1581_v4 }
  0x34   :  { %1203 = vmatpush1.bf16.msra.mxu0 %v1293_v48  ;;  %1219 = vmatpush1.bf16.msra.mxu1 %v1301_v49 }
  0x35   :  { %1205 = vmatprep.subr.bf16.mxu0 %v1294_v50  ;;  %1221 = vmatprep.subr.bf16.mxu1 %v1302_v51 }
  0x36   :  { %508 = vmatprep.mubr.f32.mxu0 %v1449_v3  ;;  %597 = vmatprep.mubr.f32.mxu1 %v1449_v3 }
  0x37   :  { %1103 = vmatmul.mubr.msk.f32.gmra.mrb[14].mxu0 %vm235_vm0, %v1601_v13  ;;  %1107 = vmatmul.mubr.msk.f32.gmra.mrb[14].mxu1 %vm235_vm0, %v1601_v13 }
  0x38   :  { %1207 = vmatpush1.bf16.msra.mxu0 %v1295_v54  ;;  %1223 = vmatpush1.bf16.msra.mxu1 %v1303_v55 }
  0x39   :  { %620 = vmatprep.subr.mxu0 %v220_v56  ;;  %709 = vmatprep.subr.mxu1 %v222_v58 }
  0x3a   :  { %668 = vmatprep.mubr.f32.mxu0 %v1449_v3  ;;  %757 = vmatprep.mubr.f32.mxu1 %v1449_v3 }
  0x3c   :  { %621 = vmatpush1.msra.mxu0 %v219_v61  ;;  %710 = vmatpush1.msra.mxu1 %v221_v0 }
  0x3d   :  { %1108 = vmatmul.mubr.msk.f32.vlgmr.msra.gmra.mrb[16].mxu0 %vm235_vm0, %v1536_v44  ;;  %1112 = vmatmul.mubr.msk.f32.vlgmr.msra.gmra.mrb[16].mxu1 %vm235_vm0, %v1536_v44 }
  0x3e   :  { %1225 = vmatprep.subr.bf16.mxu0 %v1304_v5  ;;  %1241 = vmatprep.subr.bf16.mxu1 %v1312_v9 }
  0x3f   :  { %1227 = vmatpush1.bf16.msra.mxu0 %v1305_v8  ;;  %1243 = vmatpush1.bf16.msra.mxu1 %v1313_v10 }
  0x40   :  { %1229 = vmatprep.subr.bf16.mxu0 %v1306_v11  ;;  %1245 = vmatprep.subr.bf16.mxu1 %v1314_v12 }
  0x41   :  { %674 = vmatprep.mubr.f32.mxu0 %v1449_v3  ;;  %763 = vmatprep.mubr.f32.mxu1 %v1449_v3 }
  0x42   :  { %1109 = vmatmul.mubr.msk.f32.gmra.mrb[18].mxu0 %vm235_vm0, %v1560_v57  ;;  %1113 = vmatmul.mubr.msk.f32.gmra.mrb[18].mxu1 %vm235_vm0, %v1560_v57 }
  0x43   :  { %1231 = vmatpush1.bf16.msra.mxu0 %v1307_v18  ;;  %1247 = vmatpush1.bf16.msra.mxu1 %v1315_v19 }
  0x44   :  { %1233 = vmatprep.subr.bf16.mxu0 %v1308_v20  ;;  %1249 = vmatprep.subr.bf16.mxu1 %v1316_v21 }
  0x45   :  { %680 = vmatprep.mubr.f32.mxu0 %v1449_v3  ;;  %769 = vmatprep.mubr.f32.mxu1 %v1449_v3 }
  0x46   :  { %1110 = vmatmul.mubr.msk.f32.gmra.mrb[20].mxu0 %vm235_vm0, %v1581_v4  ;;  %1114 = vmatmul.mubr.msk.f32.gmra.mrb[20].mxu1 %vm235_vm0, %v1581_v4 }
  0x47   :  { %1235 = vmatpush1.bf16.msra.mxu0 %v1309_v26  ;;  %1251 = vmatpush1.bf16.msra.mxu1 %v1317_v27 }
  0x48   :  { %1237 = vmatprep.subr.bf16.mxu0 %v1310_v28  ;;  %1253 = vmatprep.subr.bf16.mxu1 %v1318_v29 }
  0x49   :  { %686 = vmatprep.mubr.f32.mxu0 %v1449_v3  ;;  %775 = vmatprep.mubr.f32.mxu1 %v1449_v3 }
  0x4a   :  { %1111 = vmatmul.mubr.msk.f32.gmra.mrb[22].mxu0 %vm235_vm0, %v1601_v13  ;;  %1115 = vmatmul.mubr.msk.f32.gmra.mrb[22].mxu1 %vm235_vm0, %v1601_v13 }
  0x4b   :  { %1239 = vmatpush1.bf16.msra.mxu0 %v1311_v32  ;;  %1255 = vmatpush1.bf16.msra.mxu1 %v1319_v33 }
  0x4c   :  { %798 = vmatprep.subr.mxu0 %v224_v34  ;;  %887 = vmatprep.subr.mxu1 %v226_v35 }
  0x4d   :  { %846 = vmatprep.mubr.f32.mxu0 %v1449_v3  ;;  %935 = vmatprep.mubr.f32.mxu1 %v1449_v3 }
  0x4f   :  { %799 = vmatpush1.msra.mxu0 %v223_v36  ;;  %888 = vmatpush1.msra.mxu1 %v225_v37 }
  0x50   :  { %1116 = vmatmul.mubr.msk.f32.vlgmr.msra.gmra.mrb[24].mxu0 %vm235_vm0, %v1536_v44  ;;  %1120 = vmatmul.mubr.msk.f32.vlgmr.msra.gmra.mrb[24].mxu1 %vm235_vm0, %v1536_v44 }
  0x51   :  { %852 = vmatprep.mubr.f32.mxu0 %v1449_v3  ;;  %941 = vmatprep.mubr.f32.mxu1 %v1449_v3 }
  0x54   :  { %1117 = vmatmul.mubr.msk.f32.gmra.mrb[26].mxu0 %vm235_vm0, %v1560_v57  ;;  %1121 = vmatmul.mubr.msk.f32.gmra.mrb[26].mxu1 %vm235_vm0, %v1560_v57 }
  0x55   :  { %858 = vmatprep.mubr.f32.mxu0 %v1449_v3  ;;  %947 = vmatprep.mubr.f32.mxu1 %v1449_v3 }
  0x58   :  { %1118 = vmatmul.mubr.msk.f32.gmra.mrb[28].mxu0 %vm235_vm0, %v1581_v4  ;;  %1122 = vmatmul.mubr.msk.f32.gmra.mrb[28].mxu1 %vm235_vm0, %v1581_v4 }
  0x59   :  { %864 = vmatprep.mubr.f32.mxu0 %v1449_v3  ;;  %953 = vmatprep.mubr.f32.mxu1 %v1449_v3 }
  0x5c   :  { %1119 = vmatmul.mubr.msk.f32.gmra.mrb[30].mxu0 %vm235_vm0, %v1601_v13  ;;  %1123 = vmatmul.mubr.msk.f32.gmra.mrb[30].mxu1 %vm235_vm0, %v1601_v13 }
  0xea   :  { %v314_v44 = vpop.f32.mrb[0].mxu0  ;;  %v403_v57 = vpop.f32.mrb[0].mxu1 }
  0xeb   :  { %1321 = vtanh.f32 %v314_v44  ;;  %v316_v38 = vpop.f32.mrb[1].mxu0  ;;  %v405_v39 = vpop.f32.mrb[1].mxu1 }
  0xec   :  { %1323 = vtanh.f32 %v403_v57 }
  0xed   :  { %1325 = vtanh.f32 %v316_v38 }
  0xee   :  { %1327 = vtanh.f32 %v405_v39 }
  0xef   :  { %v320_v40 = vpop.f32.mrb[2].mxu0  ;;  %v409_v4 = vpop.f32.mrb[2].mxu1 }
  0xf0   :  { %1329 = vtanh.f32 %v320_v40  ;;  %v322_v41 = vpop.f32.mrb[3].mxu0  ;;  %v411_v3 = vpop.f32.mrb[3].mxu1 }
  0xf1   :  { %1331 = vtanh.f32 %v409_v4 }
  0xf2   :  { %1333 = vtanh.f32 %v322_v41 }
  0xf3   :  { %1335 = vtanh.f32 %v411_v3  ;;  %v326_v42 = vpop.f32.mrb[4].mxu0  ;;  %v415_v43 = vpop.f32.mrb[4].mxu1 }
  0xf4   :  { %1337 = vtanh.f32 %v326_v42  ;;  %v328_v13 = vpop.f32.mrb[5].mxu0  ;;  %v417_v46 = vpop.f32.mrb[5].mxu1 }
  0xf5   :  { %v1322_v45 = vpop.eup %1321  ;;  %1339 = vtanh.f32 %v415_v43 }
  0xf6   :  { %v1324_v47 = vpop.eup %1323  ;;  %1024 = vst [vmem:[%s1988_s2] sm:$0xff] %v1322_v45  ;;  %1341 = vtanh.f32 %v328_v13 }
  0xf7   :  { %v1326_v48 = vpop.eup %1325  ;;  %1026 = vst [vmem:[%s1988_s2 + $0x10] sm:$0xff] %v1324_v47  ;;  %1343 = vtanh.f32 %v417_v46  ;;  %v332_v49 = vpop.f32.mrb[6].mxu0 }
  0xf8   :  { %v1328_v50 = vpop.eup %1327  ;;  %1025 = vst [vmem:[%s1988_s2 + $0x8] sm:$0xff] %v1326_v48  ;;  %1345 = vtanh.f32 %v332_v49  ;;  %v421_v51 = vpop.f32.mrb[6].mxu1 }
  0xf9   :  { %v334_v52 = vpop.f32.mrb[7].mxu0  ;;  %1027 = vst [vmem:[%s1988_s2 + $0x18] sm:$0xff] %v1328_v50  ;;  %1347 = vtanh.f32 %v421_v51  ;;  %v423_v53 = vpop.f32.mrb[7].mxu1 }
  0xfa   :  { %v1330_v54 = vpop.eup %1329  ;;  %1349 = vtanh.f32 %v334_v52 }
  0xfb   :  { %v1332_v55 = vpop.eup %1331  ;;  %1040 = vst [vmem:[%s1988_s2 + $0x80] sm:$0xff] %v1330_v54  ;;  %1351 = vtanh.f32 %v423_v53 }
  0xfc   :  { %v1334_v56 = vpop.eup %1333  ;;  %1042 = vst [vmem:[%s1988_s2 + $0x90] sm:$0xff] %v1332_v55 }
  0xfd   :  { %v1336_v58 = vpop.eup %1335  ;;  %1041 = vst [vmem:[%s1988_s2 + $0x88] sm:$0xff] %v1334_v56  ;;  %v492_v59 = vpop.f32.mrb[8].mxu0 }
  0xfe   :  { %v1338_v60 = vpop.eup %1337  ;;  %1043 = vst [vmem:[%s1988_s2 + $0x98] sm:$0xff] %v1336_v58  ;;  %1353 = vtanh.f32 %v492_v59  ;;  %v581_v61 = vpop.f32.mrb[8].mxu1 }
  0xff   :  { %v494_v62 = vpop.f32.mrb[9].mxu0  ;;  %v1340_v63 = vpop.eup %1339  ;;  %1056 = vst [vmem:[%s1988_s2 + $0x100] sm:$0xff] %v1338_v60  ;;  %1355 = vtanh.f32 %v581_v61 }
 0x100   :  { %v583_v0 = vpop.f32.mrb[9].mxu1  ;;  %v1342_v1 = vpop.eup %1341  ;;  %1058 = vst [vmem:[%s1988_s2 + $0x110] sm:$0xff] %v1340_v63  ;;  %1357 = vtanh.f32 %v494_v62 }
 0x101   :  { %v1344_v2 = vpop.eup %1343  ;;  %1057 = vst [vmem:[%s1988_s2 + $0x108] sm:$0xff] %v1342_v1  ;;  %1359 = vtanh.f32 %v583_v0 }
 0x102   :  { %v1346_v5 = vpop.eup %1345  ;;  %1059 = vst [vmem:[%s1988_s2 + $0x118] sm:$0xff] %v1344_v2  ;;  %v498_v6 = vpop.f32.mrb[10].mxu0 }
 0x103   :  { %v1348_v7 = vpop.eup %1347  ;;  %1072 = vst [vmem:[%s1988_s2 + $0x180] sm:$0x7] %v1346_v5  ;;  %1361 = vtanh.f32 %v498_v6  ;;  %v587_v8 = vpop.f32.mrb[10].mxu1 }
 0x104   :  { %v500_v9 = vpop.f32.mrb[11].mxu0  ;;  %v1350_v10 = vpop.eup %1349  ;;  %1074 = vst [vmem:[%s1988_s2 + $0x190] sm:$0x7] %v1348_v7  ;;  %1363 = vtanh.f32 %v587_v8 }
 0x105   :  { %v589_v11 = vpop.f32.mrb[11].mxu1  ;;  %v1352_v12 = vpop.eup %1351  ;;  %1073 = vst [vmem:[%s1988_s2 + $0x188] sm:$0x7] %v1350_v10  ;;  %1365 = vtanh.f32 %v500_v9 }
 0x106   :  { %1075 = vst [vmem:[%s1988_s2 + $0x198] sm:$0x7] %v1352_v12  ;;  %1367 = vtanh.f32 %v589_v11  ;;  %v504_v14 = vpop.f32.mrb[12].mxu0  ;;  %v593_v15 = vpop.f32.mrb[12].mxu1 }
 0x107   :  { %1369 = vtanh.f32 %v504_v14  ;;  %v506_v16 = vpop.f32.mrb[13].mxu0  ;;  %v595_v18 = vpop.f32.mrb[13].mxu1 }
 0x108   :  { %v1354_v17 = vpop.eup %1353  ;;  %1371 = vtanh.f32 %v593_v15 }
 0x109   :  { %v1356_v19 = vpop.eup %1355  ;;  %1028 = vst [vmem:[%s1988_s2 + $0x20] sm:$0xff] %v1354_v17  ;;  %1373 = vtanh.f32 %v506_v16 }
 0x10a   :  { %v1358_v20 = vpop.eup %1357  ;;  %1030 = vst [vmem:[%s1988_s2 + $0x30] sm:$0xff] %v1356_v19  ;;  %1375 = vtanh.f32 %v595_v18  ;;  %v510_v21 = vpop.f32.mrb[14].mxu0 }
 0x10b   :  { %v1360_v22 = vpop.eup %1359  ;;  %1029 = vst [vmem:[%s1988_s2 + $0x28] sm:$0xff] %v1358_v20  ;;  %1377 = vtanh.f32 %v510_v21  ;;  %v599_v23 = vpop.f32.mrb[14].mxu1 }
 0x10c   :  { %v512_v24 = vpop.f32.mrb[15].mxu0  ;;  %1031 = vst [vmem:[%s1988_s2 + $0x38] sm:$0xff] %v1360_v22  ;;  %1379 = vtanh.f32 %v599_v23  ;;  %v601_v25 = vpop.f32.mrb[15].mxu1 }
 0x10d   :  { %v1362_v26 = vpop.eup %1361  ;;  %1381 = vtanh.f32 %v512_v24 }
 0x10e   :  { %v1364_v27 = vpop.eup %1363  ;;  %1044 = vst [vmem:[%s1988_s2 + $0xa0] sm:$0xff] %v1362_v26  ;;  %1383 = vtanh.f32 %v601_v25 }
 0x10f   :  { %v1366_v28 = vpop.eup %1365  ;;  %1046 = vst [vmem:[%s1988_s2 + $0xb0] sm:$0xff] %v1364_v27 }
 0x110   :  { %v1368_v29 = vpop.eup %1367  ;;  %1045 = vst [vmem:[%s1988_s2 + $0xa8] sm:$0xff] %v1366_v28  ;;  %v670_v30 = vpop.f32.mrb[16].mxu0 }
 0x111   :  { %v1370_v31 = vpop.eup %1369  ;;  %1047 = vst [vmem:[%s1988_s2 + $0xb8] sm:$0xff] %v1368_v29  ;;  %1385 = vtanh.f32 %v670_v30  ;;  %v759_v32 = vpop.f32.mrb[16].mxu1 }
 0x112   :  { %v672_v33 = vpop.f32.mrb[17].mxu0  ;;  %v1372_v34 = vpop.eup %1371  ;;  %1060 = vst [vmem:[%s1988_s2 + $0x120] sm:$0xff] %v1370_v31  ;;  %1387 = vtanh.f32 %v759_v32 }
 0x113   :  { %v761_v35 = vpop.f32.mrb[17].mxu1  ;;  %v1374_v36 = vpop.eup %1373  ;;  %1062 = vst [vmem:[%s1988_s2 + $0x130] sm:$0xff] %v1372_v34  ;;  %1389 = vtanh.f32 %v672_v33 }
 0x114   :  { %v1376_v37 = vpop.eup %1375  ;;  %1061 = vst [vmem:[%s1988_s2 + $0x128] sm:$0xff] %v1374_v36  ;;  %1391 = vtanh.f32 %v761_v35 }
 0x115   :  { %v1378_v44 = vpop.eup %1377  ;;  %1063 = vst [vmem:[%s1988_s2 + $0x138] sm:$0xff] %v1376_v37  ;;  %v676_v57 = vpop.f32.mrb[18].mxu0 }
 0x116   :  { %v1380_v38 = vpop.eup %1379  ;;  %1076 = vst [vmem:[%s1988_s2 + $0x1a0] sm:$0x7] %v1378_v44  ;;  %1393 = vtanh.f32 %v676_v57  ;;  %v765_v39 = vpop.f32.mrb[18].mxu1 }
 0x117   :  { %v678_v40 = vpop.f32.mrb[19].mxu0  ;;  %v1382_v4 = vpop.eup %1381  ;;  %1078 = vst [vmem:[%s1988_s2 + $0x1b0] sm:$0x7] %v1380_v38  ;;  %1395 = vtanh.f32 %v765_v39 }
 0x118   :  { %v767_v41 = vpop.f32.mrb[19].mxu1  ;;  %v1384_v3 = vpop.eup %1383  ;;  %1077 = vst [vmem:[%s1988_s2 + $0x1a8] sm:$0x7] %v1382_v4  ;;  %1397 = vtanh.f32 %v678_v40 }
 0x119   :  { %1079 = vst [vmem:[%s1988_s2 + $0x1b8] sm:$0x7] %v1384_v3  ;;  %1399 = vtanh.f32 %v767_v41  ;;  %v682_v42 = vpop.f32.mrb[20].mxu0  ;;  %v771_v43 = vpop.f32.mrb[20].mxu1 }
 0x11a   :  { %1401 = vtanh.f32 %v682_v42  ;;  %v684_v13 = vpop.f32.mrb[21].mxu0  ;;  %v773_v46 = vpop.f32.mrb[21].mxu1 }
 0x11b   :  { %v1386_v45 = vpop.eup %1385  ;;  %1403 = vtanh.f32 %v771_v43 }
 0x11c   :  { %v1388_v47 = vpop.eup %1387  ;;  %1032 = vst [vmem:[%s1988_s2 + $0x40] sm:$0xff] %v1386_v45  ;;  %1405 = vtanh.f32 %v684_v13 }
 0x11d   :  { %v1390_v48 = vpop.eup %1389  ;;  %1034 = vst [vmem:[%s1988_s2 + $0x50] sm:$0xff] %v1388_v47  ;;  %1407 = vtanh.f32 %v773_v46  ;;  %v688_v49 = vpop.f32.mrb[22].mxu0 }
 0x11e   :  { %v1392_v50 = vpop.eup %1391  ;;  %1033 = vst [vmem:[%s1988_s2 + $0x48] sm:$0xff] %v1390_v48  ;;  %1409 = vtanh.f32 %v688_v49  ;;  %v777_v51 = vpop.f32.mrb[22].mxu1 }
 0x11f   :  { %v690_v52 = vpop.f32.mrb[23].mxu0  ;;  %1035 = vst [vmem:[%s1988_s2 + $0x58] sm:$0xff] %v1392_v50  ;;  %1411 = vtanh.f32 %v777_v51  ;;  %v779_v53 = vpop.f32.mrb[23].mxu1 }
 0x120   :  { %v1394_v54 = vpop.eup %1393  ;;  %1413 = vtanh.f32 %v690_v52 }
 0x121   :  { %v1396_v55 = vpop.eup %1395  ;;  %1048 = vst [vmem:[%s1988_s2 + $0xc0] sm:$0xff] %v1394_v54  ;;  %1415 = vtanh.f32 %v779_v53 }
 0x122   :  { %v1398_v56 = vpop.eup %1397  ;;  %1050 = vst [vmem:[%s1988_s2 + $0xd0] sm:$0xff] %v1396_v55 }
 0x123   :  { %v1400_v58 = vpop.eup %1399  ;;  %1049 = vst [vmem:[%s1988_s2 + $0xc8] sm:$0xff] %v1398_v56  ;;  %v848_v59 = vpop.f32.mrb[24].mxu0 }
 0x124   :  { %v1402_v60 = vpop.eup %1401  ;;  %1051 = vst [vmem:[%s1988_s2 + $0xd8] sm:$0xff] %v1400_v58  ;;  %1417 = vtanh.f32 %v848_v59  ;;  %v937_v61 = vpop.f32.mrb[24].mxu1 }
 0x125   :  { %v850_v62 = vpop.f32.mrb[25].mxu0  ;;  %v1404_v63 = vpop.eup %1403  ;;  %1064 = vst [vmem:[%s1988_s2 + $0x140] sm:$0xff] %v1402_v60  ;;  %1419 = vtanh.f32 %v937_v61 }
 0x126   :  { %v939_v0 = vpop.f32.mrb[25].mxu1  ;;  %v1406_v1 = vpop.eup %1405  ;;  %1066 = vst [vmem:[%s1988_s2 + $0x150] sm:$0xff] %v1404_v63  ;;  %1421 = vtanh.f32 %v850_v62 }
 0x127   :  { %v1408_v2 = vpop.eup %1407  ;;  %1065 = vst [vmem:[%s1988_s2 + $0x148] sm:$0xff] %v1406_v1  ;;  %1423 = vtanh.f32 %v939_v0  ;;  %v854_v5 = vpop.f32.mrb[26].mxu0 }
 0x128   :  { %v1410_v6 = vpop.eup %1409  ;;  %1067 = vst [vmem:[%s1988_s2 + $0x158] sm:$0xff] %v1408_v2  ;;  %1425 = vtanh.f32 %v854_v5  ;;  %v943_v7 = vpop.f32.mrb[26].mxu1 }
 0x129   :  { %v856_v8 = vpop.f32.mrb[27].mxu0  ;;  %v1412_v9 = vpop.eup %1411  ;;  %1080 = vst [vmem:[%s1988_s2 + $0x1c0] sm:$0x7] %v1410_v6  ;;  %1427 = vtanh.f32 %v943_v7 }
 0x12a   :  { %v945_v10 = vpop.f32.mrb[27].mxu1  ;;  %v1414_v11 = vpop.eup %1413  ;;  %1082 = vst [vmem:[%s1988_s2 + $0x1d0] sm:$0x7] %v1412_v9  ;;  %1429 = vtanh.f32 %v856_v8 }
 0x12b   :  { %v1416_v12 = vpop.eup %1415  ;;  %1081 = vst [vmem:[%s1988_s2 + $0x1c8] sm:$0x7] %v1414_v11  ;;  %1431 = vtanh.f32 %v945_v10  ;;  %v860_v14 = vpop.f32.mrb[28].mxu0 }
 0x12c   :  { %1083 = vst [vmem:[%s1988_s2 + $0x1d8] sm:$0x7] %v1416_v12  ;;  %1433 = vtanh.f32 %v860_v14  ;;  %v949_v15 = vpop.f32.mrb[28].mxu1  ;;  %v862_v16 = vpop.f32.mrb[29].mxu0 }
 0x12d   :  { %1435 = vtanh.f32 %v949_v15  ;;  %v951_v17 = vpop.f32.mrb[29].mxu1 }
 0x12e   :  { %v1418_v18 = vpop.eup %1417  ;;  %1437 = vtanh.f32 %v862_v16 }
 0x12f   :  { %v1420_v19 = vpop.eup %1419  ;;  %1036 = vst [vmem:[%s1988_s2 + $0x60] sm:$0xff] %v1418_v18  ;;  %1439 = vtanh.f32 %v951_v17  ;;  %v866_v20 = vpop.f32.mrb[30].mxu0 }
 0x130   :  { %v1422_v21 = vpop.eup %1421  ;;  %1038 = vst [vmem:[%s1988_s2 + $0x70] sm:$0xff] %v1420_v19  ;;  %1441 = vtanh.f32 %v866_v20  ;;  %v955_v22 = vpop.f32.mrb[30].mxu1 }
 0x131   :  { %v868_v23 = vpop.f32.mrb[31].mxu0  ;;  %v1424_v24 = vpop.eup %1423  ;;  %1037 = vst [vmem:[%s1988_s2 + $0x68] sm:$0xff] %v1422_v21  ;;  %1443 = vtanh.f32 %v955_v22 }
 0x132   :  { %v957_v25 = vpop.f32.mrb[31].mxu1  ;;  %v1426_v26 = vpop.eup %1425  ;;  %1039 = vst [vmem:[%s1988_s2 + $0x78] sm:$0xff] %v1424_v24  ;;  %1445 = vtanh.f32 %v868_v23 }
 0x133   :  { %v1428_v27 = vpop.eup %1427  ;;  %1052 = vst [vmem:[%s1988_s2 + $0xe0] sm:$0xff] %v1426_v26  ;;  %1447 = vtanh.f32 %v957_v25 }
 0x134   :  { %v1430_v28 = vpop.eup %1429  ;;  %1054 = vst [vmem:[%s1988_s2 + $0xf0] sm:$0xff] %v1428_v27 }
 0x135   :  { %v1432_v29 = vpop.eup %1431  ;;  %1053 = vst [vmem:[%s1988_s2 + $0xe8] sm:$0xff] %v1430_v28 }
 0x136   :  { %v1434_v30 = vpop.eup %1433  ;;  %1055 = vst [vmem:[%s1988_s2 + $0xf8] sm:$0xff] %v1432_v29 }
 0x137   :  { %v1436_v31 = vpop.eup %1435  ;;  %1068 = vst [vmem:[%s1988_s2 + $0x160] sm:$0xff] %v1434_v30 }
 0x138   :  { %v1438_v32 = vpop.eup %1437  ;;  %1070 = vst [vmem:[%s1988_s2 + $0x170] sm:$0xff] %v1436_v31 }
 0x139   :  { %v1440_v33 = vpop.eup %1439  ;;  %1069 = vst [vmem:[%s1988_s2 + $0x168] sm:$0xff] %v1438_v32 }
 0x13a   :  { %v1442_v34 = vpop.eup %1441  ;;  %1071 = vst [vmem:[%s1988_s2 + $0x178] sm:$0xff] %v1440_v33 }
 0x13b   :  { %v1444_v35 = vpop.eup %1443  ;;  %1084 = vst [vmem:[%s1988_s2 + $0x1e0] sm:$0x7] %v1442_v34 }
 0x13c   :  { %v1446_v36 = vpop.eup %1445  ;;  %1086 = vst [vmem:[%s1988_s2 + $0x1f0] sm:$0x7] %v1444_v35 }
 0x13d   :  { %v1448_v37 = vpop.eup %1447  ;;  %1085 = vst [vmem:[%s1988_s2 + $0x1e8] sm:$0x7] %v1446_v36 }
 0x13e   :  { %1087 = vst [vmem:[%s1988_s2 + $0x1f8] sm:$0x7] %v1448_v37 }

</bundles_post_ra>
